<compile_context>
chip_gen: v6e
topology: v6e:2x2x1
jax: 0.10.0
libtpu: 0.0.40
codegen_flags: <defaults>
</compile_context>

<pallas_src>
import jax
import jax.numpy as jnp
import numpy as np
from jax.experimental import pallas as pl
from jax.experimental.pallas import tpu as pltpu  # noqa: F401  (no grid/scratch needed here)

NUM_HIDDEN = 8
NUM_LAYERS = 5


# ----------------------------------------------------------------------------
# Fused Pallas kernel: 5 LSTM layers + Linear head, everything VMEM resident.
# ----------------------------------------------------------------------------
def _mv_lstm_fused_kernel(x_ref, wih0_ref, wihr_ref, whh_ref, bias_ref,
                          h0_ref, c0_ref, lin_w_ref, lin_b_ref,
                          out_ref, hN_ref, cN_ref):
    """Whole forward pass in one program (no grid).

    x_ref    : (B, T, F)        input sequence
    wih0_ref : (F, 4H)          layer-0 W_ih^T   (gate columns ordered [i,f,o,g])
    wihr_ref : (L-1, H, 4H)     W_ih^T for layers 1..L-1
    whh_ref  : (L, H, 4H)       W_hh^T per layer
    bias_ref : (L, 1, 4H)       b_ih + b_hh per layer
    h0_ref   : (L, B, H)        initial hidden states
    c0_ref   : (L, B, H)        initial cell states
    lin_w_ref: (H, 1)           final linear weight^T
    lin_b_ref: (1, 1)           final linear bias
    out_ref  : (B, 1)           linear(last hidden of last layer)
    hN_ref   : (L, B, H)        final hidden states
    cN_ref   : (L, B, H)        final cell states
    """
    B, T, _ = x_ref.shape
    L = h0_ref.shape[0]
    H = h0_ref.shape[2]

    # Current layer's input sequence as a list of (B, F_in) timestep slices.
    layer_in = [x_ref[:, t, :] for t in range(T)]

    h = None
    for layer in range(L):
        wih = wih0_ref[...] if layer == 0 else wihr_ref[layer - 1]
        whh = whh_ref[layer]            # (H, 4H)
        bias = bias_ref[layer]          # (1, 4H)

        # Precompute the input projection for all timesteps: these T small
        # matmuls are independent of the recurrence and schedule off the
        # serial critical path.
        gx = [jnp.dot(layer_in[t], wih, preferred_element_type=jnp.float32) + bias
              for t in range(T)]

        h = h0_ref[layer]               # (B, H)
        c = c0_ref[layer]               # (B, H)
        ys = []
        for t in range(T):
            g = gx[t] + jnp.dot(h, whh, preferred_element_type=jnp.float32)  # (B, 4H)
            # Gate columns are pre-permuted to [i | f | o | g]:
            #   one sigmoid over the first 3H columns, one tanh over the last H.
            sig = jax.nn.sigmoid(g[:, :3 * H])
            i_g = sig[:, 0 * H:1 * H]
            f_g = sig[:, 1 * H:2 * H]
            o_g = sig[:, 2 * H:3 * H]
            g_g = jnp.tanh(g[:, 3 * H:])
            c = f_g * c + i_g * g_g
            h = o_g * jnp.tanh(c)
            ys.append(h)

        # Final states written exactly once per layer.
        hN_ref[layer] = h
        cN_ref[layer] = c
        layer_in = ys                   # next layer consumes this layer's outputs

    # Linear head on lstm_out[:, -1, :] (= final h of the last layer).
    out_ref[...] = (jnp.dot(h, lin_w_ref[...], preferred_element_type=jnp.float32)
                    + lin_b_ref[...])


# ----------------------------------------------------------------------------
# Wrapper
# ----------------------------------------------------------------------------
def mv_lstm_forward(params, x, h):
    """Pallas implementation of MV_LSTM.forward(x, h).

    x: (B, T, n_features) float32
    h: tuple (h0, c0), each (num_layers, B, hidden)
    returns (out_linear, (h_n, c_n)) matching the PyTorch module.
    """
    h0_all, c0_all = h
    B = x.shape[0]

    out, h_n, c_n = pl.pallas_call(
        _mv_lstm_fused_kernel,
        out_shape=(
            jax.ShapeDtypeStruct((B, 1), jnp.float32),
            jax.ShapeDtypeStruct((NUM_LAYERS, B, NUM_HIDDEN), jnp.float32),
            jax.ShapeDtypeStruct((NUM_LAYERS, B, NUM_HIDDEN), jnp.float32),
        ),
    )(x, params["wih0"], params["wih_rest"], params["whh"], params["bias"],
      h0_all, c0_all, params["lin_w_t"], params["lin_b"])
    return out, (h_n, c_n)


# ----------------------------------------------------------------------------
# Parameters: raw torch-style init + kernel-layout preparation.
# ----------------------------------------------------------------------------
def init_raw_params(key, n_features, hidden=NUM_HIDDEN, layers=NUM_LAYERS):
    """torch.nn.LSTM-style params: per layer (w_ih, w_hh, b_ih, b_hh), gates [i,f,g,o]."""
    raw = {"lstm": []}
    bound = 1.0 / np.sqrt(hidden)
    for layer in range(layers):
        in_dim = n_features if layer == 0 else hidden
        key, k1, k2, k3, k4 = jax.random.split(key, 5)
        w_ih = jax.random.uniform(k1, (4 * hidden, in_dim), jnp.float32, -bound, bound)
        w_hh = jax.random.uniform(k2, (4 * hidden, hidden), jnp.float32, -bound, bound)
        b_ih = jax.random.uniform(k3, (4 * hidden,), jnp.float32, -bound, bound)
        b_hh = jax.random.uniform(k4, (4 * hidden,), jnp.float32, -bound, bound)
        raw["lstm"].append((w_ih, w_hh, b_ih, b_hh))
    key, k5, k6 = jax.random.split(key, 3)
    raw["lin_w"] = jax.random.uniform(k5, (1, hidden), jnp.float32, -bound, bound)
    raw["lin_b"] = jax.random.uniform(k6, (1,), jnp.float32, -bound, bound)
    return raw


# Permutation of the 4H gate axis: PyTorch [i, f, g, o] -> kernel [i, f, o, g]
# so sigmoid covers the first 3H columns and tanh the last H.
_GATE_PERM = np.concatenate([
    np.arange(0 * NUM_HIDDEN, 1 * NUM_HIDDEN),   # i
    np.arange(1 * NUM_HIDDEN, 2 * NUM_HIDDEN),   # f
    np.arange(3 * NUM_HIDDEN, 4 * NUM_HIDDEN),   # o
    np.arange(2 * NUM_HIDDEN, 3 * NUM_HIDDEN),   # g
])


def prepare_kernel_params(raw):
    wih0 = None
    wih_rest, whh_all, bias_all = [], [], []
    for layer, (w_ih, w_hh, b_ih, b_hh) in enumerate(raw["lstm"]):
        wih_t = jnp.transpose(w_ih)[:, _GATE_PERM]     # (in, 4H), columns [i,f,o,g]
        whh_t = jnp.transpose(w_hh)[:, _GATE_PERM]     # (H, 4H)
        bias = (b_ih + b_hh)[_GATE_PERM][None, :]      # (1, 4H)
        if layer == 0:
            wih0 = wih_t
        else:
            wih_rest.append(wih_t)
        whh_all.append(whh_t)
        bias_all.append(bias)
    return {
        "wih0": wih0,                            # (F, 4H)
        "wih_rest": jnp.stack(wih_rest, 0),      # (L-1, H, 4H)
        "whh": jnp.stack(whh_all, 0),            # (L, H, 4H)
        "bias": jnp.stack(bias_all, 0),          # (L, 1, 4H)
        "lin_w_t": jnp.transpose(raw["lin_w"]),  # (H, 1)
        "lin_b": raw["lin_b"][None, :],          # (1, 1)
    }


# ----------------------------------------------------------------------------
# Pure-JAX reference (torch-layout params, standard [i,f,g,o] gate order).
# ----------------------------------------------------------------------------
def reference_forward(raw, x, h):
    h0_all, c0_all = h
    H = NUM_HIDDEN
    layer_in = x
    h_f, c_f = [], []
    for layer in range(NUM_LAYERS):
        w_ih, w_hh, b_ih, b_hh = raw["lstm"][layer]
        h_t = h0_all[layer]
        c_t = c0_all[layer]
        ys = []
        for t in range(layer_in.shape[1]):
            g = layer_in[:, t, :] @ w_ih.T + h_t @ w_hh.T + b_ih + b_hh
            i = jax.nn.sigmoid(g[:, 0 * H:1 * H])
            f = jax.nn.sigmoid(g[:, 1 * H:2 * H])
            gg = jnp.tanh(g[:, 2 * H:3 * H])
            o = jax.nn.sigmoid(g[:, 3 * H:4 * H])
            c_t = f * c_t + i * gg
            h_t = o * jnp.tanh(c_t)
            ys.append(h_t)
        layer_in = jnp.stack(ys, axis=1)
        h_f.append(h_t)
        c_f.append(c_t)
    out = layer_in[:, -1, :] @ raw["lin_w"].T + raw["lin_b"]
    return out, (jnp.stack(h_f, 0), jnp.stack(c_f, 0))


# ----------------------------------------------------------------------------
if __name__ == "__main__":
    B, T, F = 2, 8, 4          # batch, seq_len, n_features

    key = jax.random.PRNGKey(0)
    key, kx = jax.random.split(key)
    x = jax.random.normal(kx, (B, T, F), dtype=jnp.float32)

    raw = init_raw_params(jax.random.PRNGKey(0), n_features=F)
    params = prepare_kernel_params(raw)

    # init_hidden(batch_size): zeros of shape (num_layers, B, hidden)
    h0 = jnp.zeros((NUM_LAYERS, B, NUM_HIDDEN), jnp.float32)
    c0 = jnp.zeros((NUM_LAYERS, B, NUM_HIDDEN), jnp.float32)

    out, (h_n, c_n) = mv_lstm_forward(params, x, (h0, c0))
    out = jax.block_until_ready(out)
    h_n = jax.block_until_ready(h_n)
    c_n = jax.block_until_ready(c_n)

    ref_out, (ref_h, ref_c) = reference_forward(raw, x, (h0, c0))
    np.testing.assert_allclose(np.asarray(out), np.asarray(ref_out), rtol=1e-5, atol=1e-5)
    np.testing.assert_allclose(np.asarray(h_n), np.asarray(ref_h), rtol=1e-5, atol=1e-5)
    np.testing.assert_allclose(np.asarray(c_n), np.asarray(ref_c), rtol=1e-5, atol=1e-5)

    assert out.shape == (B, 1)
    assert h_n.shape == (NUM_LAYERS, B, NUM_HIDDEN)
    assert c_n.shape == (NUM_LAYERS, B, NUM_HIDDEN)

    print("KERNEL_OK")
</pallas_src>

<mosaic_0001>
module attributes {stable_mosaic.version = 11 : i64} {
  func.func @_mv_lstm_fused_kernel(%arg0: memref<2x8x4xf32, #tpu.memory_space<vmem>>, %arg1: memref<4x32xf32, #tpu.memory_space<vmem>>, %arg2: memref<4x8x32xf32, #tpu.memory_space<vmem>>, %arg3: memref<5x8x32xf32, #tpu.memory_space<vmem>>, %arg4: memref<5x1x32xf32, #tpu.memory_space<vmem>>, %arg5: memref<5x2x8xf32, #tpu.memory_space<vmem>>, %arg6: memref<5x2x8xf32, #tpu.memory_space<vmem>>, %arg7: memref<8x1xf32, #tpu.memory_space<vmem>>, %arg8: memref<1x1xf32, #tpu.memory_space<vmem>>, %arg9: memref<2x1xf32, #tpu.memory_space<vmem>>, %arg10: memref<5x2x8xf32, #tpu.memory_space<vmem>>, %arg11: memref<5x2x8xf32, #tpu.memory_space<vmem>>) attributes {dimension_semantics = [], scalar_prefetch = 0 : i64, scratch_operands = 0 : i64, tpu.core_type = #tpu.core_type<tc>} {
    %c0 = arith.constant 0 : index
    %c0_0 = arith.constant 0 : index
    %c0_1 = arith.constant 0 : index
    %0 = vector.load %arg0[%c0, %c0_0, %c0_1] : memref<2x8x4xf32, #tpu.memory_space<vmem>>, vector<2x1x4xf32>
    %1 = vector.shape_cast %0 : vector<2x1x4xf32> to vector<2x4xf32>
    %c0_2 = arith.constant 0 : index
    %c1 = arith.constant 1 : index
    %c0_3 = arith.constant 0 : index
    %2 = vector.load %arg0[%c0_2, %c1, %c0_3] : memref<2x8x4xf32, #tpu.memory_space<vmem>>, vector<2x1x4xf32>
    %3 = vector.shape_cast %2 : vector<2x1x4xf32> to vector<2x4xf32>
    %c0_4 = arith.constant 0 : index
    %c2 = arith.constant 2 : index
    %c0_5 = arith.constant 0 : index
    %4 = vector.load %arg0[%c0_4, %c2, %c0_5] : memref<2x8x4xf32, #tpu.memory_space<vmem>>, vector<2x1x4xf32>
    %5 = vector.shape_cast %4 : vector<2x1x4xf32> to vector<2x4xf32>
    %c0_6 = arith.constant 0 : index
    %c3 = arith.constant 3 : index
    %c0_7 = arith.constant 0 : index
    %6 = vector.load %arg0[%c0_6, %c3, %c0_7] : memref<2x8x4xf32, #tpu.memory_space<vmem>>, vector<2x1x4xf32>
    %7 = vector.shape_cast %6 : vector<2x1x4xf32> to vector<2x4xf32>
    %c0_8 = arith.constant 0 : index
    %c4 = arith.constant 4 : index
    %c0_9 = arith.constant 0 : index
    %8 = vector.load %arg0[%c0_8, %c4, %c0_9] : memref<2x8x4xf32, #tpu.memory_space<vmem>>, vector<2x1x4xf32>
    %9 = vector.shape_cast %8 : vector<2x1x4xf32> to vector<2x4xf32>
    %c0_10 = arith.constant 0 : index
    %c5 = arith.constant 5 : index
    %c0_11 = arith.constant 0 : index
    %10 = vector.load %arg0[%c0_10, %c5, %c0_11] : memref<2x8x4xf32, #tpu.memory_space<vmem>>, vector<2x1x4xf32>
    %11 = vector.shape_cast %10 : vector<2x1x4xf32> to vector<2x4xf32>
    %c0_12 = arith.constant 0 : index
    %c6 = arith.constant 6 : index
    %c0_13 = arith.constant 0 : index
    %12 = vector.load %arg0[%c0_12, %c6, %c0_13] : memref<2x8x4xf32, #tpu.memory_space<vmem>>, vector<2x1x4xf32>
    %13 = vector.shape_cast %12 : vector<2x1x4xf32> to vector<2x4xf32>
    %c0_14 = arith.constant 0 : index
    %c7 = arith.constant 7 : index
    %c0_15 = arith.constant 0 : index
    %14 = vector.load %arg0[%c0_14, %c7, %c0_15] : memref<2x8x4xf32, #tpu.memory_space<vmem>>, vector<2x1x4xf32>
    %15 = vector.shape_cast %14 : vector<2x1x4xf32> to vector<2x4xf32>
    %c0_16 = arith.constant 0 : index
    %c0_17 = arith.constant 0 : index
    %16 = vector.load %arg1[%c0_16, %c0_17] : memref<4x32xf32, #tpu.memory_space<vmem>>, vector<4x32xf32>
    %c0_18 = arith.constant 0 : index
    %c0_19 = arith.constant 0 : index
    %c0_20 = arith.constant 0 : index
    %17 = vector.load %arg3[%c0_18, %c0_19, %c0_20] : memref<5x8x32xf32, #tpu.memory_space<vmem>>, vector<1x8x32xf32>
    %18 = vector.shape_cast %17 : vector<1x8x32xf32> to vector<8x32xf32>
    %c0_21 = arith.constant 0 : index
    %c0_22 = arith.constant 0 : index
    %c0_23 = arith.constant 0 : index
    %19 = vector.load %arg4[%c0_21, %c0_22, %c0_23] : memref<5x1x32xf32, #tpu.memory_space<vmem>>, vector<1x1x32xf32>
    %20 = vector.shape_cast %19 : vector<1x1x32xf32> to vector<1x32xf32>
    %cst = arith.constant dense<0.000000e+00> : vector<2x32xf32>
    %21 = tpu.matmul %1, %16, %cst {dimension_numbers = #tpu.dot_dimension_numbers<[1], [0], [0], [1], [0, 0, 1, 1], [], []>} : vector<2x4xf32>, vector<4x32xf32>, vector<2x32xf32> -> vector<2x32xf32>
    %22 = vector.broadcast %20 : vector<1x32xf32> to vector<2x32xf32>
    %23 = arith.addf %21, %22 : vector<2x32xf32>
    %cst_24 = arith.constant dense<0.000000e+00> : vector<2x32xf32>
    %24 = tpu.matmul %3, %16, %cst_24 {dimension_numbers = #tpu.dot_dimension_numbers<[1], [0], [0], [1], [0, 0, 1, 1], [], []>} : vector<2x4xf32>, vector<4x32xf32>, vector<2x32xf32> -> vector<2x32xf32>
    %25 = vector.broadcast %20 : vector<1x32xf32> to vector<2x32xf32>
    %26 = arith.addf %24, %25 : vector<2x32xf32>
    %cst_25 = arith.constant dense<0.000000e+00> : vector<2x32xf32>
    %27 = tpu.matmul %5, %16, %cst_25 {dimension_numbers = #tpu.dot_dimension_numbers<[1], [0], [0], [1], [0, 0, 1, 1], [], []>} : vector<2x4xf32>, vector<4x32xf32>, vector<2x32xf32> -> vector<2x32xf32>
    %28 = vector.broadcast %20 : vector<1x32xf32> to vector<2x32xf32>
    %29 = arith.addf %27, %28 : vector<2x32xf32>
    %cst_26 = arith.constant dense<0.000000e+00> : vector<2x32xf32>
    %30 = tpu.matmul %7, %16, %cst_26 {dimension_numbers = #tpu.dot_dimension_numbers<[1], [0], [0], [1], [0, 0, 1, 1], [], []>} : vector<2x4xf32>, vector<4x32xf32>, vector<2x32xf32> -> vector<2x32xf32>
    %31 = vector.broadcast %20 : vector<1x32xf32> to vector<2x32xf32>
    %32 = arith.addf %30, %31 : vector<2x32xf32>
    %cst_27 = arith.constant dense<0.000000e+00> : vector<2x32xf32>
    %33 = tpu.matmul %9, %16, %cst_27 {dimension_numbers = #tpu.dot_dimension_numbers<[1], [0], [0], [1], [0, 0, 1, 1], [], []>} : vector<2x4xf32>, vector<4x32xf32>, vector<2x32xf32> -> vector<2x32xf32>
    %34 = vector.broadcast %20 : vector<1x32xf32> to vector<2x32xf32>
    %35 = arith.addf %33, %34 : vector<2x32xf32>
    %cst_28 = arith.constant dense<0.000000e+00> : vector<2x32xf32>
    %36 = tpu.matmul %11, %16, %cst_28 {dimension_numbers = #tpu.dot_dimension_numbers<[1], [0], [0], [1], [0, 0, 1, 1], [], []>} : vector<2x4xf32>, vector<4x32xf32>, vector<2x32xf32> -> vector<2x32xf32>
    %37 = vector.broadcast %20 : vector<1x32xf32> to vector<2x32xf32>
    %38 = arith.addf %36, %37 : vector<2x32xf32>
    %cst_29 = arith.constant dense<0.000000e+00> : vector<2x32xf32>
    %39 = tpu.matmul %13, %16, %cst_29 {dimension_numbers = #tpu.dot_dimension_numbers<[1], [0], [0], [1], [0, 0, 1, 1], [], []>} : vector<2x4xf32>, vector<4x32xf32>, vector<2x32xf32> -> vector<2x32xf32>
    %40 = vector.broadcast %20 : vector<1x32xf32> to vector<2x32xf32>
    %41 = arith.addf %39, %40 : vector<2x32xf32>
    %cst_30 = arith.constant dense<0.000000e+00> : vector<2x32xf32>
    %42 = tpu.matmul %15, %16, %cst_30 {dimension_numbers = #tpu.dot_dimension_numbers<[1], [0], [0], [1], [0, 0, 1, 1], [], []>} : vector<2x4xf32>, vector<4x32xf32>, vector<2x32xf32> -> vector<2x32xf32>
    %43 = vector.broadcast %20 : vector<1x32xf32> to vector<2x32xf32>
    %44 = arith.addf %42, %43 : vector<2x32xf32>
    %c0_31 = arith.constant 0 : index
    %c0_32 = arith.constant 0 : index
    %c0_33 = arith.constant 0 : index
    %45 = vector.load %arg5[%c0_31, %c0_32, %c0_33] : memref<5x2x8xf32, #tpu.memory_space<vmem>>, vector<1x2x8xf32>
    %46 = vector.shape_cast %45 : vector<1x2x8xf32> to vector<2x8xf32>
    %c0_34 = arith.constant 0 : index
    %c0_35 = arith.constant 0 : index
    %c0_36 = arith.constant 0 : index
    %47 = vector.load %arg6[%c0_34, %c0_35, %c0_36] : memref<5x2x8xf32, #tpu.memory_space<vmem>>, vector<1x2x8xf32>
    %48 = vector.shape_cast %47 : vector<1x2x8xf32> to vector<2x8xf32>
    %cst_37 = arith.constant dense<0.000000e+00> : vector<2x32xf32>
    %49 = tpu.matmul %46, %18, %cst_37 {dimension_numbers = #tpu.dot_dimension_numbers<[1], [0], [0], [1], [0, 0, 1, 1], [], []>} : vector<2x8xf32>, vector<8x32xf32>, vector<2x32xf32> -> vector<2x32xf32>
    %50 = arith.addf %23, %49 : vector<2x32xf32>
    %51 = vector.extract_strided_slice %50 {offsets = [0, 0], sizes = [2, 24], strides = [1, 1]} : vector<2x32xf32> to vector<2x24xf32>
    %52 = arith.negf %51 : vector<2x24xf32>
    %53 = math.exp %52 : vector<2x24xf32>
    %cst_38 = arith.constant 1.000000e+00 : f32
    %54 = vector.broadcast %cst_38 : f32 to vector<2x24xf32>
    %55 = arith.addf %54, %53 : vector<2x24xf32>
    %56 = arith.divf %54, %55 : vector<2x24xf32>
    %57 = vector.extract_strided_slice %56 {offsets = [0, 0], sizes = [2, 8], strides = [1, 1]} : vector<2x24xf32> to vector<2x8xf32>
    %58 = vector.extract_strided_slice %56 {offsets = [0, 8], sizes = [2, 8], strides = [1, 1]} : vector<2x24xf32> to vector<2x8xf32>
    %59 = vector.extract_strided_slice %56 {offsets = [0, 16], sizes = [2, 8], strides = [1, 1]} : vector<2x24xf32> to vector<2x8xf32>
    %60 = vector.extract_strided_slice %50 {offsets = [0, 24], sizes = [2, 8], strides = [1, 1]} : vector<2x32xf32> to vector<2x8xf32>
    %61 = math.tanh %60 : vector<2x8xf32>
    %62 = arith.mulf %58, %48 : vector<2x8xf32>
    %63 = arith.mulf %57, %61 : vector<2x8xf32>
    %64 = arith.addf %62, %63 : vector<2x8xf32>
    %65 = math.tanh %64 : vector<2x8xf32>
    %66 = arith.mulf %59, %65 : vector<2x8xf32>
    %cst_39 = arith.constant dense<0.000000e+00> : vector<2x32xf32>
    %67 = tpu.matmul %66, %18, %cst_39 {dimension_numbers = #tpu.dot_dimension_numbers<[1], [0], [0], [1], [0, 0, 1, 1], [], []>} : vector<2x8xf32>, vector<8x32xf32>, vector<2x32xf32> -> vector<2x32xf32>
    %68 = arith.addf %26, %67 : vector<2x32xf32>
    %69 = vector.extract_strided_slice %68 {offsets = [0, 0], sizes = [2, 24], strides = [1, 1]} : vector<2x32xf32> to vector<2x24xf32>
    %70 = arith.negf %69 : vector<2x24xf32>
    %71 = math.exp %70 : vector<2x24xf32>
    %cst_40 = arith.constant 1.000000e+00 : f32
    %72 = vector.broadcast %cst_40 : f32 to vector<2x24xf32>
    %73 = arith.addf %72, %71 : vector<2x24xf32>
    %74 = arith.divf %72, %73 : vector<2x24xf32>
    %75 = vector.extract_strided_slice %74 {offsets = [0, 0], sizes = [2, 8], strides = [1, 1]} : vector<2x24xf32> to vector<2x8xf32>
    %76 = vector.extract_strided_slice %74 {offsets = [0, 8], sizes = [2, 8], strides = [1, 1]} : vector<2x24xf32> to vector<2x8xf32>
    %77 = vector.extract_strided_slice %74 {offsets = [0, 16], sizes = [2, 8], strides = [1, 1]} : vector<2x24xf32> to vector<2x8xf32>
    %78 = vector.extract_strided_slice %68 {offsets = [0, 24], sizes = [2, 8], strides = [1, 1]} : vector<2x32xf32> to vector<2x8xf32>
    %79 = math.tanh %78 : vector<2x8xf32>
    %80 = arith.mulf %76, %64 : vector<2x8xf32>
    %81 = arith.mulf %75, %79 : vector<2x8xf32>
    %82 = arith.addf %80, %81 : vector<2x8xf32>
    %83 = math.tanh %82 : vector<2x8xf32>
    %84 = arith.mulf %77, %83 : vector<2x8xf32>
    %cst_41 = arith.constant dense<0.000000e+00> : vector<2x32xf32>
    %85 = tpu.matmul %84, %18, %cst_41 {dimension_numbers = #tpu.dot_dimension_numbers<[1], [0], [0], [1], [0, 0, 1, 1], [], []>} : vector<2x8xf32>, vector<8x32xf32>, vector<2x32xf32> -> vector<2x32xf32>
    %86 = arith.addf %29, %85 : vector<2x32xf32>
    %87 = vector.extract_strided_slice %86 {offsets = [0, 0], sizes = [2, 24], strides = [1, 1]} : vector<2x32xf32> to vector<2x24xf32>
    %88 = arith.negf %87 : vector<2x24xf32>
    %89 = math.exp %88 : vector<2x24xf32>
    %cst_42 = arith.constant 1.000000e+00 : f32
    %90 = vector.broadcast %cst_42 : f32 to vector<2x24xf32>
    %91 = arith.addf %90, %89 : vector<2x24xf32>
    %92 = arith.divf %90, %91 : vector<2x24xf32>
    %93 = vector.extract_strided_slice %92 {offsets = [0, 0], sizes = [2, 8], strides = [1, 1]} : vector<2x24xf32> to vector<2x8xf32>
    %94 = vector.extract_strided_slice %92 {offsets = [0, 8], sizes = [2, 8], strides = [1, 1]} : vector<2x24xf32> to vector<2x8xf32>
    %95 = vector.extract_strided_slice %92 {offsets = [0, 16], sizes = [2, 8], strides = [1, 1]} : vector<2x24xf32> to vector<2x8xf32>
    %96 = vector.extract_strided_slice %86 {offsets = [0, 24], sizes = [2, 8], strides = [1, 1]} : vector<2x32xf32> to vector<2x8xf32>
    %97 = math.tanh %96 : vector<2x8xf32>
    %98 = arith.mulf %94, %82 : vector<2x8xf32>
    %99 = arith.mulf %93, %97 : vector<2x8xf32>
    %100 = arith.addf %98, %99 : vector<2x8xf32>
    %101 = math.tanh %100 : vector<2x8xf32>
    %102 = arith.mulf %95, %101 : vector<2x8xf32>
    %cst_43 = arith.constant dense<0.000000e+00> : vector<2x32xf32>
    %103 = tpu.matmul %102, %18, %cst_43 {dimension_numbers = #tpu.dot_dimension_numbers<[1], [0], [0], [1], [0, 0, 1, 1], [], []>} : vector<2x8xf32>, vector<8x32xf32>, vector<2x32xf32> -> vector<2x32xf32>
    %104 = arith.addf %32, %103 : vector<2x32xf32>
    %105 = vector.extract_strided_slice %104 {offsets = [0, 0], sizes = [2, 24], strides = [1, 1]} : vector<2x32xf32> to vector<2x24xf32>
    %106 = arith.negf %105 : vector<2x24xf32>
    %107 = math.exp %106 : vector<2x24xf32>
    %cst_44 = arith.constant 1.000000e+00 : f32
    %108 = vector.broadcast %cst_44 : f32 to vector<2x24xf32>
    %109 = arith.addf %108, %107 : vector<2x24xf32>
    %110 = arith.divf %108, %109 : vector<2x24xf32>
    %111 = vector.extract_strided_slice %110 {offsets = [0, 0], sizes = [2, 8], strides = [1, 1]} : vector<2x24xf32> to vector<2x8xf32>
    %112 = vector.extract_strided_slice %110 {offsets = [0, 8], sizes = [2, 8], strides = [1, 1]} : vector<2x24xf32> to vector<2x8xf32>
    %113 = vector.extract_strided_slice %110 {offsets = [0, 16], sizes = [2, 8], strides = [1, 1]} : vector<2x24xf32> to vector<2x8xf32>
    %114 = vector.extract_strided_slice %104 {offsets = [0, 24], sizes = [2, 8], strides = [1, 1]} : vector<2x32xf32> to vector<2x8xf32>
    %115 = math.tanh %114 : vector<2x8xf32>
    %116 = arith.mulf %112, %100 : vector<2x8xf32>
    %117 = arith.mulf %111, %115 : vector<2x8xf32>
    %118 = arith.addf %116, %117 : vector<2x8xf32>
    %119 = math.tanh %118 : vector<2x8xf32>
    %120 = arith.mulf %113, %119 : vector<2x8xf32>
    %cst_45 = arith.constant dense<0.000000e+00> : vector<2x32xf32>
    %121 = tpu.matmul %120, %18, %cst_45 {dimension_numbers = #tpu.dot_dimension_numbers<[1], [0], [0], [1], [0, 0, 1, 1], [], []>} : vector<2x8xf32>, vector<8x32xf32>, vector<2x32xf32> -> vector<2x32xf32>
    %122 = arith.addf %35, %121 : vector<2x32xf32>
    %123 = vector.extract_strided_slice %122 {offsets = [0, 0], sizes = [2, 24], strides = [1, 1]} : vector<2x32xf32> to vector<2x24xf32>
    %124 = arith.negf %123 : vector<2x24xf32>
    %125 = math.exp %124 : vector<2x24xf32>
    %cst_46 = arith.constant 1.000000e+00 : f32
    %126 = vector.broadcast %cst_46 : f32 to vector<2x24xf32>
    %127 = arith.addf %126, %125 : vector<2x24xf32>
    %128 = arith.divf %126, %127 : vector<2x24xf32>
    %129 = vector.extract_strided_slice %128 {offsets = [0, 0], sizes = [2, 8], strides = [1, 1]} : vector<2x24xf32> to vector<2x8xf32>
    %130 = vector.extract_strided_slice %128 {offsets = [0, 8], sizes = [2, 8], strides = [1, 1]} : vector<2x24xf32> to vector<2x8xf32>
    %131 = vector.extract_strided_slice %128 {offsets = [0, 16], sizes = [2, 8], strides = [1, 1]} : vector<2x24xf32> to vector<2x8xf32>
    %132 = vector.extract_strided_slice %122 {offsets = [0, 24], sizes = [2, 8], strides = [1, 1]} : vector<2x32xf32> to vector<2x8xf32>
    %133 = math.tanh %132 : vector<2x8xf32>
    %134 = arith.mulf %130, %118 : vector<2x8xf32>
    %135 = arith.mulf %129, %133 : vector<2x8xf32>
    %136 = arith.addf %134, %135 : vector<2x8xf32>
    %137 = math.tanh %136 : vector<2x8xf32>
    %138 = arith.mulf %131, %137 : vector<2x8xf32>
    %cst_47 = arith.constant dense<0.000000e+00> : vector<2x32xf32>
    %139 = tpu.matmul %138, %18, %cst_47 {dimension_numbers = #tpu.dot_dimension_numbers<[1], [0], [0], [1], [0, 0, 1, 1], [], []>} : vector<2x8xf32>, vector<8x32xf32>, vector<2x32xf32> -> vector<2x32xf32>
    %140 = arith.addf %38, %139 : vector<2x32xf32>
    %141 = vector.extract_strided_slice %140 {offsets = [0, 0], sizes = [2, 24], strides = [1, 1]} : vector<2x32xf32> to vector<2x24xf32>
    %142 = arith.negf %141 : vector<2x24xf32>
    %143 = math.exp %142 : vector<2x24xf32>
    %cst_48 = arith.constant 1.000000e+00 : f32
    %144 = vector.broadcast %cst_48 : f32 to vector<2x24xf32>
    %145 = arith.addf %144, %143 : vector<2x24xf32>
    %146 = arith.divf %144, %145 : vector<2x24xf32>
    %147 = vector.extract_strided_slice %146 {offsets = [0, 0], sizes = [2, 8], strides = [1, 1]} : vector<2x24xf32> to vector<2x8xf32>
    %148 = vector.extract_strided_slice %146 {offsets = [0, 8], sizes = [2, 8], strides = [1, 1]} : vector<2x24xf32> to vector<2x8xf32>
    %149 = vector.extract_strided_slice %146 {offsets = [0, 16], sizes = [2, 8], strides = [1, 1]} : vector<2x24xf32> to vector<2x8xf32>
    %150 = vector.extract_strided_slice %140 {offsets = [0, 24], sizes = [2, 8], strides = [1, 1]} : vector<2x32xf32> to vector<2x8xf32>
    %151 = math.tanh %150 : vector<2x8xf32>
    %152 = arith.mulf %148, %136 : vector<2x8xf32>
    %153 = arith.mulf %147, %151 : vector<2x8xf32>
    %154 = arith.addf %152, %153 : vector<2x8xf32>
    %155 = math.tanh %154 : vector<2x8xf32>
    %156 = arith.mulf %149, %155 : vector<2x8xf32>
    %cst_49 = arith.constant dense<0.000000e+00> : vector<2x32xf32>
    %157 = tpu.matmul %156, %18, %cst_49 {dimension_numbers = #tpu.dot_dimension_numbers<[1], [0], [0], [1], [0, 0, 1, 1], [], []>} : vector<2x8xf32>, vector<8x32xf32>, vector<2x32xf32> -> vector<2x32xf32>
    %158 = arith.addf %41, %157 : vector<2x32xf32>
    %159 = vector.extract_strided_slice %158 {offsets = [0, 0], sizes = [2, 24], strides = [1, 1]} : vector<2x32xf32> to vector<2x24xf32>
    %160 = arith.negf %159 : vector<2x24xf32>
    %161 = math.exp %160 : vector<2x24xf32>
    %cst_50 = arith.constant 1.000000e+00 : f32
    %162 = vector.broadcast %cst_50 : f32 to vector<2x24xf32>
    %163 = arith.addf %162, %161 : vector<2x24xf32>
    %164 = arith.divf %162, %163 : vector<2x24xf32>
    %165 = vector.extract_strided_slice %164 {offsets = [0, 0], sizes = [2, 8], strides = [1, 1]} : vector<2x24xf32> to vector<2x8xf32>
    %166 = vector.extract_strided_slice %164 {offsets = [0, 8], sizes = [2, 8], strides = [1, 1]} : vector<2x24xf32> to vector<2x8xf32>
    %167 = vector.extract_strided_slice %164 {offsets = [0, 16], sizes = [2, 8], strides = [1, 1]} : vector<2x24xf32> to vector<2x8xf32>
    %168 = vector.extract_strided_slice %158 {offsets = [0, 24], sizes = [2, 8], strides = [1, 1]} : vector<2x32xf32> to vector<2x8xf32>
    %169 = math.tanh %168 : vector<2x8xf32>
    %170 = arith.mulf %166, %154 : vector<2x8xf32>
    %171 = arith.mulf %165, %169 : vector<2x8xf32>
    %172 = arith.addf %170, %171 : vector<2x8xf32>
    %173 = math.tanh %172 : vector<2x8xf32>
    %174 = arith.mulf %167, %173 : vector<2x8xf32>
    %cst_51 = arith.constant dense<0.000000e+00> : vector<2x32xf32>
    %175 = tpu.matmul %174, %18, %cst_51 {dimension_numbers = #tpu.dot_dimension_numbers<[1], [0], [0], [1], [0, 0, 1, 1], [], []>} : vector<2x8xf32>, vector<8x32xf32>, vector<2x32xf32> -> vector<2x32xf32>
    %176 = arith.addf %44, %175 : vector<2x32xf32>
    %177 = vector.extract_strided_slice %176 {offsets = [0, 0], sizes = [2, 24], strides = [1, 1]} : vector<2x32xf32> to vector<2x24xf32>
    %178 = arith.negf %177 : vector<2x24xf32>
    %179 = math.exp %178 : vector<2x24xf32>
    %cst_52 = arith.constant 1.000000e+00 : f32
    %180 = vector.broadcast %cst_52 : f32 to vector<2x24xf32>
    %181 = arith.addf %180, %179 : vector<2x24xf32>
    %182 = arith.divf %180, %181 : vector<2x24xf32>
    %183 = vector.extract_strided_slice %182 {offsets = [0, 0], sizes = [2, 8], strides = [1, 1]} : vector<2x24xf32> to vector<2x8xf32>
    %184 = vector.extract_strided_slice %182 {offsets = [0, 8], sizes = [2, 8], strides = [1, 1]} : vector<2x24xf32> to vector<2x8xf32>
    %185 = vector.extract_strided_slice %182 {offsets = [0, 16], sizes = [2, 8], strides = [1, 1]} : vector<2x24xf32> to vector<2x8xf32>
    %186 = vector.extract_strided_slice %176 {offsets = [0, 24], sizes = [2, 8], strides = [1, 1]} : vector<2x32xf32> to vector<2x8xf32>
    %187 = math.tanh %186 : vector<2x8xf32>
    %188 = arith.mulf %184, %172 : vector<2x8xf32>
    %189 = arith.mulf %183, %187 : vector<2x8xf32>
    %190 = arith.addf %188, %189 : vector<2x8xf32>
    %191 = math.tanh %190 : vector<2x8xf32>
    %192 = arith.mulf %185, %191 : vector<2x8xf32>
    %c0_53 = arith.constant 0 : index
    %c0_54 = arith.constant 0 : index
    %c0_55 = arith.constant 0 : index
    %193 = vector.load %arg10[%c0_53, %c0_54, %c0_55] : memref<5x2x8xf32, #tpu.memory_space<vmem>>, vector<1x2x8xf32>
    %194 = vector.shape_cast %193 : vector<1x2x8xf32> to vector<2x8xf32>
    %195 = vector.shape_cast %192 : vector<2x8xf32> to vector<1x2x8xf32>
    tpu.vector_store %arg10[%c0_53, %c0_54, %c0_55], %195 {strides = array<i32>} : memref<5x2x8xf32, #tpu.memory_space<vmem>>, vector<1x2x8xf32>,
    %c0_56 = arith.constant 0 : index
    %c0_57 = arith.constant 0 : index
    %c0_58 = arith.constant 0 : index
    %196 = vector.load %arg11[%c0_56, %c0_57, %c0_58] : memref<5x2x8xf32, #tpu.memory_space<vmem>>, vector<1x2x8xf32>
    %197 = vector.shape_cast %196 : vector<1x2x8xf32> to vector<2x8xf32>
    %198 = vector.shape_cast %190 : vector<2x8xf32> to vector<1x2x8xf32>
    tpu.vector_store %arg11[%c0_56, %c0_57, %c0_58], %198 {strides = array<i32>} : memref<5x2x8xf32, #tpu.memory_space<vmem>>, vector<1x2x8xf32>,
    %c0_59 = arith.constant 0 : index
    %c0_60 = arith.constant 0 : index
    %c0_61 = arith.constant 0 : index
    %199 = vector.load %arg2[%c0_59, %c0_60, %c0_61] : memref<4x8x32xf32, #tpu.memory_space<vmem>>, vector<1x8x32xf32>
    %200 = vector.shape_cast %199 : vector<1x8x32xf32> to vector<8x32xf32>
    %c1_62 = arith.constant 1 : index
    %c0_63 = arith.constant 0 : index
    %c0_64 = arith.constant 0 : index
    %201 = vector.load %arg3[%c1_62, %c0_63, %c0_64] : memref<5x8x32xf32, #tpu.memory_space<vmem>>, vector<1x8x32xf32>
    %202 = vector.shape_cast %201 : vector<1x8x32xf32> to vector<8x32xf32>
    %c1_65 = arith.constant 1 : index
    %c0_66 = arith.constant 0 : index
    %c0_67 = arith.constant 0 : index
    %203 = vector.load %arg4[%c1_65, %c0_66, %c0_67] : memref<5x1x32xf32, #tpu.memory_space<vmem>>, vector<1x1x32xf32>
    %204 = vector.shape_cast %203 : vector<1x1x32xf32> to vector<1x32xf32>
    %cst_68 = arith.constant dense<0.000000e+00> : vector<2x32xf32>
    %205 = tpu.matmul %66, %200, %cst_68 {dimension_numbers = #tpu.dot_dimension_numbers<[1], [0], [0], [1], [0, 0, 1, 1], [], []>} : vector<2x8xf32>, vector<8x32xf32>, vector<2x32xf32> -> vector<2x32xf32>
    %206 = vector.broadcast %204 : vector<1x32xf32> to vector<2x32xf32>
    %207 = arith.addf %205, %206 : vector<2x32xf32>
    %cst_69 = arith.constant dense<0.000000e+00> : vector<2x32xf32>
    %208 = tpu.matmul %84, %200, %cst_69 {dimension_numbers = #tpu.dot_dimension_numbers<[1], [0], [0], [1], [0, 0, 1, 1], [], []>} : vector<2x8xf32>, vector<8x32xf32>, vector<2x32xf32> -> vector<2x32xf32>
    %209 = vector.broadcast %204 : vector<1x32xf32> to vector<2x32xf32>
    %210 = arith.addf %208, %209 : vector<2x32xf32>
    %cst_70 = arith.constant dense<0.000000e+00> : vector<2x32xf32>
    %211 = tpu.matmul %102, %200, %cst_70 {dimension_numbers = #tpu.dot_dimension_numbers<[1], [0], [0], [1], [0, 0, 1, 1], [], []>} : vector<2x8xf32>, vector<8x32xf32>, vector<2x32xf32> -> vector<2x32xf32>
    %212 = vector.broadcast %204 : vector<1x32xf32> to vector<2x32xf32>
    %213 = arith.addf %211, %212 : vector<2x32xf32>
    %cst_71 = arith.constant dense<0.000000e+00> : vector<2x32xf32>
    %214 = tpu.matmul %120, %200, %cst_71 {dimension_numbers = #tpu.dot_dimension_numbers<[1], [0], [0], [1], [0, 0, 1, 1], [], []>} : vector<2x8xf32>, vector<8x32xf32>, vector<2x32xf32> -> vector<2x32xf32>
    %215 = vector.broadcast %204 : vector<1x32xf32> to vector<2x32xf32>
    %216 = arith.addf %214, %215 : vector<2x32xf32>
    %cst_72 = arith.constant dense<0.000000e+00> : vector<2x32xf32>
    %217 = tpu.matmul %138, %200, %cst_72 {dimension_numbers = #tpu.dot_dimension_numbers<[1], [0], [0], [1], [0, 0, 1, 1], [], []>} : vector<2x8xf32>, vector<8x32xf32>, vector<2x32xf32> -> vector<2x32xf32>
    %218 = vector.broadcast %204 : vector<1x32xf32> to vector<2x32xf32>
    %219 = arith.addf %217, %218 : vector<2x32xf32>
    %cst_73 = arith.constant dense<0.000000e+00> : vector<2x32xf32>
    %220 = tpu.matmul %156, %200, %cst_73 {dimension_numbers = #tpu.dot_dimension_numbers<[1], [0], [0], [1], [0, 0, 1, 1], [], []>} : vector<2x8xf32>, vector<8x32xf32>, vector<2x32xf32> -> vector<2x32xf32>
    %221 = vector.broadcast %204 : vector<1x32xf32> to vector<2x32xf32>
    %222 = arith.addf %220, %221 : vector<2x32xf32>
    %cst_74 = arith.constant dense<0.000000e+00> : vector<2x32xf32>
    %223 = tpu.matmul %174, %200, %cst_74 {dimension_numbers = #tpu.dot_dimension_numbers<[1], [0], [0], [1], [0, 0, 1, 1], [], []>} : vector<2x8xf32>, vector<8x32xf32>, vector<2x32xf32> -> vector<2x32xf32>
    %224 = vector.broadcast %204 : vector<1x32xf32> to vector<2x32xf32>
    %225 = arith.addf %223, %224 : vector<2x32xf32>
    %cst_75 = arith.constant dense<0.000000e+00> : vector<2x32xf32>
    %226 = tpu.matmul %192, %200, %cst_75 {dimension_numbers = #tpu.dot_dimension_numbers<[1], [0], [0], [1], [0, 0, 1, 1], [], []>} : vector<2x8xf32>, vector<8x32xf32>, vector<2x32xf32> -> vector<2x32xf32>
    %227 = vector.broadcast %204 : vector<1x32xf32> to vector<2x32xf32>
    %228 = arith.addf %226, %227 : vector<2x32xf32>
    %c1_76 = arith.constant 1 : index
    %c0_77 = arith.constant 0 : index
    %c0_78 = arith.constant 0 : index
    %229 = vector.load %arg5[%c1_76, %c0_77, %c0_78] : memref<5x2x8xf32, #tpu.memory_space<vmem>>, vector<1x2x8xf32>
    %230 = vector.shape_cast %229 : vector<1x2x8xf32> to vector<2x8xf32>
    %c1_79 = arith.constant 1 : index
    %c0_80 = arith.constant 0 : index
    %c0_81 = arith.constant 0 : index
    %231 = vector.load %arg6[%c1_79, %c0_80, %c0_81] : memref<5x2x8xf32, #tpu.memory_space<vmem>>, vector<1x2x8xf32>
    %232 = vector.shape_cast %231 : vector<1x2x8xf32> to vector<2x8xf32>
    %cst_82 = arith.constant dense<0.000000e+00> : vector<2x32xf32>
    %233 = tpu.matmul %230, %202, %cst_82 {dimension_numbers = #tpu.dot_dimension_numbers<[1], [0], [0], [1], [0, 0, 1, 1], [], []>} : vector<2x8xf32>, vector<8x32xf32>, vector<2x32xf32> -> vector<2x32xf32>
    %234 = arith.addf %207, %233 : vector<2x32xf32>
    %235 = vector.extract_strided_slice %234 {offsets = [0, 0], sizes = [2, 24], strides = [1, 1]} : vector<2x32xf32> to vector<2x24xf32>
    %236 = arith.negf %235 : vector<2x24xf32>
    %237 = math.exp %236 : vector<2x24xf32>
    %cst_83 = arith.constant 1.000000e+00 : f32
    %238 = vector.broadcast %cst_83 : f32 to vector<2x24xf32>
    %239 = arith.addf %238, %237 : vector<2x24xf32>
    %240 = arith.divf %238, %239 : vector<2x24xf32>
    %241 = vector.extract_strided_slice %240 {offsets = [0, 0], sizes = [2, 8], strides = [1, 1]} : vector<2x24xf32> to vector<2x8xf32>
    %242 = vector.extract_strided_slice %240 {offsets = [0, 8], sizes = [2, 8], strides = [1, 1]} : vector<2x24xf32> to vector<2x8xf32>
    %243 = vector.extract_strided_slice %240 {offsets = [0, 16], sizes = [2, 8], strides = [1, 1]} : vector<2x24xf32> to vector<2x8xf32>
    %244 = vector.extract_strided_slice %234 {offsets = [0, 24], sizes = [2, 8], strides = [1, 1]} : vector<2x32xf32> to vector<2x8xf32>
    %245 = math.tanh %244 : vector<2x8xf32>
    %246 = arith.mulf %242, %232 : vector<2x8xf32>
    %247 = arith.mulf %241, %245 : vector<2x8xf32>
    %248 = arith.addf %246, %247 : vector<2x8xf32>
    %249 = math.tanh %248 : vector<2x8xf32>
    %250 = arith.mulf %243, %249 : vector<2x8xf32>
    %cst_84 = arith.constant dense<0.000000e+00> : vector<2x32xf32>
    %251 = tpu.matmul %250, %202, %cst_84 {dimension_numbers = #tpu.dot_dimension_numbers<[1], [0], [0], [1], [0, 0, 1, 1], [], []>} : vector<2x8xf32>, vector<8x32xf32>, vector<2x32xf32> -> vector<2x32xf32>
    %252 = arith.addf %210, %251 : vector<2x32xf32>
    %253 = vector.extract_strided_slice %252 {offsets = [0, 0], sizes = [2, 24], strides = [1, 1]} : vector<2x32xf32> to vector<2x24xf32>
    %254 = arith.negf %253 : vector<2x24xf32>
    %255 = math.exp %254 : vector<2x24xf32>
    %cst_85 = arith.constant 1.000000e+00 : f32
    %256 = vector.broadcast %cst_85 : f32 to vector<2x24xf32>
    %257 = arith.addf %256, %255 : vector<2x24xf32>
    %258 = arith.divf %256, %257 : vector<2x24xf32>
    %259 = vector.extract_strided_slice %258 {offsets = [0, 0], sizes = [2, 8], strides = [1, 1]} : vector<2x24xf32> to vector<2x8xf32>
    %260 = vector.extract_strided_slice %258 {offsets = [0, 8], sizes = [2, 8], strides = [1, 1]} : vector<2x24xf32> to vector<2x8xf32>
    %261 = vector.extract_strided_slice %258 {offsets = [0, 16], sizes = [2, 8], strides = [1, 1]} : vector<2x24xf32> to vector<2x8xf32>
    %262 = vector.extract_strided_slice %252 {offsets = [0, 24], sizes = [2, 8], strides = [1, 1]} : vector<2x32xf32> to vector<2x8xf32>
    %263 = math.tanh %262 : vector<2x8xf32>
    %264 = arith.mulf %260, %248 : vector<2x8xf32>
    %265 = arith.mulf %259, %263 : vector<2x8xf32>
    %266 = arith.addf %264, %265 : vector<2x8xf32>
    %267 = math.tanh %266 : vector<2x8xf32>
    %268 = arith.mulf %261, %267 : vector<2x8xf32>
    %cst_86 = arith.constant dense<0.000000e+00> : vector<2x32xf32>
    %269 = tpu.matmul %268, %202, %cst_86 {dimension_numbers = #tpu.dot_dimension_numbers<[1], [0], [0], [1], [0, 0, 1, 1], [], []>} : vector<2x8xf32>, vector<8x32xf32>, vector<2x32xf32> -> vector<2x32xf32>
    %270 = arith.addf %213, %269 : vector<2x32xf32>
    %271 = vector.extract_strided_slice %270 {offsets = [0, 0], sizes = [2, 24], strides = [1, 1]} : vector<2x32xf32> to vector<2x24xf32>
    %272 = arith.negf %271 : vector<2x24xf32>
    %273 = math.exp %272 : vector<2x24xf32>
    %cst_87 = arith.constant 1.000000e+00 : f32
    %274 = vector.broadcast %cst_87 : f32 to vector<2x24xf32>
    %275 = arith.addf %274, %273 : vector<2x24xf32>
    %276 = arith.divf %274, %275 : vector<2x24xf32>
    %277 = vector.extract_strided_slice %276 {offsets = [0, 0], sizes = [2, 8], strides = [1, 1]} : vector<2x24xf32> to vector<2x8xf32>
    %278 = vector.extract_strided_slice %276 {offsets = [0, 8], sizes = [2, 8], strides = [1, 1]} : vector<2x24xf32> to vector<2x8xf32>
    %279 = vector.extract_strided_slice %276 {offsets = [0, 16], sizes = [2, 8], strides = [1, 1]} : vector<2x24xf32> to vector<2x8xf32>
    %280 = vector.extract_strided_slice %270 {offsets = [0, 24], sizes = [2, 8], strides = [1, 1]} : vector<2x32xf32> to vector<2x8xf32>
    %281 = math.tanh %280 : vector<2x8xf32>
    %282 = arith.mulf %278, %266 : vector<2x8xf32>
    %283 = arith.mulf %277, %281 : vector<2x8xf32>
    %284 = arith.addf %282, %283 : vector<2x8xf32>
    %285 = math.tanh %284 : vector<2x8xf32>
    %286 = arith.mulf %279, %285 : vector<2x8xf32>
    %cst_88 = arith.constant dense<0.000000e+00> : vector<2x32xf32>
    %287 = tpu.matmul %286, %202, %cst_88 {dimension_numbers = #tpu.dot_dimension_numbers<[1], [0], [0], [1], [0, 0, 1, 1], [], []>} : vector<2x8xf32>, vector<8x32xf32>, vector<2x32xf32> -> vector<2x32xf32>
    %288 = arith.addf %216, %287 : vector<2x32xf32>
    %289 = vector.extract_strided_slice %288 {offsets = [0, 0], sizes = [2, 24], strides = [1, 1]} : vector<2x32xf32> to vector<2x24xf32>
    %290 = arith.negf %289 : vector<2x24xf32>
    %291 = math.exp %290 : vector<2x24xf32>
    %cst_89 = arith.constant 1.000000e+00 : f32
    %292 = vector.broadcast %cst_89 : f32 to vector<2x24xf32>
    %293 = arith.addf %292, %291 : vector<2x24xf32>
    %294 = arith.divf %292, %293 : vector<2x24xf32>
    %295 = vector.extract_strided_slice %294 {offsets = [0, 0], sizes = [2, 8], strides = [1, 1]} : vector<2x24xf32> to vector<2x8xf32>
    %296 = vector.extract_strided_slice %294 {offsets = [0, 8], sizes = [2, 8], strides = [1, 1]} : vector<2x24xf32> to vector<2x8xf32>
    %297 = vector.extract_strided_slice %294 {offsets = [0, 16], sizes = [2, 8], strides = [1, 1]} : vector<2x24xf32> to vector<2x8xf32>
    %298 = vector.extract_strided_slice %288 {offsets = [0, 24], sizes = [2, 8], strides = [1, 1]} : vector<2x32xf32> to vector<2x8xf32>
    %299 = math.tanh %298 : vector<2x8xf32>
    %300 = arith.mulf %296, %284 : vector<2x8xf32>
    %301 = arith.mulf %295, %299 : vector<2x8xf32>
    %302 = arith.addf %300, %301 : vector<2x8xf32>
    %303 = math.tanh %302 : vector<2x8xf32>
    %304 = arith.mulf %297, %303 : vector<2x8xf32>
    %cst_90 = arith.constant dense<0.000000e+00> : vector<2x32xf32>
    %305 = tpu.matmul %304, %202, %cst_90 {dimension_numbers = #tpu.dot_dimension_numbers<[1], [0], [0], [1], [0, 0, 1, 1], [], []>} : vector<2x8xf32>, vector<8x32xf32>, vector<2x32xf32> -> vector<2x32xf32>
    %306 = arith.addf %219, %305 : vector<2x32xf32>
    %307 = vector.extract_strided_slice %306 {offsets = [0, 0], sizes = [2, 24], strides = [1, 1]} : vector<2x32xf32> to vector<2x24xf32>
    %308 = arith.negf %307 : vector<2x24xf32>
    %309 = math.exp %308 : vector<2x24xf32>
    %cst_91 = arith.constant 1.000000e+00 : f32
    %310 = vector.broadcast %cst_91 : f32 to vector<2x24xf32>
    %311 = arith.addf %310, %309 : vector<2x24xf32>
    %312 = arith.divf %310, %311 : vector<2x24xf32>
    %313 = vector.extract_strided_slice %312 {offsets = [0, 0], sizes = [2, 8], strides = [1, 1]} : vector<2x24xf32> to vector<2x8xf32>
    %314 = vector.extract_strided_slice %312 {offsets = [0, 8], sizes = [2, 8], strides = [1, 1]} : vector<2x24xf32> to vector<2x8xf32>
    %315 = vector.extract_strided_slice %312 {offsets = [0, 16], sizes = [2, 8], strides = [1, 1]} : vector<2x24xf32> to vector<2x8xf32>
    %316 = vector.extract_strided_slice %306 {offsets = [0, 24], sizes = [2, 8], strides = [1, 1]} : vector<2x32xf32> to vector<2x8xf32>
    %317 = math.tanh %316 : vector<2x8xf32>
    %318 = arith.mulf %314, %302 : vector<2x8xf32>
    %319 = arith.mulf %313, %317 : vector<2x8xf32>
    %320 = arith.addf %318, %319 : vector<2x8xf32>
    %321 = math.tanh %320 : vector<2x8xf32>
    %322 = arith.mulf %315, %321 : vector<2x8xf32>
    %cst_92 = arith.constant dense<0.000000e+00> : vector<2x32xf32>
    %323 = tpu.matmul %322, %202, %cst_92 {dimension_numbers = #tpu.dot_dimension_numbers<[1], [0], [0], [1], [0, 0, 1, 1], [], []>} : vector<2x8xf32>, vector<8x32xf32>, vector<2x32xf32> -> vector<2x32xf32>
    %324 = arith.addf %222, %323 : vector<2x32xf32>
    %325 = vector.extract_strided_slice %324 {offsets = [0, 0], sizes = [2, 24], strides = [1, 1]} : vector<2x32xf32> to vector<2x24xf32>
    %326 = arith.negf %325 : vector<2x24xf32>
    %327 = math.exp %326 : vector<2x24xf32>
    %cst_93 = arith.constant 1.000000e+00 : f32
    %328 = vector.broadcast %cst_93 : f32 to vector<2x24xf32>
    %329 = arith.addf %328, %327 : vector<2x24xf32>
    %330 = arith.divf %328, %329 : vector<2x24xf32>
    %331 = vector.extract_strided_slice %330 {offsets = [0, 0], sizes = [2, 8], strides = [1, 1]} : vector<2x24xf32> to vector<2x8xf32>
    %332 = vector.extract_strided_slice %330 {offsets = [0, 8], sizes = [2, 8], strides = [1, 1]} : vector<2x24xf32> to vector<2x8xf32>
    %333 = vector.extract_strided_slice %330 {offsets = [0, 16], sizes = [2, 8], strides = [1, 1]} : vector<2x24xf32> to vector<2x8xf32>
    %334 = vector.extract_strided_slice %324 {offsets = [0, 24], sizes = [2, 8], strides = [1, 1]} : vector<2x32xf32> to vector<2x8xf32>
    %335 = math.tanh %334 : vector<2x8xf32>
    %336 = arith.mulf %332, %320 : vector<2x8xf32>
    %337 = arith.mulf %331, %335 : vector<2x8xf32>
    %338 = arith.addf %336, %337 : vector<2x8xf32>
    %339 = math.tanh %338 : vector<2x8xf32>
    %340 = arith.mulf %333, %339 : vector<2x8xf32>
    %cst_94 = arith.constant dense<0.000000e+00> : vector<2x32xf32>
    %341 = tpu.matmul %340, %202, %cst_94 {dimension_numbers = #tpu.dot_dimension_numbers<[1], [0], [0], [1], [0, 0, 1, 1], [], []>} : vector<2x8xf32>, vector<8x32xf32>, vector<2x32xf32> -> vector<2x32xf32>
    %342 = arith.addf %225, %341 : vector<2x32xf32>
    %343 = vector.extract_strided_slice %342 {offsets = [0, 0], sizes = [2, 24], strides = [1, 1]} : vector<2x32xf32> to vector<2x24xf32>
    %344 = arith.negf %343 : vector<2x24xf32>
    %345 = math.exp %344 : vector<2x24xf32>
    %cst_95 = arith.constant 1.000000e+00 : f32
    %346 = vector.broadcast %cst_95 : f32 to vector<2x24xf32>
    %347 = arith.addf %346, %345 : vector<2x24xf32>
    %348 = arith.divf %346, %347 : vector<2x24xf32>
    %349 = vector.extract_strided_slice %348 {offsets = [0, 0], sizes = [2, 8], strides = [1, 1]} : vector<2x24xf32> to vector<2x8xf32>
    %350 = vector.extract_strided_slice %348 {offsets = [0, 8], sizes = [2, 8], strides = [1, 1]} : vector<2x24xf32> to vector<2x8xf32>
    %351 = vector.extract_strided_slice %348 {offsets = [0, 16], sizes = [2, 8], strides = [1, 1]} : vector<2x24xf32> to vector<2x8xf32>
    %352 = vector.extract_strided_slice %342 {offsets = [0, 24], sizes = [2, 8], strides = [1, 1]} : vector<2x32xf32> to vector<2x8xf32>
    %353 = math.tanh %352 : vector<2x8xf32>
    %354 = arith.mulf %350, %338 : vector<2x8xf32>
    %355 = arith.mulf %349, %353 : vector<2x8xf32>
    %356 = arith.addf %354, %355 : vector<2x8xf32>
    %357 = math.tanh %356 : vector<2x8xf32>
    %358 = arith.mulf %351, %357 : vector<2x8xf32>
    %cst_96 = arith.constant dense<0.000000e+00> : vector<2x32xf32>
    %359 = tpu.matmul %358, %202, %cst_96 {dimension_numbers = #tpu.dot_dimension_numbers<[1], [0], [0], [1], [0, 0, 1, 1], [], []>} : vector<2x8xf32>, vector<8x32xf32>, vector<2x32xf32> -> vector<2x32xf32>
    %360 = arith.addf %228, %359 : vector<2x32xf32>
    %361 = vector.extract_strided_slice %360 {offsets = [0, 0], sizes = [2, 24], strides = [1, 1]} : vector<2x32xf32> to vector<2x24xf32>
    %362 = arith.negf %361 : vector<2x24xf32>
    %363 = math.exp %362 : vector<2x24xf32>
    %cst_97 = arith.constant 1.000000e+00 : f32
    %364 = vector.broadcast %cst_97 : f32 to vector<2x24xf32>
    %365 = arith.addf %364, %363 : vector<2x24xf32>
    %366 = arith.divf %364, %365 : vector<2x24xf32>
    %367 = vector.extract_strided_slice %366 {offsets = [0, 0], sizes = [2, 8], strides = [1, 1]} : vector<2x24xf32> to vector<2x8xf32>
    %368 = vector.extract_strided_slice %366 {offsets = [0, 8], sizes = [2, 8], strides = [1, 1]} : vector<2x24xf32> to vector<2x8xf32>
    %369 = vector.extract_strided_slice %366 {offsets = [0, 16], sizes = [2, 8], strides = [1, 1]} : vector<2x24xf32> to vector<2x8xf32>
    %370 = vector.extract_strided_slice %360 {offsets = [0, 24], sizes = [2, 8], strides = [1, 1]} : vector<2x32xf32> to vector<2x8xf32>
    %371 = math.tanh %370 : vector<2x8xf32>
    %372 = arith.mulf %368, %356 : vector<2x8xf32>
    %373 = arith.mulf %367, %371 : vector<2x8xf32>
    %374 = arith.addf %372, %373 : vector<2x8xf32>
    %375 = math.tanh %374 : vector<2x8xf32>
    %376 = arith.mulf %369, %375 : vector<2x8xf32>
    %c1_98 = arith.constant 1 : index
    %c0_99 = arith.constant 0 : index
    %c0_100 = arith.constant 0 : index
    %377 = vector.load %arg10[%c1_98, %c0_99, %c0_100] : memref<5x2x8xf32, #tpu.memory_space<vmem>>, vector<1x2x8xf32>
    %378 = vector.shape_cast %377 : vector<1x2x8xf32> to vector<2x8xf32>
    %379 = vector.shape_cast %376 : vector<2x8xf32> to vector<1x2x8xf32>
    tpu.vector_store %arg10[%c1_98, %c0_99, %c0_100], %379 {strides = array<i32>} : memref<5x2x8xf32, #tpu.memory_space<vmem>>, vector<1x2x8xf32>,
    %c1_101 = arith.constant 1 : index
    %c0_102 = arith.constant 0 : index
    %c0_103 = arith.constant 0 : index
    %380 = vector.load %arg11[%c1_101, %c0_102, %c0_103] : memref<5x2x8xf32, #tpu.memory_space<vmem>>, vector<1x2x8xf32>
    %381 = vector.shape_cast %380 : vector<1x2x8xf32> to vector<2x8xf32>
    %382 = vector.shape_cast %374 : vector<2x8xf32> to vector<1x2x8xf32>
    tpu.vector_store %arg11[%c1_101, %c0_102, %c0_103], %382 {strides = array<i32>} : memref<5x2x8xf32, #tpu.memory_space<vmem>>, vector<1x2x8xf32>,
    %c1_104 = arith.constant 1 : index
    %c0_105 = arith.constant 0 : index
    %c0_106 = arith.constant 0 : index
    %383 = vector.load %arg2[%c1_104, %c0_105, %c0_106] : memref<4x8x32xf32, #tpu.memory_space<vmem>>, vector<1x8x32xf32>
    %384 = vector.shape_cast %383 : vector<1x8x32xf32> to vector<8x32xf32>
    %c2_107 = arith.constant 2 : index
    %c0_108 = arith.constant 0 : index
    %c0_109 = arith.constant 0 : index
    %385 = vector.load %arg3[%c2_107, %c0_108, %c0_109] : memref<5x8x32xf32, #tpu.memory_space<vmem>>, vector<1x8x32xf32>
    %386 = vector.shape_cast %385 : vector<1x8x32xf32> to vector<8x32xf32>
    %c2_110 = arith.constant 2 : index
    %c0_111 = arith.constant 0 : index
    %c0_112 = arith.constant 0 : index
    %387 = vector.load %arg4[%c2_110, %c0_111, %c0_112] : memref<5x1x32xf32, #tpu.memory_space<vmem>>, vector<1x1x32xf32>
    %388 = vector.shape_cast %387 : vector<1x1x32xf32> to vector<1x32xf32>
    %cst_113 = arith.constant dense<0.000000e+00> : vector<2x32xf32>
    %389 = tpu.matmul %250, %384, %cst_113 {dimension_numbers = #tpu.dot_dimension_numbers<[1], [0], [0], [1], [0, 0, 1, 1], [], []>} : vector<2x8xf32>, vector<8x32xf32>, vector<2x32xf32> -> vector<2x32xf32>
    %390 = vector.broadcast %388 : vector<1x32xf32> to vector<2x32xf32>
    %391 = arith.addf %389, %390 : vector<2x32xf32>
    %cst_114 = arith.constant dense<0.000000e+00> : vector<2x32xf32>
    %392 = tpu.matmul %268, %384, %cst_114 {dimension_numbers = #tpu.dot_dimension_numbers<[1], [0], [0], [1], [0, 0, 1, 1], [], []>} : vector<2x8xf32>, vector<8x32xf32>, vector<2x32xf32> -> vector<2x32xf32>
    %393 = vector.broadcast %388 : vector<1x32xf32> to vector<2x32xf32>
    %394 = arith.addf %392, %393 : vector<2x32xf32>
    %cst_115 = arith.constant dense<0.000000e+00> : vector<2x32xf32>
    %395 = tpu.matmul %286, %384, %cst_115 {dimension_numbers = #tpu.dot_dimension_numbers<[1], [0], [0], [1], [0, 0, 1, 1], [], []>} : vector<2x8xf32>, vector<8x32xf32>, vector<2x32xf32> -> vector<2x32xf32>
    %396 = vector.broadcast %388 : vector<1x32xf32> to vector<2x32xf32>
    %397 = arith.addf %395, %396 : vector<2x32xf32>
    %cst_116 = arith.constant dense<0.000000e+00> : vector<2x32xf32>
    %398 = tpu.matmul %304, %384, %cst_116 {dimension_numbers = #tpu.dot_dimension_numbers<[1], [0], [0], [1], [0, 0, 1, 1], [], []>} : vector<2x8xf32>, vector<8x32xf32>, vector<2x32xf32> -> vector<2x32xf32>
    %399 = vector.broadcast %388 : vector<1x32xf32> to vector<2x32xf32>
    %400 = arith.addf %398, %399 : vector<2x32xf32>
    %cst_117 = arith.constant dense<0.000000e+00> : vector<2x32xf32>
    %401 = tpu.matmul %322, %384, %cst_117 {dimension_numbers = #tpu.dot_dimension_numbers<[1], [0], [0], [1], [0, 0, 1, 1], [], []>} : vector<2x8xf32>, vector<8x32xf32>, vector<2x32xf32> -> vector<2x32xf32>
    %402 = vector.broadcast %388 : vector<1x32xf32> to vector<2x32xf32>
    %403 = arith.addf %401, %402 : vector<2x32xf32>
    %cst_118 = arith.constant dense<0.000000e+00> : vector<2x32xf32>
    %404 = tpu.matmul %340, %384, %cst_118 {dimension_numbers = #tpu.dot_dimension_numbers<[1], [0], [0], [1], [0, 0, 1, 1], [], []>} : vector<2x8xf32>, vector<8x32xf32>, vector<2x32xf32> -> vector<2x32xf32>
    %405 = vector.broadcast %388 : vector<1x32xf32> to vector<2x32xf32>
    %406 = arith.addf %404, %405 : vector<2x32xf32>
    %cst_119 = arith.constant dense<0.000000e+00> : vector<2x32xf32>
    %407 = tpu.matmul %358, %384, %cst_119 {dimension_numbers = #tpu.dot_dimension_numbers<[1], [0], [0], [1], [0, 0, 1, 1], [], []>} : vector<2x8xf32>, vector<8x32xf32>, vector<2x32xf32> -> vector<2x32xf32>
    %408 = vector.broadcast %388 : vector<1x32xf32> to vector<2x32xf32>
    %409 = arith.addf %407, %408 : vector<2x32xf32>
    %cst_120 = arith.constant dense<0.000000e+00> : vector<2x32xf32>
    %410 = tpu.matmul %376, %384, %cst_120 {dimension_numbers = #tpu.dot_dimension_numbers<[1], [0], [0], [1], [0, 0, 1, 1], [], []>} : vector<2x8xf32>, vector<8x32xf32>, vector<2x32xf32> -> vector<2x32xf32>
    %411 = vector.broadcast %388 : vector<1x32xf32> to vector<2x32xf32>
    %412 = arith.addf %410, %411 : vector<2x32xf32>
    %c2_121 = arith.constant 2 : index
    %c0_122 = arith.constant 0 : index
    %c0_123 = arith.constant 0 : index
    %413 = vector.load %arg5[%c2_121, %c0_122, %c0_123] : memref<5x2x8xf32, #tpu.memory_space<vmem>>, vector<1x2x8xf32>
    %414 = vector.shape_cast %413 : vector<1x2x8xf32> to vector<2x8xf32>
    %c2_124 = arith.constant 2 : index
    %c0_125 = arith.constant 0 : index
    %c0_126 = arith.constant 0 : index
    %415 = vector.load %arg6[%c2_124, %c0_125, %c0_126] : memref<5x2x8xf32, #tpu.memory_space<vmem>>, vector<1x2x8xf32>
    %416 = vector.shape_cast %415 : vector<1x2x8xf32> to vector<2x8xf32>
    %cst_127 = arith.constant dense<0.000000e+00> : vector<2x32xf32>
    %417 = tpu.matmul %414, %386, %cst_127 {dimension_numbers = #tpu.dot_dimension_numbers<[1], [0], [0], [1], [0, 0, 1, 1], [], []>} : vector<2x8xf32>, vector<8x32xf32>, vector<2x32xf32> -> vector<2x32xf32>
    %418 = arith.addf %391, %417 : vector<2x32xf32>
    %419 = vector.extract_strided_slice %418 {offsets = [0, 0], sizes = [2, 24], strides = [1, 1]} : vector<2x32xf32> to vector<2x24xf32>
    %420 = arith.negf %419 : vector<2x24xf32>
    %421 = math.exp %420 : vector<2x24xf32>
    %cst_128 = arith.constant 1.000000e+00 : f32
    %422 = vector.broadcast %cst_128 : f32 to vector<2x24xf32>
    %423 = arith.addf %422, %421 : vector<2x24xf32>
    %424 = arith.divf %422, %423 : vector<2x24xf32>
    %425 = vector.extract_strided_slice %424 {offsets = [0, 0], sizes = [2, 8], strides = [1, 1]} : vector<2x24xf32> to vector<2x8xf32>
    %426 = vector.extract_strided_slice %424 {offsets = [0, 8], sizes = [2, 8], strides = [1, 1]} : vector<2x24xf32> to vector<2x8xf32>
    %427 = vector.extract_strided_slice %424 {offsets = [0, 16], sizes = [2, 8], strides = [1, 1]} : vector<2x24xf32> to vector<2x8xf32>
    %428 = vector.extract_strided_slice %418 {offsets = [0, 24], sizes = [2, 8], strides = [1, 1]} : vector<2x32xf32> to vector<2x8xf32>
    %429 = math.tanh %428 : vector<2x8xf32>
    %430 = arith.mulf %426, %416 : vector<2x8xf32>
    %431 = arith.mulf %425, %429 : vector<2x8xf32>
    %432 = arith.addf %430, %431 : vector<2x8xf32>
    %433 = math.tanh %432 : vector<2x8xf32>
    %434 = arith.mulf %427, %433 : vector<2x8xf32>
    %cst_129 = arith.constant dense<0.000000e+00> : vector<2x32xf32>
    %435 = tpu.matmul %434, %386, %cst_129 {dimension_numbers = #tpu.dot_dimension_numbers<[1], [0], [0], [1], [0, 0, 1, 1], [], []>} : vector<2x8xf32>, vector<8x32xf32>, vector<2x32xf32> -> vector<2x32xf32>
    %436 = arith.addf %394, %435 : vector<2x32xf32>
    %437 = vector.extract_strided_slice %436 {offsets = [0, 0], sizes = [2, 24], strides = [1, 1]} : vector<2x32xf32> to vector<2x24xf32>
    %438 = arith.negf %437 : vector<2x24xf32>
    %439 = math.exp %438 : vector<2x24xf32>
    %cst_130 = arith.constant 1.000000e+00 : f32
    %440 = vector.broadcast %cst_130 : f32 to vector<2x24xf32>
    %441 = arith.addf %440, %439 : vector<2x24xf32>
    %442 = arith.divf %440, %441 : vector<2x24xf32>
    %443 = vector.extract_strided_slice %442 {offsets = [0, 0], sizes = [2, 8], strides = [1, 1]} : vector<2x24xf32> to vector<2x8xf32>
    %444 = vector.extract_strided_slice %442 {offsets = [0, 8], sizes = [2, 8], strides = [1, 1]} : vector<2x24xf32> to vector<2x8xf32>
    %445 = vector.extract_strided_slice %442 {offsets = [0, 16], sizes = [2, 8], strides = [1, 1]} : vector<2x24xf32> to vector<2x8xf32>
    %446 = vector.extract_strided_slice %436 {offsets = [0, 24], sizes = [2, 8], strides = [1, 1]} : vector<2x32xf32> to vector<2x8xf32>
    %447 = math.tanh %446 : vector<2x8xf32>
    %448 = arith.mulf %444, %432 : vector<2x8xf32>
    %449 = arith.mulf %443, %447 : vector<2x8xf32>
    %450 = arith.addf %448, %449 : vector<2x8xf32>
    %451 = math.tanh %450 : vector<2x8xf32>
    %452 = arith.mulf %445, %451 : vector<2x8xf32>
    %cst_131 = arith.constant dense<0.000000e+00> : vector<2x32xf32>
    %453 = tpu.matmul %452, %386, %cst_131 {dimension_numbers = #tpu.dot_dimension_numbers<[1], [0], [0], [1], [0, 0, 1, 1], [], []>} : vector<2x8xf32>, vector<8x32xf32>, vector<2x32xf32> -> vector<2x32xf32>
    %454 = arith.addf %397, %453 : vector<2x32xf32>
    %455 = vector.extract_strided_slice %454 {offsets = [0, 0], sizes = [2, 24], strides = [1, 1]} : vector<2x32xf32> to vector<2x24xf32>
    %456 = arith.negf %455 : vector<2x24xf32>
    %457 = math.exp %456 : vector<2x24xf32>
    %cst_132 = arith.constant 1.000000e+00 : f32
    %458 = vector.broadcast %cst_132 : f32 to vector<2x24xf32>
    %459 = arith.addf %458, %457 : vector<2x24xf32>
    %460 = arith.divf %458, %459 : vector<2x24xf32>
    %461 = vector.extract_strided_slice %460 {offsets = [0, 0], sizes = [2, 8], strides = [1, 1]} : vector<2x24xf32> to vector<2x8xf32>
    %462 = vector.extract_strided_slice %460 {offsets = [0, 8], sizes = [2, 8], strides = [1, 1]} : vector<2x24xf32> to vector<2x8xf32>
    %463 = vector.extract_strided_slice %460 {offsets = [0, 16], sizes = [2, 8], strides = [1, 1]} : vector<2x24xf32> to vector<2x8xf32>
    %464 = vector.extract_strided_slice %454 {offsets = [0, 24], sizes = [2, 8], strides = [1, 1]} : vector<2x32xf32> to vector<2x8xf32>
    %465 = math.tanh %464 : vector<2x8xf32>
    %466 = arith.mulf %462, %450 : vector<2x8xf32>
    %467 = arith.mulf %461, %465 : vector<2x8xf32>
    %468 = arith.addf %466, %467 : vector<2x8xf32>
    %469 = math.tanh %468 : vector<2x8xf32>
    %470 = arith.mulf %463, %469 : vector<2x8xf32>
    %cst_133 = arith.constant dense<0.000000e+00> : vector<2x32xf32>
    %471 = tpu.matmul %470, %386, %cst_133 {dimension_numbers = #tpu.dot_dimension_numbers<[1], [0], [0], [1], [0, 0, 1, 1], [], []>} : vector<2x8xf32>, vector<8x32xf32>, vector<2x32xf32> -> vector<2x32xf32>
    %472 = arith.addf %400, %471 : vector<2x32xf32>
    %473 = vector.extract_strided_slice %472 {offsets = [0, 0], sizes = [2, 24], strides = [1, 1]} : vector<2x32xf32> to vector<2x24xf32>
    %474 = arith.negf %473 : vector<2x24xf32>
    %475 = math.exp %474 : vector<2x24xf32>
    %cst_134 = arith.constant 1.000000e+00 : f32
    %476 = vector.broadcast %cst_134 : f32 to vector<2x24xf32>
    %477 = arith.addf %476, %475 : vector<2x24xf32>
    %478 = arith.divf %476, %477 : vector<2x24xf32>
    %479 = vector.extract_strided_slice %478 {offsets = [0, 0], sizes = [2, 8], strides = [1, 1]} : vector<2x24xf32> to vector<2x8xf32>
    %480 = vector.extract_strided_slice %478 {offsets = [0, 8], sizes = [2, 8], strides = [1, 1]} : vector<2x24xf32> to vector<2x8xf32>
    %481 = vector.extract_strided_slice %478 {offsets = [0, 16], sizes = [2, 8], strides = [1, 1]} : vector<2x24xf32> to vector<2x8xf32>
    %482 = vector.extract_strided_slice %472 {offsets = [0, 24], sizes = [2, 8], strides = [1, 1]} : vector<2x32xf32> to vector<2x8xf32>
    %483 = math.tanh %482 : vector<2x8xf32>
    %484 = arith.mulf %480, %468 : vector<2x8xf32>
    %485 = arith.mulf %479, %483 : vector<2x8xf32>
    %486 = arith.addf %484, %485 : vector<2x8xf32>
    %487 = math.tanh %486 : vector<2x8xf32>
    %488 = arith.mulf %481, %487 : vector<2x8xf32>
    %cst_135 = arith.constant dense<0.000000e+00> : vector<2x32xf32>
    %489 = tpu.matmul %488, %386, %cst_135 {dimension_numbers = #tpu.dot_dimension_numbers<[1], [0], [0], [1], [0, 0, 1, 1], [], []>} : vector<2x8xf32>, vector<8x32xf32>, vector<2x32xf32> -> vector<2x32xf32>
    %490 = arith.addf %403, %489 : vector<2x32xf32>
    %491 = vector.extract_strided_slice %490 {offsets = [0, 0], sizes = [2, 24], strides = [1, 1]} : vector<2x32xf32> to vector<2x24xf32>
    %492 = arith.negf %491 : vector<2x24xf32>
    %493 = math.exp %492 : vector<2x24xf32>
    %cst_136 = arith.constant 1.000000e+00 : f32
    %494 = vector.broadcast %cst_136 : f32 to vector<2x24xf32>
    %495 = arith.addf %494, %493 : vector<2x24xf32>
    %496 = arith.divf %494, %495 : vector<2x24xf32>
    %497 = vector.extract_strided_slice %496 {offsets = [0, 0], sizes = [2, 8], strides = [1, 1]} : vector<2x24xf32> to vector<2x8xf32>
    %498 = vector.extract_strided_slice %496 {offsets = [0, 8], sizes = [2, 8], strides = [1, 1]} : vector<2x24xf32> to vector<2x8xf32>
    %499 = vector.extract_strided_slice %496 {offsets = [0, 16], sizes = [2, 8], strides = [1, 1]} : vector<2x24xf32> to vector<2x8xf32>
    %500 = vector.extract_strided_slice %490 {offsets = [0, 24], sizes = [2, 8], strides = [1, 1]} : vector<2x32xf32> to vector<2x8xf32>
    %501 = math.tanh %500 : vector<2x8xf32>
    %502 = arith.mulf %498, %486 : vector<2x8xf32>
    %503 = arith.mulf %497, %501 : vector<2x8xf32>
    %504 = arith.addf %502, %503 : vector<2x8xf32>
    %505 = math.tanh %504 : vector<2x8xf32>
    %506 = arith.mulf %499, %505 : vector<2x8xf32>
    %cst_137 = arith.constant dense<0.000000e+00> : vector<2x32xf32>
    %507 = tpu.matmul %506, %386, %cst_137 {dimension_numbers = #tpu.dot_dimension_numbers<[1], [0], [0], [1], [0, 0, 1, 1], [], []>} : vector<2x8xf32>, vector<8x32xf32>, vector<2x32xf32> -> vector<2x32xf32>
    %508 = arith.addf %406, %507 : vector<2x32xf32>
    %509 = vector.extract_strided_slice %508 {offsets = [0, 0], sizes = [2, 24], strides = [1, 1]} : vector<2x32xf32> to vector<2x24xf32>
    %510 = arith.negf %509 : vector<2x24xf32>
    %511 = math.exp %510 : vector<2x24xf32>
    %cst_138 = arith.constant 1.000000e+00 : f32
    %512 = vector.broadcast %cst_138 : f32 to vector<2x24xf32>
    %513 = arith.addf %512, %511 : vector<2x24xf32>
    %514 = arith.divf %512, %513 : vector<2x24xf32>
    %515 = vector.extract_strided_slice %514 {offsets = [0, 0], sizes = [2, 8], strides = [1, 1]} : vector<2x24xf32> to vector<2x8xf32>
    %516 = vector.extract_strided_slice %514 {offsets = [0, 8], sizes = [2, 8], strides = [1, 1]} : vector<2x24xf32> to vector<2x8xf32>
    %517 = vector.extract_strided_slice %514 {offsets = [0, 16], sizes = [2, 8], strides = [1, 1]} : vector<2x24xf32> to vector<2x8xf32>
    %518 = vector.extract_strided_slice %508 {offsets = [0, 24], sizes = [2, 8], strides = [1, 1]} : vector<2x32xf32> to vector<2x8xf32>
    %519 = math.tanh %518 : vector<2x8xf32>
    %520 = arith.mulf %516, %504 : vector<2x8xf32>
    %521 = arith.mulf %515, %519 : vector<2x8xf32>
    %522 = arith.addf %520, %521 : vector<2x8xf32>
    %523 = math.tanh %522 : vector<2x8xf32>
    %524 = arith.mulf %517, %523 : vector<2x8xf32>
    %cst_139 = arith.constant dense<0.000000e+00> : vector<2x32xf32>
    %525 = tpu.matmul %524, %386, %cst_139 {dimension_numbers = #tpu.dot_dimension_numbers<[1], [0], [0], [1], [0, 0, 1, 1], [], []>} : vector<2x8xf32>, vector<8x32xf32>, vector<2x32xf32> -> vector<2x32xf32>
    %526 = arith.addf %409, %525 : vector<2x32xf32>
    %527 = vector.extract_strided_slice %526 {offsets = [0, 0], sizes = [2, 24], strides = [1, 1]} : vector<2x32xf32> to vector<2x24xf32>
    %528 = arith.negf %527 : vector<2x24xf32>
    %529 = math.exp %528 : vector<2x24xf32>
    %cst_140 = arith.constant 1.000000e+00 : f32
    %530 = vector.broadcast %cst_140 : f32 to vector<2x24xf32>
    %531 = arith.addf %530, %529 : vector<2x24xf32>
    %532 = arith.divf %530, %531 : vector<2x24xf32>
    %533 = vector.extract_strided_slice %532 {offsets = [0, 0], sizes = [2, 8], strides = [1, 1]} : vector<2x24xf32> to vector<2x8xf32>
    %534 = vector.extract_strided_slice %532 {offsets = [0, 8], sizes = [2, 8], strides = [1, 1]} : vector<2x24xf32> to vector<2x8xf32>
    %535 = vector.extract_strided_slice %532 {offsets = [0, 16], sizes = [2, 8], strides = [1, 1]} : vector<2x24xf32> to vector<2x8xf32>
    %536 = vector.extract_strided_slice %526 {offsets = [0, 24], sizes = [2, 8], strides = [1, 1]} : vector<2x32xf32> to vector<2x8xf32>
    %537 = math.tanh %536 : vector<2x8xf32>
    %538 = arith.mulf %534, %522 : vector<2x8xf32>
    %539 = arith.mulf %533, %537 : vector<2x8xf32>
    %540 = arith.addf %538, %539 : vector<2x8xf32>
    %541 = math.tanh %540 : vector<2x8xf32>
    %542 = arith.mulf %535, %541 : vector<2x8xf32>
    %cst_141 = arith.constant dense<0.000000e+00> : vector<2x32xf32>
    %543 = tpu.matmul %542, %386, %cst_141 {dimension_numbers = #tpu.dot_dimension_numbers<[1], [0], [0], [1], [0, 0, 1, 1], [], []>} : vector<2x8xf32>, vector<8x32xf32>, vector<2x32xf32> -> vector<2x32xf32>
    %544 = arith.addf %412, %543 : vector<2x32xf32>
    %545 = vector.extract_strided_slice %544 {offsets = [0, 0], sizes = [2, 24], strides = [1, 1]} : vector<2x32xf32> to vector<2x24xf32>
    %546 = arith.negf %545 : vector<2x24xf32>
    %547 = math.exp %546 : vector<2x24xf32>
    %cst_142 = arith.constant 1.000000e+00 : f32
    %548 = vector.broadcast %cst_142 : f32 to vector<2x24xf32>
    %549 = arith.addf %548, %547 : vector<2x24xf32>
    %550 = arith.divf %548, %549 : vector<2x24xf32>
    %551 = vector.extract_strided_slice %550 {offsets = [0, 0], sizes = [2, 8], strides = [1, 1]} : vector<2x24xf32> to vector<2x8xf32>
    %552 = vector.extract_strided_slice %550 {offsets = [0, 8], sizes = [2, 8], strides = [1, 1]} : vector<2x24xf32> to vector<2x8xf32>
    %553 = vector.extract_strided_slice %550 {offsets = [0, 16], sizes = [2, 8], strides = [1, 1]} : vector<2x24xf32> to vector<2x8xf32>
    %554 = vector.extract_strided_slice %544 {offsets = [0, 24], sizes = [2, 8], strides = [1, 1]} : vector<2x32xf32> to vector<2x8xf32>
    %555 = math.tanh %554 : vector<2x8xf32>
    %556 = arith.mulf %552, %540 : vector<2x8xf32>
    %557 = arith.mulf %551, %555 : vector<2x8xf32>
    %558 = arith.addf %556, %557 : vector<2x8xf32>
    %559 = math.tanh %558 : vector<2x8xf32>
    %560 = arith.mulf %553, %559 : vector<2x8xf32>
    %c2_143 = arith.constant 2 : index
    %c0_144 = arith.constant 0 : index
    %c0_145 = arith.constant 0 : index
    %561 = vector.load %arg10[%c2_143, %c0_144, %c0_145] : memref<5x2x8xf32, #tpu.memory_space<vmem>>, vector<1x2x8xf32>
    %562 = vector.shape_cast %561 : vector<1x2x8xf32> to vector<2x8xf32>
    %563 = vector.shape_cast %560 : vector<2x8xf32> to vector<1x2x8xf32>
    tpu.vector_store %arg10[%c2_143, %c0_144, %c0_145], %563 {strides = array<i32>} : memref<5x2x8xf32, #tpu.memory_space<vmem>>, vector<1x2x8xf32>,
    %c2_146 = arith.constant 2 : index
    %c0_147 = arith.constant 0 : index
    %c0_148 = arith.constant 0 : index
    %564 = vector.load %arg11[%c2_146, %c0_147, %c0_148] : memref<5x2x8xf32, #tpu.memory_space<vmem>>, vector<1x2x8xf32>
    %565 = vector.shape_cast %564 : vector<1x2x8xf32> to vector<2x8xf32>
    %566 = vector.shape_cast %558 : vector<2x8xf32> to vector<1x2x8xf32>
    tpu.vector_store %arg11[%c2_146, %c0_147, %c0_148], %566 {strides = array<i32>} : memref<5x2x8xf32, #tpu.memory_space<vmem>>, vector<1x2x8xf32>,
    %c2_149 = arith.constant 2 : index
    %c0_150 = arith.constant 0 : index
    %c0_151 = arith.constant 0 : index
    %567 = vector.load %arg2[%c2_149, %c0_150, %c0_151] : memref<4x8x32xf32, #tpu.memory_space<vmem>>, vector<1x8x32xf32>
    %568 = vector.shape_cast %567 : vector<1x8x32xf32> to vector<8x32xf32>
    %c3_152 = arith.constant 3 : index
    %c0_153 = arith.constant 0 : index
    %c0_154 = arith.constant 0 : index
    %569 = vector.load %arg3[%c3_152, %c0_153, %c0_154] : memref<5x8x32xf32, #tpu.memory_space<vmem>>, vector<1x8x32xf32>
    %570 = vector.shape_cast %569 : vector<1x8x32xf32> to vector<8x32xf32>
    %c3_155 = arith.constant 3 : index
    %c0_156 = arith.constant 0 : index
    %c0_157 = arith.constant 0 : index
    %571 = vector.load %arg4[%c3_155, %c0_156, %c0_157] : memref<5x1x32xf32, #tpu.memory_space<vmem>>, vector<1x1x32xf32>
    %572 = vector.shape_cast %571 : vector<1x1x32xf32> to vector<1x32xf32>
    %cst_158 = arith.constant dense<0.000000e+00> : vector<2x32xf32>
    %573 = tpu.matmul %434, %568, %cst_158 {dimension_numbers = #tpu.dot_dimension_numbers<[1], [0], [0], [1], [0, 0, 1, 1], [], []>} : vector<2x8xf32>, vector<8x32xf32>, vector<2x32xf32> -> vector<2x32xf32>
    %574 = vector.broadcast %572 : vector<1x32xf32> to vector<2x32xf32>
    %575 = arith.addf %573, %574 : vector<2x32xf32>
    %cst_159 = arith.constant dense<0.000000e+00> : vector<2x32xf32>
    %576 = tpu.matmul %452, %568, %cst_159 {dimension_numbers = #tpu.dot_dimension_numbers<[1], [0], [0], [1], [0, 0, 1, 1], [], []>} : vector<2x8xf32>, vector<8x32xf32>, vector<2x32xf32> -> vector<2x32xf32>
    %577 = vector.broadcast %572 : vector<1x32xf32> to vector<2x32xf32>
    %578 = arith.addf %576, %577 : vector<2x32xf32>
    %cst_160 = arith.constant dense<0.000000e+00> : vector<2x32xf32>
    %579 = tpu.matmul %470, %568, %cst_160 {dimension_numbers = #tpu.dot_dimension_numbers<[1], [0], [0], [1], [0, 0, 1, 1], [], []>} : vector<2x8xf32>, vector<8x32xf32>, vector<2x32xf32> -> vector<2x32xf32>
    %580 = vector.broadcast %572 : vector<1x32xf32> to vector<2x32xf32>
    %581 = arith.addf %579, %580 : vector<2x32xf32>
    %cst_161 = arith.constant dense<0.000000e+00> : vector<2x32xf32>
    %582 = tpu.matmul %488, %568, %cst_161 {dimension_numbers = #tpu.dot_dimension_numbers<[1], [0], [0], [1], [0, 0, 1, 1], [], []>} : vector<2x8xf32>, vector<8x32xf32>, vector<2x32xf32> -> vector<2x32xf32>
    %583 = vector.broadcast %572 : vector<1x32xf32> to vector<2x32xf32>
    %584 = arith.addf %582, %583 : vector<2x32xf32>
    %cst_162 = arith.constant dense<0.000000e+00> : vector<2x32xf32>
    %585 = tpu.matmul %506, %568, %cst_162 {dimension_numbers = #tpu.dot_dimension_numbers<[1], [0], [0], [1], [0, 0, 1, 1], [], []>} : vector<2x8xf32>, vector<8x32xf32>, vector<2x32xf32> -> vector<2x32xf32>
    %586 = vector.broadcast %572 : vector<1x32xf32> to vector<2x32xf32>
    %587 = arith.addf %585, %586 : vector<2x32xf32>
    %cst_163 = arith.constant dense<0.000000e+00> : vector<2x32xf32>
    %588 = tpu.matmul %524, %568, %cst_163 {dimension_numbers = #tpu.dot_dimension_numbers<[1], [0], [0], [1], [0, 0, 1, 1], [], []>} : vector<2x8xf32>, vector<8x32xf32>, vector<2x32xf32> -> vector<2x32xf32>
    %589 = vector.broadcast %572 : vector<1x32xf32> to vector<2x32xf32>
    %590 = arith.addf %588, %589 : vector<2x32xf32>
    %cst_164 = arith.constant dense<0.000000e+00> : vector<2x32xf32>
    %591 = tpu.matmul %542, %568, %cst_164 {dimension_numbers = #tpu.dot_dimension_numbers<[1], [0], [0], [1], [0, 0, 1, 1], [], []>} : vector<2x8xf32>, vector<8x32xf32>, vector<2x32xf32> -> vector<2x32xf32>
    %592 = vector.broadcast %572 : vector<1x32xf32> to vector<2x32xf32>
    %593 = arith.addf %591, %592 : vector<2x32xf32>
    %cst_165 = arith.constant dense<0.000000e+00> : vector<2x32xf32>
    %594 = tpu.matmul %560, %568, %cst_165 {dimension_numbers = #tpu.dot_dimension_numbers<[1], [0], [0], [1], [0, 0, 1, 1], [], []>} : vector<2x8xf32>, vector<8x32xf32>, vector<2x32xf32> -> vector<2x32xf32>
    %595 = vector.broadcast %572 : vector<1x32xf32> to vector<2x32xf32>
    %596 = arith.addf %594, %595 : vector<2x32xf32>
    %c3_166 = arith.constant 3 : index
    %c0_167 = arith.constant 0 : index
    %c0_168 = arith.constant 0 : index
    %597 = vector.load %arg5[%c3_166, %c0_167, %c0_168] : memref<5x2x8xf32, #tpu.memory_space<vmem>>, vector<1x2x8xf32>
    %598 = vector.shape_cast %597 : vector<1x2x8xf32> to vector<2x8xf32>
    %c3_169 = arith.constant 3 : index
    %c0_170 = arith.constant 0 : index
    %c0_171 = arith.constant 0 : index
    %599 = vector.load %arg6[%c3_169, %c0_170, %c0_171] : memref<5x2x8xf32, #tpu.memory_space<vmem>>, vector<1x2x8xf32>
    %600 = vector.shape_cast %599 : vector<1x2x8xf32> to vector<2x8xf32>
    %cst_172 = arith.constant dense<0.000000e+00> : vector<2x32xf32>
    %601 = tpu.matmul %598, %570, %cst_172 {dimension_numbers = #tpu.dot_dimension_numbers<[1], [0], [0], [1], [0, 0, 1, 1], [], []>} : vector<2x8xf32>, vector<8x32xf32>, vector<2x32xf32> -> vector<2x32xf32>
    %602 = arith.addf %575, %601 : vector<2x32xf32>
    %603 = vector.extract_strided_slice %602 {offsets = [0, 0], sizes = [2, 24], strides = [1, 1]} : vector<2x32xf32> to vector<2x24xf32>
    %604 = arith.negf %603 : vector<2x24xf32>
    %605 = math.exp %604 : vector<2x24xf32>
    %cst_173 = arith.constant 1.000000e+00 : f32
    %606 = vector.broadcast %cst_173 : f32 to vector<2x24xf32>
    %607 = arith.addf %606, %605 : vector<2x24xf32>
    %608 = arith.divf %606, %607 : vector<2x24xf32>
    %609 = vector.extract_strided_slice %608 {offsets = [0, 0], sizes = [2, 8], strides = [1, 1]} : vector<2x24xf32> to vector<2x8xf32>
    %610 = vector.extract_strided_slice %608 {offsets = [0, 8], sizes = [2, 8], strides = [1, 1]} : vector<2x24xf32> to vector<2x8xf32>
    %611 = vector.extract_strided_slice %608 {offsets = [0, 16], sizes = [2, 8], strides = [1, 1]} : vector<2x24xf32> to vector<2x8xf32>
    %612 = vector.extract_strided_slice %602 {offsets = [0, 24], sizes = [2, 8], strides = [1, 1]} : vector<2x32xf32> to vector<2x8xf32>
    %613 = math.tanh %612 : vector<2x8xf32>
    %614 = arith.mulf %610, %600 : vector<2x8xf32>
    %615 = arith.mulf %609, %613 : vector<2x8xf32>
    %616 = arith.addf %614, %615 : vector<2x8xf32>
    %617 = math.tanh %616 : vector<2x8xf32>
    %618 = arith.mulf %611, %617 : vector<2x8xf32>
    %cst_174 = arith.constant dense<0.000000e+00> : vector<2x32xf32>
    %619 = tpu.matmul %618, %570, %cst_174 {dimension_numbers = #tpu.dot_dimension_numbers<[1], [0], [0], [1], [0, 0, 1, 1], [], []>} : vector<2x8xf32>, vector<8x32xf32>, vector<2x32xf32> -> vector<2x32xf32>
    %620 = arith.addf %578, %619 : vector<2x32xf32>
    %621 = vector.extract_strided_slice %620 {offsets = [0, 0], sizes = [2, 24], strides = [1, 1]} : vector<2x32xf32> to vector<2x24xf32>
    %622 = arith.negf %621 : vector<2x24xf32>
    %623 = math.exp %622 : vector<2x24xf32>
    %cst_175 = arith.constant 1.000000e+00 : f32
    %624 = vector.broadcast %cst_175 : f32 to vector<2x24xf32>
    %625 = arith.addf %624, %623 : vector<2x24xf32>
    %626 = arith.divf %624, %625 : vector<2x24xf32>
    %627 = vector.extract_strided_slice %626 {offsets = [0, 0], sizes = [2, 8], strides = [1, 1]} : vector<2x24xf32> to vector<2x8xf32>
    %628 = vector.extract_strided_slice %626 {offsets = [0, 8], sizes = [2, 8], strides = [1, 1]} : vector<2x24xf32> to vector<2x8xf32>
    %629 = vector.extract_strided_slice %626 {offsets = [0, 16], sizes = [2, 8], strides = [1, 1]} : vector<2x24xf32> to vector<2x8xf32>
    %630 = vector.extract_strided_slice %620 {offsets = [0, 24], sizes = [2, 8], strides = [1, 1]} : vector<2x32xf32> to vector<2x8xf32>
    %631 = math.tanh %630 : vector<2x8xf32>
    %632 = arith.mulf %628, %616 : vector<2x8xf32>
    %633 = arith.mulf %627, %631 : vector<2x8xf32>
    %634 = arith.addf %632, %633 : vector<2x8xf32>
    %635 = math.tanh %634 : vector<2x8xf32>
    %636 = arith.mulf %629, %635 : vector<2x8xf32>
    %cst_176 = arith.constant dense<0.000000e+00> : vector<2x32xf32>
    %637 = tpu.matmul %636, %570, %cst_176 {dimension_numbers = #tpu.dot_dimension_numbers<[1], [0], [0], [1], [0, 0, 1, 1], [], []>} : vector<2x8xf32>, vector<8x32xf32>, vector<2x32xf32> -> vector<2x32xf32>
    %638 = arith.addf %581, %637 : vector<2x32xf32>
    %639 = vector.extract_strided_slice %638 {offsets = [0, 0], sizes = [2, 24], strides = [1, 1]} : vector<2x32xf32> to vector<2x24xf32>
    %640 = arith.negf %639 : vector<2x24xf32>
    %641 = math.exp %640 : vector<2x24xf32>
    %cst_177 = arith.constant 1.000000e+00 : f32
    %642 = vector.broadcast %cst_177 : f32 to vector<2x24xf32>
    %643 = arith.addf %642, %641 : vector<2x24xf32>
    %644 = arith.divf %642, %643 : vector<2x24xf32>
    %645 = vector.extract_strided_slice %644 {offsets = [0, 0], sizes = [2, 8], strides = [1, 1]} : vector<2x24xf32> to vector<2x8xf32>
    %646 = vector.extract_strided_slice %644 {offsets = [0, 8], sizes = [2, 8], strides = [1, 1]} : vector<2x24xf32> to vector<2x8xf32>
    %647 = vector.extract_strided_slice %644 {offsets = [0, 16], sizes = [2, 8], strides = [1, 1]} : vector<2x24xf32> to vector<2x8xf32>
    %648 = vector.extract_strided_slice %638 {offsets = [0, 24], sizes = [2, 8], strides = [1, 1]} : vector<2x32xf32> to vector<2x8xf32>
    %649 = math.tanh %648 : vector<2x8xf32>
    %650 = arith.mulf %646, %634 : vector<2x8xf32>
    %651 = arith.mulf %645, %649 : vector<2x8xf32>
    %652 = arith.addf %650, %651 : vector<2x8xf32>
    %653 = math.tanh %652 : vector<2x8xf32>
    %654 = arith.mulf %647, %653 : vector<2x8xf32>
    %cst_178 = arith.constant dense<0.000000e+00> : vector<2x32xf32>
    %655 = tpu.matmul %654, %570, %cst_178 {dimension_numbers = #tpu.dot_dimension_numbers<[1], [0], [0], [1], [0, 0, 1, 1], [], []>} : vector<2x8xf32>, vector<8x32xf32>, vector<2x32xf32> -> vector<2x32xf32>
    %656 = arith.addf %584, %655 : vector<2x32xf32>
    %657 = vector.extract_strided_slice %656 {offsets = [0, 0], sizes = [2, 24], strides = [1, 1]} : vector<2x32xf32> to vector<2x24xf32>
    %658 = arith.negf %657 : vector<2x24xf32>
    %659 = math.exp %658 : vector<2x24xf32>
    %cst_179 = arith.constant 1.000000e+00 : f32
    %660 = vector.broadcast %cst_179 : f32 to vector<2x24xf32>
    %661 = arith.addf %660, %659 : vector<2x24xf32>
    %662 = arith.divf %660, %661 : vector<2x24xf32>
    %663 = vector.extract_strided_slice %662 {offsets = [0, 0], sizes = [2, 8], strides = [1, 1]} : vector<2x24xf32> to vector<2x8xf32>
    %664 = vector.extract_strided_slice %662 {offsets = [0, 8], sizes = [2, 8], strides = [1, 1]} : vector<2x24xf32> to vector<2x8xf32>
    %665 = vector.extract_strided_slice %662 {offsets = [0, 16], sizes = [2, 8], strides = [1, 1]} : vector<2x24xf32> to vector<2x8xf32>
    %666 = vector.extract_strided_slice %656 {offsets = [0, 24], sizes = [2, 8], strides = [1, 1]} : vector<2x32xf32> to vector<2x8xf32>
    %667 = math.tanh %666 : vector<2x8xf32>
    %668 = arith.mulf %664, %652 : vector<2x8xf32>
    %669 = arith.mulf %663, %667 : vector<2x8xf32>
    %670 = arith.addf %668, %669 : vector<2x8xf32>
    %671 = math.tanh %670 : vector<2x8xf32>
    %672 = arith.mulf %665, %671 : vector<2x8xf32>
    %cst_180 = arith.constant dense<0.000000e+00> : vector<2x32xf32>
    %673 = tpu.matmul %672, %570, %cst_180 {dimension_numbers = #tpu.dot_dimension_numbers<[1], [0], [0], [1], [0, 0, 1, 1], [], []>} : vector<2x8xf32>, vector<8x32xf32>, vector<2x32xf32> -> vector<2x32xf32>
    %674 = arith.addf %587, %673 : vector<2x32xf32>
    %675 = vector.extract_strided_slice %674 {offsets = [0, 0], sizes = [2, 24], strides = [1, 1]} : vector<2x32xf32> to vector<2x24xf32>
    %676 = arith.negf %675 : vector<2x24xf32>
    %677 = math.exp %676 : vector<2x24xf32>
    %cst_181 = arith.constant 1.000000e+00 : f32
    %678 = vector.broadcast %cst_181 : f32 to vector<2x24xf32>
    %679 = arith.addf %678, %677 : vector<2x24xf32>
    %680 = arith.divf %678, %679 : vector<2x24xf32>
    %681 = vector.extract_strided_slice %680 {offsets = [0, 0], sizes = [2, 8], strides = [1, 1]} : vector<2x24xf32> to vector<2x8xf32>
    %682 = vector.extract_strided_slice %680 {offsets = [0, 8], sizes = [2, 8], strides = [1, 1]} : vector<2x24xf32> to vector<2x8xf32>
    %683 = vector.extract_strided_slice %680 {offsets = [0, 16], sizes = [2, 8], strides = [1, 1]} : vector<2x24xf32> to vector<2x8xf32>
    %684 = vector.extract_strided_slice %674 {offsets = [0, 24], sizes = [2, 8], strides = [1, 1]} : vector<2x32xf32> to vector<2x8xf32>
    %685 = math.tanh %684 : vector<2x8xf32>
    %686 = arith.mulf %682, %670 : vector<2x8xf32>
    %687 = arith.mulf %681, %685 : vector<2x8xf32>
    %688 = arith.addf %686, %687 : vector<2x8xf32>
    %689 = math.tanh %688 : vector<2x8xf32>
    %690 = arith.mulf %683, %689 : vector<2x8xf32>
    %cst_182 = arith.constant dense<0.000000e+00> : vector<2x32xf32>
    %691 = tpu.matmul %690, %570, %cst_182 {dimension_numbers = #tpu.dot_dimension_numbers<[1], [0], [0], [1], [0, 0, 1, 1], [], []>} : vector<2x8xf32>, vector<8x32xf32>, vector<2x32xf32> -> vector<2x32xf32>
    %692 = arith.addf %590, %691 : vector<2x32xf32>
    %693 = vector.extract_strided_slice %692 {offsets = [0, 0], sizes = [2, 24], strides = [1, 1]} : vector<2x32xf32> to vector<2x24xf32>
    %694 = arith.negf %693 : vector<2x24xf32>
    %695 = math.exp %694 : vector<2x24xf32>
    %cst_183 = arith.constant 1.000000e+00 : f32
    %696 = vector.broadcast %cst_183 : f32 to vector<2x24xf32>
    %697 = arith.addf %696, %695 : vector<2x24xf32>
    %698 = arith.divf %696, %697 : vector<2x24xf32>
    %699 = vector.extract_strided_slice %698 {offsets = [0, 0], sizes = [2, 8], strides = [1, 1]} : vector<2x24xf32> to vector<2x8xf32>
    %700 = vector.extract_strided_slice %698 {offsets = [0, 8], sizes = [2, 8], strides = [1, 1]} : vector<2x24xf32> to vector<2x8xf32>
    %701 = vector.extract_strided_slice %698 {offsets = [0, 16], sizes = [2, 8], strides = [1, 1]} : vector<2x24xf32> to vector<2x8xf32>
    %702 = vector.extract_strided_slice %692 {offsets = [0, 24], sizes = [2, 8], strides = [1, 1]} : vector<2x32xf32> to vector<2x8xf32>
    %703 = math.tanh %702 : vector<2x8xf32>
    %704 = arith.mulf %700, %688 : vector<2x8xf32>
    %705 = arith.mulf %699, %703 : vector<2x8xf32>
    %706 = arith.addf %704, %705 : vector<2x8xf32>
    %707 = math.tanh %706 : vector<2x8xf32>
    %708 = arith.mulf %701, %707 : vector<2x8xf32>
    %cst_184 = arith.constant dense<0.000000e+00> : vector<2x32xf32>
    %709 = tpu.matmul %708, %570, %cst_184 {dimension_numbers = #tpu.dot_dimension_numbers<[1], [0], [0], [1], [0, 0, 1, 1], [], []>} : vector<2x8xf32>, vector<8x32xf32>, vector<2x32xf32> -> vector<2x32xf32>
    %710 = arith.addf %593, %709 : vector<2x32xf32>
    %711 = vector.extract_strided_slice %710 {offsets = [0, 0], sizes = [2, 24], strides = [1, 1]} : vector<2x32xf32> to vector<2x24xf32>
    %712 = arith.negf %711 : vector<2x24xf32>
    %713 = math.exp %712 : vector<2x24xf32>
    %cst_185 = arith.constant 1.000000e+00 : f32
    %714 = vector.broadcast %cst_185 : f32 to vector<2x24xf32>
    %715 = arith.addf %714, %713 : vector<2x24xf32>
    %716 = arith.divf %714, %715 : vector<2x24xf32>
    %717 = vector.extract_strided_slice %716 {offsets = [0, 0], sizes = [2, 8], strides = [1, 1]} : vector<2x24xf32> to vector<2x8xf32>
    %718 = vector.extract_strided_slice %716 {offsets = [0, 8], sizes = [2, 8], strides = [1, 1]} : vector<2x24xf32> to vector<2x8xf32>
    %719 = vector.extract_strided_slice %716 {offsets = [0, 16], sizes = [2, 8], strides = [1, 1]} : vector<2x24xf32> to vector<2x8xf32>
    %720 = vector.extract_strided_slice %710 {offsets = [0, 24], sizes = [2, 8], strides = [1, 1]} : vector<2x32xf32> to vector<2x8xf32>
    %721 = math.tanh %720 : vector<2x8xf32>
    %722 = arith.mulf %718, %706 : vector<2x8xf32>
    %723 = arith.mulf %717, %721 : vector<2x8xf32>
    %724 = arith.addf %722, %723 : vector<2x8xf32>
    %725 = math.tanh %724 : vector<2x8xf32>
    %726 = arith.mulf %719, %725 : vector<2x8xf32>
    %cst_186 = arith.constant dense<0.000000e+00> : vector<2x32xf32>
    %727 = tpu.matmul %726, %570, %cst_186 {dimension_numbers = #tpu.dot_dimension_numbers<[1], [0], [0], [1], [0, 0, 1, 1], [], []>} : vector<2x8xf32>, vector<8x32xf32>, vector<2x32xf32> -> vector<2x32xf32>
    %728 = arith.addf %596, %727 : vector<2x32xf32>
    %729 = vector.extract_strided_slice %728 {offsets = [0, 0], sizes = [2, 24], strides = [1, 1]} : vector<2x32xf32> to vector<2x24xf32>
    %730 = arith.negf %729 : vector<2x24xf32>
    %731 = math.exp %730 : vector<2x24xf32>
    %cst_187 = arith.constant 1.000000e+00 : f32
    %732 = vector.broadcast %cst_187 : f32 to vector<2x24xf32>
    %733 = arith.addf %732, %731 : vector<2x24xf32>
    %734 = arith.divf %732, %733 : vector<2x24xf32>
    %735 = vector.extract_strided_slice %734 {offsets = [0, 0], sizes = [2, 8], strides = [1, 1]} : vector<2x24xf32> to vector<2x8xf32>
    %736 = vector.extract_strided_slice %734 {offsets = [0, 8], sizes = [2, 8], strides = [1, 1]} : vector<2x24xf32> to vector<2x8xf32>
    %737 = vector.extract_strided_slice %734 {offsets = [0, 16], sizes = [2, 8], strides = [1, 1]} : vector<2x24xf32> to vector<2x8xf32>
    %738 = vector.extract_strided_slice %728 {offsets = [0, 24], sizes = [2, 8], strides = [1, 1]} : vector<2x32xf32> to vector<2x8xf32>
    %739 = math.tanh %738 : vector<2x8xf32>
    %740 = arith.mulf %736, %724 : vector<2x8xf32>
    %741 = arith.mulf %735, %739 : vector<2x8xf32>
    %742 = arith.addf %740, %741 : vector<2x8xf32>
    %743 = math.tanh %742 : vector<2x8xf32>
    %744 = arith.mulf %737, %743 : vector<2x8xf32>
    %c3_188 = arith.constant 3 : index
    %c0_189 = arith.constant 0 : index
    %c0_190 = arith.constant 0 : index
    %745 = vector.load %arg10[%c3_188, %c0_189, %c0_190] : memref<5x2x8xf32, #tpu.memory_space<vmem>>, vector<1x2x8xf32>
    %746 = vector.shape_cast %745 : vector<1x2x8xf32> to vector<2x8xf32>
    %747 = vector.shape_cast %744 : vector<2x8xf32> to vector<1x2x8xf32>
    tpu.vector_store %arg10[%c3_188, %c0_189, %c0_190], %747 {strides = array<i32>} : memref<5x2x8xf32, #tpu.memory_space<vmem>>, vector<1x2x8xf32>,
    %c3_191 = arith.constant 3 : index
    %c0_192 = arith.constant 0 : index
    %c0_193 = arith.constant 0 : index
    %748 = vector.load %arg11[%c3_191, %c0_192, %c0_193] : memref<5x2x8xf32, #tpu.memory_space<vmem>>, vector<1x2x8xf32>
    %749 = vector.shape_cast %748 : vector<1x2x8xf32> to vector<2x8xf32>
    %750 = vector.shape_cast %742 : vector<2x8xf32> to vector<1x2x8xf32>
    tpu.vector_store %arg11[%c3_191, %c0_192, %c0_193], %750 {strides = array<i32>} : memref<5x2x8xf32, #tpu.memory_space<vmem>>, vector<1x2x8xf32>,
    %c3_194 = arith.constant 3 : index
    %c0_195 = arith.constant 0 : index
    %c0_196 = arith.constant 0 : index
    %751 = vector.load %arg2[%c3_194, %c0_195, %c0_196] : memref<4x8x32xf32, #tpu.memory_space<vmem>>, vector<1x8x32xf32>
    %752 = vector.shape_cast %751 : vector<1x8x32xf32> to vector<8x32xf32>
    %c4_197 = arith.constant 4 : index
    %c0_198 = arith.constant 0 : index
    %c0_199 = arith.constant 0 : index
    %753 = vector.load %arg3[%c4_197, %c0_198, %c0_199] : memref<5x8x32xf32, #tpu.memory_space<vmem>>, vector<1x8x32xf32>
    %754 = vector.shape_cast %753 : vector<1x8x32xf32> to vector<8x32xf32>
    %c4_200 = arith.constant 4 : index
    %c0_201 = arith.constant 0 : index
    %c0_202 = arith.constant 0 : index
    %755 = vector.load %arg4[%c4_200, %c0_201, %c0_202] : memref<5x1x32xf32, #tpu.memory_space<vmem>>, vector<1x1x32xf32>
    %756 = vector.shape_cast %755 : vector<1x1x32xf32> to vector<1x32xf32>
    %cst_203 = arith.constant dense<0.000000e+00> : vector<2x32xf32>
    %757 = tpu.matmul %618, %752, %cst_203 {dimension_numbers = #tpu.dot_dimension_numbers<[1], [0], [0], [1], [0, 0, 1, 1], [], []>} : vector<2x8xf32>, vector<8x32xf32>, vector<2x32xf32> -> vector<2x32xf32>
    %758 = vector.broadcast %756 : vector<1x32xf32> to vector<2x32xf32>
    %759 = arith.addf %757, %758 : vector<2x32xf32>
    %cst_204 = arith.constant dense<0.000000e+00> : vector<2x32xf32>
    %760 = tpu.matmul %636, %752, %cst_204 {dimension_numbers = #tpu.dot_dimension_numbers<[1], [0], [0], [1], [0, 0, 1, 1], [], []>} : vector<2x8xf32>, vector<8x32xf32>, vector<2x32xf32> -> vector<2x32xf32>
    %761 = vector.broadcast %756 : vector<1x32xf32> to vector<2x32xf32>
    %762 = arith.addf %760, %761 : vector<2x32xf32>
    %cst_205 = arith.constant dense<0.000000e+00> : vector<2x32xf32>
    %763 = tpu.matmul %654, %752, %cst_205 {dimension_numbers = #tpu.dot_dimension_numbers<[1], [0], [0], [1], [0, 0, 1, 1], [], []>} : vector<2x8xf32>, vector<8x32xf32>, vector<2x32xf32> -> vector<2x32xf32>
    %764 = vector.broadcast %756 : vector<1x32xf32> to vector<2x32xf32>
    %765 = arith.addf %763, %764 : vector<2x32xf32>
    %cst_206 = arith.constant dense<0.000000e+00> : vector<2x32xf32>
    %766 = tpu.matmul %672, %752, %cst_206 {dimension_numbers = #tpu.dot_dimension_numbers<[1], [0], [0], [1], [0, 0, 1, 1], [], []>} : vector<2x8xf32>, vector<8x32xf32>, vector<2x32xf32> -> vector<2x32xf32>
    %767 = vector.broadcast %756 : vector<1x32xf32> to vector<2x32xf32>
    %768 = arith.addf %766, %767 : vector<2x32xf32>
    %cst_207 = arith.constant dense<0.000000e+00> : vector<2x32xf32>
    %769 = tpu.matmul %690, %752, %cst_207 {dimension_numbers = #tpu.dot_dimension_numbers<[1], [0], [0], [1], [0, 0, 1, 1], [], []>} : vector<2x8xf32>, vector<8x32xf32>, vector<2x32xf32> -> vector<2x32xf32>
    %770 = vector.broadcast %756 : vector<1x32xf32> to vector<2x32xf32>
    %771 = arith.addf %769, %770 : vector<2x32xf32>
    %cst_208 = arith.constant dense<0.000000e+00> : vector<2x32xf32>
    %772 = tpu.matmul %708, %752, %cst_208 {dimension_numbers = #tpu.dot_dimension_numbers<[1], [0], [0], [1], [0, 0, 1, 1], [], []>} : vector<2x8xf32>, vector<8x32xf32>, vector<2x32xf32> -> vector<2x32xf32>
    %773 = vector.broadcast %756 : vector<1x32xf32> to vector<2x32xf32>
    %774 = arith.addf %772, %773 : vector<2x32xf32>
    %cst_209 = arith.constant dense<0.000000e+00> : vector<2x32xf32>
    %775 = tpu.matmul %726, %752, %cst_209 {dimension_numbers = #tpu.dot_dimension_numbers<[1], [0], [0], [1], [0, 0, 1, 1], [], []>} : vector<2x8xf32>, vector<8x32xf32>, vector<2x32xf32> -> vector<2x32xf32>
    %776 = vector.broadcast %756 : vector<1x32xf32> to vector<2x32xf32>
    %777 = arith.addf %775, %776 : vector<2x32xf32>
    %cst_210 = arith.constant dense<0.000000e+00> : vector<2x32xf32>
    %778 = tpu.matmul %744, %752, %cst_210 {dimension_numbers = #tpu.dot_dimension_numbers<[1], [0], [0], [1], [0, 0, 1, 1], [], []>} : vector<2x8xf32>, vector<8x32xf32>, vector<2x32xf32> -> vector<2x32xf32>
    %779 = vector.broadcast %756 : vector<1x32xf32> to vector<2x32xf32>
    %780 = arith.addf %778, %779 : vector<2x32xf32>
    %c4_211 = arith.constant 4 : index
    %c0_212 = arith.constant 0 : index
    %c0_213 = arith.constant 0 : index
    %781 = vector.load %arg5[%c4_211, %c0_212, %c0_213] : memref<5x2x8xf32, #tpu.memory_space<vmem>>, vector<1x2x8xf32>
    %782 = vector.shape_cast %781 : vector<1x2x8xf32> to vector<2x8xf32>
    %c4_214 = arith.constant 4 : index
    %c0_215 = arith.constant 0 : index
    %c0_216 = arith.constant 0 : index
    %783 = vector.load %arg6[%c4_214, %c0_215, %c0_216] : memref<5x2x8xf32, #tpu.memory_space<vmem>>, vector<1x2x8xf32>
    %784 = vector.shape_cast %783 : vector<1x2x8xf32> to vector<2x8xf32>
    %cst_217 = arith.constant dense<0.000000e+00> : vector<2x32xf32>
    %785 = tpu.matmul %782, %754, %cst_217 {dimension_numbers = #tpu.dot_dimension_numbers<[1], [0], [0], [1], [0, 0, 1, 1], [], []>} : vector<2x8xf32>, vector<8x32xf32>, vector<2x32xf32> -> vector<2x32xf32>
    %786 = arith.addf %759, %785 : vector<2x32xf32>
    %787 = vector.extract_strided_slice %786 {offsets = [0, 0], sizes = [2, 24], strides = [1, 1]} : vector<2x32xf32> to vector<2x24xf32>
    %788 = arith.negf %787 : vector<2x24xf32>
    %789 = math.exp %788 : vector<2x24xf32>
    %cst_218 = arith.constant 1.000000e+00 : f32
    %790 = vector.broadcast %cst_218 : f32 to vector<2x24xf32>
    %791 = arith.addf %790, %789 : vector<2x24xf32>
    %792 = arith.divf %790, %791 : vector<2x24xf32>
    %793 = vector.extract_strided_slice %792 {offsets = [0, 0], sizes = [2, 8], strides = [1, 1]} : vector<2x24xf32> to vector<2x8xf32>
    %794 = vector.extract_strided_slice %792 {offsets = [0, 8], sizes = [2, 8], strides = [1, 1]} : vector<2x24xf32> to vector<2x8xf32>
    %795 = vector.extract_strided_slice %792 {offsets = [0, 16], sizes = [2, 8], strides = [1, 1]} : vector<2x24xf32> to vector<2x8xf32>
    %796 = vector.extract_strided_slice %786 {offsets = [0, 24], sizes = [2, 8], strides = [1, 1]} : vector<2x32xf32> to vector<2x8xf32>
    %797 = math.tanh %796 : vector<2x8xf32>
    %798 = arith.mulf %794, %784 : vector<2x8xf32>
    %799 = arith.mulf %793, %797 : vector<2x8xf32>
    %800 = arith.addf %798, %799 : vector<2x8xf32>
    %801 = math.tanh %800 : vector<2x8xf32>
    %802 = arith.mulf %795, %801 : vector<2x8xf32>
    %cst_219 = arith.constant dense<0.000000e+00> : vector<2x32xf32>
    %803 = tpu.matmul %802, %754, %cst_219 {dimension_numbers = #tpu.dot_dimension_numbers<[1], [0], [0], [1], [0, 0, 1, 1], [], []>} : vector<2x8xf32>, vector<8x32xf32>, vector<2x32xf32> -> vector<2x32xf32>
    %804 = arith.addf %762, %803 : vector<2x32xf32>
    %805 = vector.extract_strided_slice %804 {offsets = [0, 0], sizes = [2, 24], strides = [1, 1]} : vector<2x32xf32> to vector<2x24xf32>
    %806 = arith.negf %805 : vector<2x24xf32>
    %807 = math.exp %806 : vector<2x24xf32>
    %cst_220 = arith.constant 1.000000e+00 : f32
    %808 = vector.broadcast %cst_220 : f32 to vector<2x24xf32>
    %809 = arith.addf %808, %807 : vector<2x24xf32>
    %810 = arith.divf %808, %809 : vector<2x24xf32>
    %811 = vector.extract_strided_slice %810 {offsets = [0, 0], sizes = [2, 8], strides = [1, 1]} : vector<2x24xf32> to vector<2x8xf32>
    %812 = vector.extract_strided_slice %810 {offsets = [0, 8], sizes = [2, 8], strides = [1, 1]} : vector<2x24xf32> to vector<2x8xf32>
    %813 = vector.extract_strided_slice %810 {offsets = [0, 16], sizes = [2, 8], strides = [1, 1]} : vector<2x24xf32> to vector<2x8xf32>
    %814 = vector.extract_strided_slice %804 {offsets = [0, 24], sizes = [2, 8], strides = [1, 1]} : vector<2x32xf32> to vector<2x8xf32>
    %815 = math.tanh %814 : vector<2x8xf32>
    %816 = arith.mulf %812, %800 : vector<2x8xf32>
    %817 = arith.mulf %811, %815 : vector<2x8xf32>
    %818 = arith.addf %816, %817 : vector<2x8xf32>
    %819 = math.tanh %818 : vector<2x8xf32>
    %820 = arith.mulf %813, %819 : vector<2x8xf32>
    %cst_221 = arith.constant dense<0.000000e+00> : vector<2x32xf32>
    %821 = tpu.matmul %820, %754, %cst_221 {dimension_numbers = #tpu.dot_dimension_numbers<[1], [0], [0], [1], [0, 0, 1, 1], [], []>} : vector<2x8xf32>, vector<8x32xf32>, vector<2x32xf32> -> vector<2x32xf32>
    %822 = arith.addf %765, %821 : vector<2x32xf32>
    %823 = vector.extract_strided_slice %822 {offsets = [0, 0], sizes = [2, 24], strides = [1, 1]} : vector<2x32xf32> to vector<2x24xf32>
    %824 = arith.negf %823 : vector<2x24xf32>
    %825 = math.exp %824 : vector<2x24xf32>
    %cst_222 = arith.constant 1.000000e+00 : f32
    %826 = vector.broadcast %cst_222 : f32 to vector<2x24xf32>
    %827 = arith.addf %826, %825 : vector<2x24xf32>
    %828 = arith.divf %826, %827 : vector<2x24xf32>
    %829 = vector.extract_strided_slice %828 {offsets = [0, 0], sizes = [2, 8], strides = [1, 1]} : vector<2x24xf32> to vector<2x8xf32>
    %830 = vector.extract_strided_slice %828 {offsets = [0, 8], sizes = [2, 8], strides = [1, 1]} : vector<2x24xf32> to vector<2x8xf32>
    %831 = vector.extract_strided_slice %828 {offsets = [0, 16], sizes = [2, 8], strides = [1, 1]} : vector<2x24xf32> to vector<2x8xf32>
    %832 = vector.extract_strided_slice %822 {offsets = [0, 24], sizes = [2, 8], strides = [1, 1]} : vector<2x32xf32> to vector<2x8xf32>
    %833 = math.tanh %832 : vector<2x8xf32>
    %834 = arith.mulf %830, %818 : vector<2x8xf32>
    %835 = arith.mulf %829, %833 : vector<2x8xf32>
    %836 = arith.addf %834, %835 : vector<2x8xf32>
    %837 = math.tanh %836 : vector<2x8xf32>
    %838 = arith.mulf %831, %837 : vector<2x8xf32>
    %cst_223 = arith.constant dense<0.000000e+00> : vector<2x32xf32>
    %839 = tpu.matmul %838, %754, %cst_223 {dimension_numbers = #tpu.dot_dimension_numbers<[1], [0], [0], [1], [0, 0, 1, 1], [], []>} : vector<2x8xf32>, vector<8x32xf32>, vector<2x32xf32> -> vector<2x32xf32>
    %840 = arith.addf %768, %839 : vector<2x32xf32>
    %841 = vector.extract_strided_slice %840 {offsets = [0, 0], sizes = [2, 24], strides = [1, 1]} : vector<2x32xf32> to vector<2x24xf32>
    %842 = arith.negf %841 : vector<2x24xf32>
    %843 = math.exp %842 : vector<2x24xf32>
    %cst_224 = arith.constant 1.000000e+00 : f32
    %844 = vector.broadcast %cst_224 : f32 to vector<2x24xf32>
    %845 = arith.addf %844, %843 : vector<2x24xf32>
    %846 = arith.divf %844, %845 : vector<2x24xf32>
    %847 = vector.extract_strided_slice %846 {offsets = [0, 0], sizes = [2, 8], strides = [1, 1]} : vector<2x24xf32> to vector<2x8xf32>
    %848 = vector.extract_strided_slice %846 {offsets = [0, 8], sizes = [2, 8], strides = [1, 1]} : vector<2x24xf32> to vector<2x8xf32>
    %849 = vector.extract_strided_slice %846 {offsets = [0, 16], sizes = [2, 8], strides = [1, 1]} : vector<2x24xf32> to vector<2x8xf32>
    %850 = vector.extract_strided_slice %840 {offsets = [0, 24], sizes = [2, 8], strides = [1, 1]} : vector<2x32xf32> to vector<2x8xf32>
    %851 = math.tanh %850 : vector<2x8xf32>
    %852 = arith.mulf %848, %836 : vector<2x8xf32>
    %853 = arith.mulf %847, %851 : vector<2x8xf32>
    %854 = arith.addf %852, %853 : vector<2x8xf32>
    %855 = math.tanh %854 : vector<2x8xf32>
    %856 = arith.mulf %849, %855 : vector<2x8xf32>
    %cst_225 = arith.constant dense<0.000000e+00> : vector<2x32xf32>
    %857 = tpu.matmul %856, %754, %cst_225 {dimension_numbers = #tpu.dot_dimension_numbers<[1], [0], [0], [1], [0, 0, 1, 1], [], []>} : vector<2x8xf32>, vector<8x32xf32>, vector<2x32xf32> -> vector<2x32xf32>
    %858 = arith.addf %771, %857 : vector<2x32xf32>
    %859 = vector.extract_strided_slice %858 {offsets = [0, 0], sizes = [2, 24], strides = [1, 1]} : vector<2x32xf32> to vector<2x24xf32>
    %860 = arith.negf %859 : vector<2x24xf32>
    %861 = math.exp %860 : vector<2x24xf32>
    %cst_226 = arith.constant 1.000000e+00 : f32
    %862 = vector.broadcast %cst_226 : f32 to vector<2x24xf32>
    %863 = arith.addf %862, %861 : vector<2x24xf32>
    %864 = arith.divf %862, %863 : vector<2x24xf32>
    %865 = vector.extract_strided_slice %864 {offsets = [0, 0], sizes = [2, 8], strides = [1, 1]} : vector<2x24xf32> to vector<2x8xf32>
    %866 = vector.extract_strided_slice %864 {offsets = [0, 8], sizes = [2, 8], strides = [1, 1]} : vector<2x24xf32> to vector<2x8xf32>
    %867 = vector.extract_strided_slice %864 {offsets = [0, 16], sizes = [2, 8], strides = [1, 1]} : vector<2x24xf32> to vector<2x8xf32>
    %868 = vector.extract_strided_slice %858 {offsets = [0, 24], sizes = [2, 8], strides = [1, 1]} : vector<2x32xf32> to vector<2x8xf32>
    %869 = math.tanh %868 : vector<2x8xf32>
    %870 = arith.mulf %866, %854 : vector<2x8xf32>
    %871 = arith.mulf %865, %869 : vector<2x8xf32>
    %872 = arith.addf %870, %871 : vector<2x8xf32>
    %873 = math.tanh %872 : vector<2x8xf32>
    %874 = arith.mulf %867, %873 : vector<2x8xf32>
    %cst_227 = arith.constant dense<0.000000e+00> : vector<2x32xf32>
    %875 = tpu.matmul %874, %754, %cst_227 {dimension_numbers = #tpu.dot_dimension_numbers<[1], [0], [0], [1], [0, 0, 1, 1], [], []>} : vector<2x8xf32>, vector<8x32xf32>, vector<2x32xf32> -> vector<2x32xf32>
    %876 = arith.addf %774, %875 : vector<2x32xf32>
    %877 = vector.extract_strided_slice %876 {offsets = [0, 0], sizes = [2, 24], strides = [1, 1]} : vector<2x32xf32> to vector<2x24xf32>
    %878 = arith.negf %877 : vector<2x24xf32>
    %879 = math.exp %878 : vector<2x24xf32>
    %cst_228 = arith.constant 1.000000e+00 : f32
    %880 = vector.broadcast %cst_228 : f32 to vector<2x24xf32>
    %881 = arith.addf %880, %879 : vector<2x24xf32>
    %882 = arith.divf %880, %881 : vector<2x24xf32>
    %883 = vector.extract_strided_slice %882 {offsets = [0, 0], sizes = [2, 8], strides = [1, 1]} : vector<2x24xf32> to vector<2x8xf32>
    %884 = vector.extract_strided_slice %882 {offsets = [0, 8], sizes = [2, 8], strides = [1, 1]} : vector<2x24xf32> to vector<2x8xf32>
    %885 = vector.extract_strided_slice %882 {offsets = [0, 16], sizes = [2, 8], strides = [1, 1]} : vector<2x24xf32> to vector<2x8xf32>
    %886 = vector.extract_strided_slice %876 {offsets = [0, 24], sizes = [2, 8], strides = [1, 1]} : vector<2x32xf32> to vector<2x8xf32>
    %887 = math.tanh %886 : vector<2x8xf32>
    %888 = arith.mulf %884, %872 : vector<2x8xf32>
    %889 = arith.mulf %883, %887 : vector<2x8xf32>
    %890 = arith.addf %888, %889 : vector<2x8xf32>
    %891 = math.tanh %890 : vector<2x8xf32>
    %892 = arith.mulf %885, %891 : vector<2x8xf32>
    %cst_229 = arith.constant dense<0.000000e+00> : vector<2x32xf32>
    %893 = tpu.matmul %892, %754, %cst_229 {dimension_numbers = #tpu.dot_dimension_numbers<[1], [0], [0], [1], [0, 0, 1, 1], [], []>} : vector<2x8xf32>, vector<8x32xf32>, vector<2x32xf32> -> vector<2x32xf32>
    %894 = arith.addf %777, %893 : vector<2x32xf32>
    %895 = vector.extract_strided_slice %894 {offsets = [0, 0], sizes = [2, 24], strides = [1, 1]} : vector<2x32xf32> to vector<2x24xf32>
    %896 = arith.negf %895 : vector<2x24xf32>
    %897 = math.exp %896 : vector<2x24xf32>
    %cst_230 = arith.constant 1.000000e+00 : f32
    %898 = vector.broadcast %cst_230 : f32 to vector<2x24xf32>
    %899 = arith.addf %898, %897 : vector<2x24xf32>
    %900 = arith.divf %898, %899 : vector<2x24xf32>
    %901 = vector.extract_strided_slice %900 {offsets = [0, 0], sizes = [2, 8], strides = [1, 1]} : vector<2x24xf32> to vector<2x8xf32>
    %902 = vector.extract_strided_slice %900 {offsets = [0, 8], sizes = [2, 8], strides = [1, 1]} : vector<2x24xf32> to vector<2x8xf32>
    %903 = vector.extract_strided_slice %900 {offsets = [0, 16], sizes = [2, 8], strides = [1, 1]} : vector<2x24xf32> to vector<2x8xf32>
    %904 = vector.extract_strided_slice %894 {offsets = [0, 24], sizes = [2, 8], strides = [1, 1]} : vector<2x32xf32> to vector<2x8xf32>
    %905 = math.tanh %904 : vector<2x8xf32>
    %906 = arith.mulf %902, %890 : vector<2x8xf32>
    %907 = arith.mulf %901, %905 : vector<2x8xf32>
    %908 = arith.addf %906, %907 : vector<2x8xf32>
    %909 = math.tanh %908 : vector<2x8xf32>
    %910 = arith.mulf %903, %909 : vector<2x8xf32>
    %cst_231 = arith.constant dense<0.000000e+00> : vector<2x32xf32>
    %911 = tpu.matmul %910, %754, %cst_231 {dimension_numbers = #tpu.dot_dimension_numbers<[1], [0], [0], [1], [0, 0, 1, 1], [], []>} : vector<2x8xf32>, vector<8x32xf32>, vector<2x32xf32> -> vector<2x32xf32>
    %912 = arith.addf %780, %911 : vector<2x32xf32>
    %913 = vector.extract_strided_slice %912 {offsets = [0, 0], sizes = [2, 24], strides = [1, 1]} : vector<2x32xf32> to vector<2x24xf32>
    %914 = arith.negf %913 : vector<2x24xf32>
    %915 = math.exp %914 : vector<2x24xf32>
    %cst_232 = arith.constant 1.000000e+00 : f32
    %916 = vector.broadcast %cst_232 : f32 to vector<2x24xf32>
    %917 = arith.addf %916, %915 : vector<2x24xf32>
    %918 = arith.divf %916, %917 : vector<2x24xf32>
    %919 = vector.extract_strided_slice %918 {offsets = [0, 0], sizes = [2, 8], strides = [1, 1]} : vector<2x24xf32> to vector<2x8xf32>
    %920 = vector.extract_strided_slice %918 {offsets = [0, 8], sizes = [2, 8], strides = [1, 1]} : vector<2x24xf32> to vector<2x8xf32>
    %921 = vector.extract_strided_slice %918 {offsets = [0, 16], sizes = [2, 8], strides = [1, 1]} : vector<2x24xf32> to vector<2x8xf32>
    %922 = vector.extract_strided_slice %912 {offsets = [0, 24], sizes = [2, 8], strides = [1, 1]} : vector<2x32xf32> to vector<2x8xf32>
    %923 = math.tanh %922 : vector<2x8xf32>
    %924 = arith.mulf %920, %908 : vector<2x8xf32>
    %925 = arith.mulf %919, %923 : vector<2x8xf32>
    %926 = arith.addf %924, %925 : vector<2x8xf32>
    %927 = math.tanh %926 : vector<2x8xf32>
    %928 = arith.mulf %921, %927 : vector<2x8xf32>
    %c4_233 = arith.constant 4 : index
    %c0_234 = arith.constant 0 : index
    %c0_235 = arith.constant 0 : index
    %929 = vector.load %arg10[%c4_233, %c0_234, %c0_235] : memref<5x2x8xf32, #tpu.memory_space<vmem>>, vector<1x2x8xf32>
    %930 = vector.shape_cast %929 : vector<1x2x8xf32> to vector<2x8xf32>
    %931 = vector.shape_cast %928 : vector<2x8xf32> to vector<1x2x8xf32>
    tpu.vector_store %arg10[%c4_233, %c0_234, %c0_235], %931 {strides = array<i32>} : memref<5x2x8xf32, #tpu.memory_space<vmem>>, vector<1x2x8xf32>,
    %c4_236 = arith.constant 4 : index
    %c0_237 = arith.constant 0 : index
    %c0_238 = arith.constant 0 : index
    %932 = vector.load %arg11[%c4_236, %c0_237, %c0_238] : memref<5x2x8xf32, #tpu.memory_space<vmem>>, vector<1x2x8xf32>
    %933 = vector.shape_cast %932 : vector<1x2x8xf32> to vector<2x8xf32>
    %934 = vector.shape_cast %926 : vector<2x8xf32> to vector<1x2x8xf32>
    tpu.vector_store %arg11[%c4_236, %c0_237, %c0_238], %934 {strides = array<i32>} : memref<5x2x8xf32, #tpu.memory_space<vmem>>, vector<1x2x8xf32>,
    %c0_239 = arith.constant 0 : index
    %c0_240 = arith.constant 0 : index
    %935 = vector.load %arg7[%c0_239, %c0_240] : memref<8x1xf32, #tpu.memory_space<vmem>>, vector<8x1xf32>
    %cst_241 = arith.constant dense<0.000000e+00> : vector<2x1xf32>
    %936 = tpu.matmul %928, %935, %cst_241 {dimension_numbers = #tpu.dot_dimension_numbers<[1], [0], [0], [1], [0, 0, 1, 1], [], []>} : vector<2x8xf32>, vector<8x1xf32>, vector<2x1xf32> -> vector<2x1xf32>
    %c0_242 = arith.constant 0 : index
    %c0_243 = arith.constant 0 : index
    %937 = vector.load %arg8[%c0_242, %c0_243] : memref<1x1xf32, #tpu.memory_space<vmem>>, vector<1x1xf32>
    %938 = vector.broadcast %937 : vector<1x1xf32> to vector<2x1xf32>
    %939 = arith.addf %936, %938 : vector<2x1xf32>
    %c0_244 = arith.constant 0 : index
    %c0_245 = arith.constant 0 : index
    %940 = vector.load %arg9[%c0_244, %c0_245] : memref<2x1xf32, #tpu.memory_space<vmem>>, vector<2x1xf32>
    tpu.vector_store %arg9[%c0_244, %c0_245], %939 {strides = array<i32>} : memref<2x1xf32, #tpu.memory_space<vmem>>, vector<2x1xf32>,
    return
  }
}

</mosaic_0001>

<bundles_post_ra>
// kernel: tpu_custom_call.1
= control target key start
LH: loop header
LB: loop body
LE: loop exit
PB: predicated region body
PF: predicated region fallthrough
CT: control target
= control target key end

     0   :  { %s9509_s0 = inlined_call_operand.vmem [shape: f32[2,8,4], index: 0, kind: input, shape index: {}]   ;;  %s9510_s1 = inlined_call_operand.hbm [shape: f32[4,32], index: 1, kind: input, shape index: {}]   ;;  %s9511_s2 = inlined_call_operand.hbm [shape: f32[4,8,32], index: 2, kind: input, shape index: {}]   ;;  %s9512_s3 = inlined_call_operand.vmem [shape: f32[5,8,32], index: 3, kind: input, shape index: {}]   ;;  %s9513_s4 = inlined_call_operand.hbm [shape: f32[5,1,32], index: 4, kind: input, shape index: {}]   ;;  %s9514_s5 = inlined_call_operand.hbm [shape: f32[5,2,8], index: 5, kind: input, shape index: {}]   ;;  %s9515_s6 = inlined_call_operand.hbm [shape: f32[5,2,8], index: 6, kind: input, shape index: {}]   ;;  %s9516_s7 = inlined_call_operand.vmem [shape: f32[8,1], index: 7, kind: input, shape index: {}]   ;;  %s9517_s8 = inlined_call_operand.<no memory space> [shape: f32[1,1], index: 8, kind: input, shape index: {}]   ;;  %s9518_s9 = inlined_call_operand.vmem [shape: f32[2,1], index: 9, kind: output, shape index: {0}]   ;;  %s9519_s10 = inlined_call_operand.hbm [shape: f32[5,2,8], index: 10, kind: output, shape index: {1}]   ;;  %s9520_s11 = inlined_call_operand.hbm [shape: f32[5,2,8], index: 11, kind: output, shape index: {2}]  }
   0x1   :  { %v17_v0 = vstv %s9517_s8 }
   0x2   :  { %18 = vst [vmem:[#allocation2] sm:$0x1] %v17_v0 }
   0x3   :  { %19 = vsyncpa [#allocation4], 0 }
   0x4   :  { %20 = vsyncpa [#allocation7], 0 }
   0x5   :  { %21 = vsyncpa [#allocation10], 0 }
   0x6   :  { %22 = vsyncpa [#allocation5], 0 }
   0x7   :  { %23 = vsyncpa [#allocation14], 0  ;;  %s8442_s19 = smov [#allocation6]  }
   0x8   :  { %s41_s20 = sshll.u32 %s8442_s19, 4  ;;  %s42_s20 = int_to_ptr.vmem [resolvable:$true] %s41_s20 }
   0x9   :  { %s8300_s21 = scalar_lea.vmem %s42_s20, 512  ;;  %p8305_p1 = scmp.lt.s32.totalorder %s42_s20, %s42_s20 }
   0xa   :  { %p8301_p0 = scmp.ne.s32.totalorder %s42_s20, %s8300_s21  ;;  %p8306_p2 = scmp.lt.s32.totalorder %s8300_s21, %s8300_s21 }
   0xc   :  { %p8307_p3 = por %p8306_p2, %p8305_p1 }
   0xe   :  { %p8308_p4 = pnand %p8307_p3, %p8301_p0 }
  0x10   :  { %8311 = shalt.err (!%p8308_p4)
}
  0x11   :  { %s8443_s22 = smov 128   ;;  %s8444_s23 = smov 8  }
  0x12   :  { %47 = dma.hbm_to_vmem [thread:$0]  %s9511_s2, 512, %s42_s20, [#allocation7], %s8443_s22, %s8443_s22, %s8444_s23  }
  0x13   :  { %s8445_s25 = smov [#allocation9]  }
  0x14   :  { %s67_s26 = sshll.u32 %s8445_s25, 4  ;;  %s68_s26 = int_to_ptr.vmem [resolvable:$true] %s67_s26 }
  0x15   :  { %s8320_s27 = scalar_lea.vmem %s68_s26, 160  ;;  %p8325_p6 = scmp.lt.s32.totalorder %s68_s26, %s68_s26 }
  0x16   :  { %p8321_p5 = scmp.ne.s32.totalorder %s68_s26, %s8320_s27  ;;  %p8326_p7 = scmp.lt.s32.totalorder %s8320_s27, %s8320_s27 }
  0x18   :  { %p8327_p8 = por %p8326_p7, %p8325_p6 }
  0x1a   :  { %p8328_p9 = pnand %p8327_p8, %p8321_p5 }
  0x1c   :  { %8331 = shalt.err (!%p8328_p9)
}
  0x1d   :  { %s8446_s28 = smov 32   ;;  %s8447_s29 = smov 2  }
  0x1e   :  { %73 = dma.hbm_to_vmem [thread:$0]  %s9514_s5, 160, %s68_s26, [#allocation10], %s8446_s28, %s8446_s28, %s8447_s29  }
  0x1f   :  { %s8448_s2 = smov [#allocation3]   ;;  %s8449_s14 = smov [#allocation8]  }
  0x20   :  { %s32_s13 = sshll.u32 %s8448_s2, 4  ;;  %s55_s15 = sshll.u32 %s8449_s14, 4  ;;  %s33_s13 = int_to_ptr.vmem [resolvable:$true] %s32_s13  ;;  %s56_s15 = int_to_ptr.vmem [resolvable:$true] %s55_s15 }
  0x21   :  { %s8340_s16 = scalar_lea.vmem %s33_s13, 64  ;;  %p8345_p11 = scmp.lt.s32.totalorder %s33_s13, %s33_s13 }
  0x22   :  { %p8341_p10 = scmp.ne.s32.totalorder %s33_s13, %s8340_s16  ;;  %p8346_p12 = scmp.lt.s32.totalorder %s8340_s16, %s8340_s16 }
  0x24   :  { %p8347_p13 = por %p8346_p12, %p8345_p11 }
  0x26   :  { %p8348_p0 = pnand %p8347_p13, %p8341_p10 }
  0x28   :  { %8351 = shalt.err (!%p8348_p0)
}
  0x29   :  { %35 = dma.hbm_to_vmem [thread:$0]  %s9510_s1, 64, %s33_s13, [#allocation4]  }
  0x2a   :  { %s8360_s19 = scalar_lea.vmem %s56_s15, 80  ;;  %s8364_s5 = scalar_lea.vmem %s56_s15, 96 }
  0x2b   :  { %p8361_p1 = scmp.ne.s32.totalorder %s56_s15, %s8360_s19  ;;  %p8365_p2 = scmp.lt.s32.totalorder %s56_s15, %s56_s15 }
  0x2c   :  { %p8366_p3 = scmp.lt.s32.totalorder %s8364_s5, %s8360_s19 }
  0x2e   :  { %p8367_p4 = por %p8366_p3, %p8365_p2 }
  0x30   :  { %p8368_p5 = pnand %p8367_p4, %p8361_p1 }
  0x32   :  { %8371 = shalt.err (!%p8368_p5)
}
  0x33   :  { %s8450_s20 = smov 16   ;;  %s8451_s21 = smov 1  }
  0x34   :  { %61 = dma.hbm_to_vmem [thread:$0]  %s9513_s4, 80, %s56_s15, [#allocation7], %s8450_s20, %s8450_s20, %s8451_s21  }
  0x35   :  { %s8452_s24 = smov [#allocation11]  }
  0x36   :  { %s79_s25 = sshll.u32 %s8452_s24, 4  ;;  %s80_s25 = int_to_ptr.vmem [resolvable:$true] %s79_s25 }
  0x37   :  { %s8380_s26 = scalar_lea.vmem %s80_s25, 160  ;;  %p8385_p7 = scmp.lt.s32.totalorder %s80_s25, %s80_s25 }
  0x38   :  { %p8381_p6 = scmp.ne.s32.totalorder %s80_s25, %s8380_s26  ;;  %p8386_p8 = scmp.lt.s32.totalorder %s8380_s26, %s8380_s26 }
  0x3a   :  { %p8387_p9 = por %p8386_p8, %p8385_p7 }
  0x3c   :  { %p8388_p10 = pnand %p8387_p9, %p8381_p6 }
  0x3e   :  { %8391 = shalt.err (!%p8388_p10)
}
  0x3f   :  { %85 = dma.hbm_to_vmem [thread:$0]  %s9515_s6, 160, %s80_s25, [#allocation10], %s8446_s28, %s8446_s28, %s8447_s29  }
  0x40   :  { %8432 = dma.done.wait [#allocation4], 64  }
  0x41   :  { %8433 = vsyncadd [#allocation4], 4294967232 }
  0x42   :  { %8434 = dma.done.wait [#allocation7], 592  }
  0x43   :  { %8435 = vsyncadd [#allocation7], 4294966704 }
  0x44   :  { %8436 = dma.done.wait [#allocation10], 320  }
  0x45   :  { %8437 = vsyncadd [#allocation10], 4294966976  ;;  %v8453_v1 = vmov 0.0   ;;  %vm8454_vm0 = vmmov 0   ;;  %vm138_vm1 = vcmask 1043456   ;;  %vm133_vm2 = vcmask 1041409  }
  0x46   :  { %7549 = vmatprep.subr.mxu0 %v8453_v1  ;;  %7551 = vmatprep.mubr.msk.f32.mxu0 %vm8454_vm0, %v8453_v1  ;;  %v8551_v2 = vld [vmem:[#allocation3] sm:$0xf]  ;;  %v105_v3 = vld [vmem:[%s9509_s0] sm:$0x1]  ;;  %v106_v4 = vld [vmem:[%s9509_s0 + $0x8] sm:$0x1] }
  0x47   :  { %7554 = vmatprep.subr.mxu1 %v8453_v1  ;;  %7556 = vmatprep.mubr.msk.f32.mxu1 %vm8454_vm0, %v8453_v1  ;;  %v132_v5 = vrot.slane %v106_v4, 7  ;;  %vm135_vm3 = vcmask 31744   ;;  %v110_v6 = vld [vmem:[%s9509_s0 + $0xa] sm:$0x1]  ;;  %v109_v7 = vld [vmem:[%s9509_s0 + $0x2] sm:$0x1] }
  0x48   :  { %7550 = vmatpush3.msk.msra.mxu0 %vm138_vm1, %v8551_v2  ;;  %7555 = vmatpush3.msk.msra.mxu1 %vm138_vm1, %v8551_v2  ;;  %v290_v8 = vrot.slane %v110_v6, 7  ;;  %v114_v9 = vld [vmem:[%s9509_s0 + $0xc] sm:$0x1]  ;;  %v113_v13 = vld [vmem:[%s9509_s0 + $0x4] sm:$0x1]  ;;  %vm746_vm4 = vcmask 64512  }
  0x49   :  { %7559 = vmatprep.subr.mxu0 %v8453_v1  ;;  %7564 = vmatprep.subr.mxu1 %v8453_v1  ;;  %v134_v10 = vsel %vm133_vm2, %v132_v5, %v105_v3  ;;  %v442_v12 = vrot.slane %v114_v9, 7  ;;  %v118_v14 = vld [vmem:[%s9509_s0 + $0xe] sm:$0x1]  ;;  %v117_v17 = vld [vmem:[%s9509_s0 + $0x6] sm:$0x1]  ;;  %s8455_s25 = smov 104  }
  0x4a   :  { %7552 = vmatmul.mubr.msk.f32.vlgmr.msra.gmra.mxu0 %vm135_vm3, %v134_v10  ;;  %v291_v11 = vsel %vm133_vm2, %v290_v8, %v109_v7  ;;  %v594_v16 = vrot.slane %v118_v14, 7  ;;  %v8608_v19 = vld [vmem:[%s9512_s3] sm:$0xff]  ;;  %v744_v20 = vld [vmem:[#allocation9] sm:$0x3]  ;;  %v745_v35 = vld [vmem:[#allocation11] sm:$0x3] }
  0x4b   :  { %7560 = vmatpush3.msk.msra.mxu0 %vm138_vm1, %v8551_v2  ;;  %7561 = vmatprep.mubr.msk.f32.mxu0 %vm8454_vm0, %v8453_v1  ;;  %v443_v15 = vsel %vm133_vm2, %v442_v12, %v113_v13  ;;  %v8624_v27 = vld [vmem:[#allocation8] ss:$0 sm:$0xff]  ;;  %v107_v46 = vld [vmem:[%s9509_s0 + $0x1] sm:$0x1]  ;;  %v108_v47 = vld [vmem:[%s9509_s0 + $0x9] sm:$0x1] }
  0x4c   :  { %7569 = vmatprep.subr.mxu0 %v8453_v1  ;;  %v595_v18 = vsel %vm133_vm2, %v594_v16, %v117_v17  ;;  %v214_v48 = vrot.slane %v108_v47, 7  ;;  %v112_v49 = vld [vmem:[%s9509_s0 + $0xb] sm:$0x1]  ;;  %v111_v50 = vld [vmem:[%s9509_s0 + $0x3] sm:$0x1]  ;;  %vm1553_vm5 = vcmask 58368  }
  0x4d   :  { %v366_v51 = vrot.slane %v112_v49, 7  ;;  %v116_v52 = vld [vmem:[%s9509_s0 + $0xd] sm:$0x1]  ;;  %v115_v56 = vld [vmem:[%s9509_s0 + $0x5] sm:$0x1]  ;;  %s8459_s6 = smov [#allocation13]  }
  0x4e   :  { %7562 = vmatmul.mubr.msk.f32.vlgmr.msra.gmra.mxu0 %vm135_vm3, %v291_v11  ;;  %v215_v53 = vsel %vm133_vm2, %v214_v48, %v107_v46  ;;  %v518_v55 = vrot.slane %v116_v52, 7  ;;  %v120_v57 = vld [vmem:[%s9509_s0 + $0xf] sm:$0x1]  ;;  %v119_v61 = vld [vmem:[%s9509_s0 + $0x7] sm:$0x1]  ;;  %s8456_s0 = smov 112  }
  0x4f   :  { %7570 = vmatpush3.msk.msra.mxu0 %vm138_vm1, %v8551_v2  ;;  %7571 = vmatprep.mubr.msk.f32.mxu0 %vm8454_vm0, %v8453_v1  ;;  %v367_v54 = vsel %vm133_vm2, %v366_v51, %v111_v50  ;;  %v670_v59 = vrot.slane %v120_v57, 7  ;;  %s7228_s30 = sshll.u32 %s8459_s6, 4  ;;  %s7229_s30 = int_to_ptr.vmem [resolvable:$true] %s7228_s30 }
  0x50   :  { %7579 = vmatprep.subr.mxu0 %v8453_v1  ;;  %7557 = vmatmul.mubr.msk.f32.vlgmr.msra.gmra.mxu1 %vm135_vm3, %v215_v53  ;;  %v519_v58 = vsel %vm133_vm2, %v518_v55, %v115_v56 }
  0x51   :  { %7565 = vmatpush3.msk.msra.mxu1 %vm138_vm1, %v8551_v2  ;;  %7566 = vmatprep.mubr.msk.f32.mxu1 %vm8454_vm0, %v8453_v1  ;;  %v671_v62 = vsel %vm133_vm2, %v670_v59, %v119_v61 }
  0x52   :  { %7572 = vmatmul.mubr.msk.f32.vlgmr.msra.gmra.mxu0 %vm135_vm3, %v443_v15  ;;  %7574 = vmatprep.subr.mxu1 %v8453_v1 }
  0x53   :  { %7580 = vmatpush3.msk.msra.mxu0 %vm138_vm1, %v8551_v2  ;;  %7581 = vmatprep.mubr.msk.f32.mxu0 %vm8454_vm0, %v8453_v1 }
  0x54   :  { %7589 = vmatprep.subr.mxu0 %v8453_v1  ;;  %7567 = vmatmul.mubr.msk.f32.vlgmr.msra.gmra.mxu1 %vm135_vm3, %v367_v54 }
  0x55   :  { %7575 = vmatpush3.msk.msra.mxu1 %vm138_vm1, %v8551_v2  ;;  %7576 = vmatprep.mubr.msk.f32.mxu1 %vm8454_vm0, %v8453_v1 }
  0x56   :  { %7582 = vmatmul.mubr.msk.f32.vlgmr.msra.gmra.mxu0 %vm135_vm3, %v595_v18  ;;  %7584 = vmatprep.subr.mxu1 %v8453_v1 }
  0x57   :  { %7590 = vmatpush3.msra.mxu0 %v8608_v19  ;;  %7591 = vmatprep.mubr.msk.f32.mxu0 %vm8454_vm0, %v8453_v1 }
  0x58   :  { %7599 = vmatprep.subr.mxu0 %v8453_v1  ;;  %7577 = vmatmul.mubr.msk.f32.vlgmr.msra.gmra.mxu1 %vm135_vm3, %v519_v58 }
  0x59   :  { %7585 = vmatpush3.msk.msra.mxu1 %vm138_vm1, %v8551_v2  ;;  %7586 = vmatprep.mubr.msk.f32.mxu1 %vm8454_vm0, %v8453_v1 }
  0x5a   :  { %7592 = vmatmul.mubr.msk.f32.vlgmr.msra.gmra.mxu0 %vm746_vm4, %v744_v20  ;;  %7594 = vmatprep.subr.mxu1 %v8453_v1 }
  0x5b   :  { %7600 = vmatpush3.msra.mxu0 %v8608_v19  ;;  %7601 = vmatprep.mubr.msk.f32.mxu0 %vm8454_vm0, %v8453_v1 }
  0x5c   :  { %7609 = vmatprep.subr.mxu0 %v8453_v1  ;;  %7587 = vmatmul.mubr.msk.f32.vlgmr.msra.gmra.mxu1 %vm135_vm3, %v671_v62 }
  0x5d   :  { %7595 = vmatpush3.msra.mxu1 %v8608_v19  ;;  %7596 = vmatprep.mubr.msk.f32.mxu1 %vm8454_vm0, %v8453_v1 }
  0x5e   :  { %7604 = vmatprep.subr.mxu1 %v8453_v1 }
 0x10a   :  { %v208_v21 = vpop.f32.mrf.mxu0 }
 0x10b   :  { %v209_v30 = vadd.f32 %v8624_v27, %v208_v21 }
 0x10c   :  { %v7553_v22 = vpop.f32.mrf.mxu0 }
 0x10e   :  { %v8620_v23 = vpop.f32.mrf.mxu0 }
 0x110   :  { %v7563_v24 = vpop.f32.mrf.mxu0  ;;  %v284_v2 = vpop.f32.mrf.mxu1 }
 0x111   :  { %v285_v11 = vadd.f32 %v8624_v27, %v284_v2 }
 0x112   :  { %v8622_v25 = vpop.f32.mrf.mxu0  ;;  %v7558_v3 = vpop.f32.mrf.mxu1 }
 0x114   :  { %v7573_v26 = vpop.f32.mrf.mxu0  ;;  %v8688_v4 = vpop.f32.mrf.mxu1 }
 0x115   :  { %v437_v51 = vadd.f32 %v8624_v27, %v8688_v4 }
 0x116   :  { %v8626_v28 = vpop.f32.mrf.mxu0  ;;  %v7568_v5 = vpop.f32.mrf.mxu1 }
 0x118   :  { %v7583_v29 = vpop.f32.mrf.mxu0  ;;  %v8690_v6 = vpop.f32.mrf.mxu1 }
 0x11a   :  { %v816_v31 = vpop.f32.mrf.mxu0  ;;  %v7578_v7 = vpop.f32.mrf.mxu1 }
 0x11b   :  { %v820_v32 = vadd.f32 %v816_v31, %v209_v30  ;;  %v513_v7 = vadd.f32 %v8624_v27, %v8622_v25 }
 0x11c   :  { %v7593_v33 = vpop.f32.mrf.mxu0  ;;  %v8692_v8 = vpop.f32.mrf.mxu1 }
 0x11d   :  { %7972 = vtanh.f32 %v820_v32  ;;  %v7266_v36 = vmul.f32 -1.442695, %v820_v32 }
 0x11e   :  { %v7588_v9 = vpop.f32.mrf.mxu1 }
 0x11f   :  { %7974 = vpow2.f32 %v7266_v36 }
 0x12a   :  { %v7973_v34 = vpop.eup %7972 }
 0x12b   :  { %834 = vrot.lane.b32.xlu0 %v7973_v34, %s8455_s25  ;;  %v361_v34 = vadd.f32 %v8624_v27, %v8620_v23 }
 0x12c   :  { %v7975_v37 = vpop.eup %7974 }
 0x12d   :  { %v824_v38 = vadd.f32 1.0, %v7975_v37 }
 0x12f   :  { %829 = vrot.lane.b32.xlu0 %v745_v35, %s8444_s23  ;;  %7976 = vrcp.f32 %v824_v38 }
 0x13c   :  { %v7977_v39 = vpop.eup %7976 }
 0x19d   :  { %v835_v40 = vpop.permute.xlu0 %834 }
 0x19e   :  { %v837_v41 = vmul.f32 %v7977_v39, %v835_v40 }
 0x1a0   :  { %839 = vrot.lane.b32.xlu1 %v837_v41, %s8444_s23 }
 0x1a1   :  { %v830_v42 = vpop.permute.xlu0 %829 }
 0x1a2   :  { %v832_v43 = vmul.f32 %v7977_v39, %v830_v42 }
 0x212   :  { %v840_v44 = vpop.permute.xlu1 %839 }
 0x213   :  { %v8632_v45 = vadd.f32 %v840_v44, %v832_v43 }
 0x215   :  { %7978 = vtanh.f32 %v8632_v45 }
 0x222   :  { %v7979_v60 = vpop.eup %7978 }
 0x223   :  { %845 = vrot.lane.b32.xlu1 %v7979_v60, %s8444_s23 }
 0x295   :  { %v846_v63 = vpop.permute.xlu1 %845 }
 0x296   :  { %v848_v0 = vmul.f32 %v7977_v39, %v846_v63 }
 0x298   :  { %850 = vrot.lane.b32.xlu0 %v848_v0, %s8456_s0 }
 0x30a   :  { %v8694_v10 = vpop.permute.xlu0 %850 }
 0x30b   :  { %7597 = vmatmul.mubr.msk.f32.vlgmr.msra.gmra.mxu1 %vm746_vm4, %v8694_v10 }
 0x30c   :  { %7605 = vmatpush3.msra.mxu1 %v8608_v19  ;;  %7606 = vmatprep.mubr.msk.f32.mxu1 %vm8454_vm0, %v8453_v1 }
 0x30d   :  { %7614 = vmatprep.subr.mxu1 %v8453_v1 }
 0x3cb   :  { %v920_v12 = vpop.f32.mrf.mxu1 }
 0x3cc   :  { %v924_v13 = vadd.f32 %v920_v12, %v285_v11 }
 0x3cd   :  { %v7598_v14 = vpop.f32.mrf.mxu1 }
 0x3ce   :  { %7980 = vtanh.f32 %v924_v13  ;;  %v7268_v16 = vmul.f32 -1.442695, %v924_v13 }
 0x3d0   :  { %7982 = vpow2.f32 %v7268_v16 }
 0x3db   :  { %v7981_v15 = vpop.eup %7980 }
 0x3dc   :  { %934 = vrot.lane.b32.xlu1 %v7981_v15, %s8455_s25 }
 0x3dd   :  { %v7983_v17 = vpop.eup %7982 }
 0x3de   :  { %v928_v18 = vadd.f32 1.0, %v7983_v17 }
 0x3e0   :  { %7984 = vrcp.f32 %v928_v18 }
 0x3ed   :  { %v7985_v20 = vpop.eup %7984 }
 0x3ee   :  { %v932_v24 = vmul.f32 %v7985_v20, %v8632_v45 }
 0x44e   :  { %v935_v21 = vpop.permute.xlu1 %934 }
 0x44f   :  { %v937_v22 = vmul.f32 %v7985_v20, %v935_v21 }
 0x451   :  { %939 = vrot.lane.b32.xlu0 %v937_v22, %s8444_s23 }
 0x4c3   :  { %v940_v26 = vpop.permute.xlu0 %939 }
 0x4c4   :  { %v942_v29 = vadd.f32 %v940_v26, %v932_v24 }
 0x4c6   :  { %7986 = vtanh.f32 %v942_v29 }
 0x4d3   :  { %v7987_v30 = vpop.eup %7986 }
 0x4d4   :  { %945 = vrot.lane.b32.xlu1 %v7987_v30, %s8444_s23 }
 0x546   :  { %v946_v31 = vpop.permute.xlu1 %945 }
 0x547   :  { %v948_v32 = vmul.f32 %v7985_v20, %v946_v31  ;;  %v589_v31 = vadd.f32 %v8624_v27, %v8690_v6 }
 0x549   :  { %950 = vrot.lane.b32.xlu0 %v948_v32, %s8456_s0 }
 0x5bb   :  { %v8708_v33 = vpop.permute.xlu0 %950 }
 0x5bc   :  { %7602 = vmatmul.mubr.msk.f32.vlgmr.msra.gmra.mxu0 %vm746_vm4, %v8708_v33 }
 0x5bd   :  { %7610 = vmatpush3.msra.mxu0 %v8608_v19  ;;  %7611 = vmatprep.mubr.msk.f32.mxu0 %vm8454_vm0, %v8453_v1 }
 0x5be   :  { %7619 = vmatprep.subr.mxu0 %v8453_v1 }
 0x67c   :  { %v1020_v35 = vpop.f32.mrf.mxu0 }
 0x67d   :  { %v1024_v36 = vadd.f32 %v1020_v35, %v361_v34 }
 0x67e   :  { %v7603_v37 = vpop.f32.mrf.mxu0 }
 0x67f   :  { %7988 = vtanh.f32 %v1024_v36  ;;  %v7270_v39 = vmul.f32 -1.442695, %v1024_v36 }
 0x681   :  { %7990 = vpow2.f32 %v7270_v39 }
 0x68c   :  { %v7989_v38 = vpop.eup %7988 }
 0x68d   :  { %1034 = vrot.lane.b32.xlu1 %v7989_v38, %s8455_s25 }
 0x68e   :  { %v7991_v40 = vpop.eup %7990 }
 0x68f   :  { %v1028_v41 = vadd.f32 1.0, %v7991_v40 }
 0x691   :  { %7992 = vrcp.f32 %v1028_v41 }
 0x69e   :  { %v7993_v42 = vpop.eup %7992 }
 0x69f   :  { %v1032_v45 = vmul.f32 %v7993_v42, %v942_v29 }
 0x6ff   :  { %v1035_v43 = vpop.permute.xlu1 %1034 }
 0x700   :  { %v1037_v44 = vmul.f32 %v7993_v42, %v1035_v43 }
 0x702   :  { %1039 = vrot.lane.b32.xlu0 %v1037_v44, %s8444_s23 }
 0x774   :  { %v1040_v46 = vpop.permute.xlu0 %1039 }
 0x775   :  { %v1042_v23 = vadd.f32 %v1040_v46, %v1032_v45 }
 0x777   :  { %7994 = vtanh.f32 %v1042_v23 }
 0x784   :  { %v7995_v47 = vpop.eup %7994 }
 0x785   :  { %1045 = vrot.lane.b32.xlu1 %v7995_v47, %s8444_s23 }
 0x7f7   :  { %v1046_v48 = vpop.permute.xlu1 %1045 }
 0x7f8   :  { %v1048_v49 = vmul.f32 %v7993_v42, %v1046_v48 }
 0x7fa   :  { %1050 = vrot.lane.b32.xlu0 %v1048_v49, %s8456_s0 }
 0x86c   :  { %v8722_v50 = vpop.permute.xlu0 %1050 }
 0x86d   :  { %7607 = vmatmul.mubr.msk.f32.vlgmr.msra.gmra.mxu1 %vm746_vm4, %v8722_v50 }
 0x86e   :  { %7615 = vmatpush3.msra.mxu1 %v8608_v19  ;;  %7616 = vmatprep.mubr.msk.f32.mxu1 %vm8454_vm0, %v8453_v1 }
 0x86f   :  { %7624 = vmatprep.subr.mxu1 %v8453_v1 }
 0x92d   :  { %v1120_v52 = vpop.f32.mrf.mxu1 }
 0x92e   :  { %v1124_v53 = vadd.f32 %v1120_v52, %v437_v51 }
 0x92f   :  { %v7608_v54 = vpop.f32.mrf.mxu1 }
 0x930   :  { %7996 = vtanh.f32 %v1124_v53  ;;  %v7272_v56 = vmul.f32 -1.442695, %v1124_v53 }
 0x932   :  { %7998 = vpow2.f32 %v7272_v56 }
 0x93d   :  { %v7997_v55 = vpop.eup %7996 }
 0x93e   :  { %1134 = vrot.lane.b32.xlu1 %v7997_v55, %s8455_s25 }
 0x93f   :  { %v7999_v57 = vpop.eup %7998 }
 0x940   :  { %v1128_v58 = vadd.f32 1.0, %v7999_v57 }
 0x942   :  { %8000 = vrcp.f32 %v1128_v58 }
 0x94f   :  { %v8001_v59 = vpop.eup %8000 }
 0x950   :  { %v1132_v62 = vmul.f32 %v8001_v59, %v1042_v23  ;;  %v8761_v23 = vld [vmem:[#allocation6] sm:$0xff] }
 0x9b0   :  { %v1135_v60 = vpop.permute.xlu1 %1134 }
 0x9b1   :  { %v1137_v61 = vmul.f32 %v8001_v59, %v1135_v60 }
 0x9b3   :  { %1139 = vrot.lane.b32.xlu0 %v1137_v61, %s8444_s23 }
 0xa25   :  { %v1140_v63 = vpop.permute.xlu0 %1139 }
 0xa26   :  { %v1142_v0 = vadd.f32 %v1140_v63, %v1132_v62 }
 0xa28   :  { %8002 = vtanh.f32 %v1142_v0 }
 0xa35   :  { %v8003_v2 = vpop.eup %8002 }
 0xa36   :  { %1145 = vrot.lane.b32.xlu1 %v8003_v2, %s8444_s23 }
 0xaa8   :  { %v1146_v3 = vpop.permute.xlu1 %1145 }
 0xaa9   :  { %v1148_v4 = vmul.f32 %v8001_v59, %v1146_v3 }
 0xaab   :  { %1150 = vrot.lane.b32.xlu0 %v1148_v4, %s8456_s0 }
 0xb1d   :  { %v8736_v5 = vpop.permute.xlu0 %1150 }
 0xb1e   :  { %7612 = vmatmul.mubr.msk.f32.vlgmr.msra.gmra.mxu0 %vm746_vm4, %v8736_v5 }
 0xb1f   :  { %7620 = vmatpush3.msra.mxu0 %v8608_v19  ;;  %7621 = vmatprep.mubr.msk.f32.mxu0 %vm8454_vm0, %v8453_v1 }
 0xb20   :  { %7629 = vmatprep.subr.mxu0 %v8453_v1 }
 0xbde   :  { %v1220_v9 = vpop.f32.mrf.mxu0 }
 0xbdf   :  { %v1224_v11 = vadd.f32 %v1220_v9, %v513_v7  ;;  %v8804_v9 = vld [vmem:[%s9512_s3 + $0x8] sm:$0xff] }
 0xbe0   :  { %v7613_v12 = vpop.f32.mrf.mxu0 }
 0xbe1   :  { %8004 = vtanh.f32 %v1224_v11  ;;  %v7274_v14 = vmul.f32 -1.442695, %v1224_v11  ;;  %v2134_v12 = vld [vmem:[#allocation9 + $0x2] sm:$0x3] }
 0xbe3   :  { %8006 = vpow2.f32 %v7274_v14 }
 0xbee   :  { %v8005_v13 = vpop.eup %8004 }
 0xbef   :  { %1234 = vrot.lane.b32.xlu1 %v8005_v13, %s8455_s25 }
 0xbf0   :  { %v8007_v15 = vpop.eup %8006 }
 0xbf1   :  { %v1228_v16 = vadd.f32 1.0, %v8007_v15 }
 0xbf3   :  { %8008 = vrcp.f32 %v1228_v16 }
 0xc00   :  { %v8009_v17 = vpop.eup %8008 }
 0xc01   :  { %v1232_v21 = vmul.f32 %v8009_v17, %v1142_v0 }
 0xc61   :  { %v1235_v18 = vpop.permute.xlu1 %1234 }
 0xc62   :  { %v1237_v20 = vmul.f32 %v8009_v17, %v1235_v18 }
 0xc64   :  { %1239 = vrot.lane.b32.xlu0 %v1237_v20, %s8444_s23 }
 0xcd6   :  { %v1240_v22 = vpop.permute.xlu0 %1239 }
 0xcd7   :  { %v1242_v25 = vadd.f32 %v1240_v22, %v1232_v21 }
 0xcd9   :  { %8010 = vtanh.f32 %v1242_v25 }
 0xce6   :  { %v8011_v24 = vpop.eup %8010 }
 0xce7   :  { %1245 = vrot.lane.b32.xlu1 %v8011_v24, %s8444_s23 }
 0xd59   :  { %v1246_v26 = vpop.permute.xlu1 %1245 }
 0xd5a   :  { %v1248_v29 = vmul.f32 %v8009_v17, %v1246_v26 }
 0xd5c   :  { %1250 = vrot.lane.b32.xlu0 %v1248_v29, %s8456_s0 }
 0xdce   :  { %v1251_v30 = vpop.permute.xlu0 %1250 }
 0xdcf   :  { %7617 = vmatmul.mubr.msk.f32.vlgmr.msra.gmra.mxu1 %vm746_vm4, %v1251_v30 }
 0xdd0   :  { %7625 = vmatpush3.msra.mxu1 %v8608_v19  ;;  %7626 = vmatprep.mubr.msk.f32.mxu1 %vm8454_vm0, %v8453_v1 }
 0xdd1   :  { %7634 = vmatprep.subr.mxu1 %v8453_v1 }
 0xe8f   :  { %v1320_v32 = vpop.f32.mrf.mxu1 }
 0xe90   :  { %v1324_v34 = vadd.f32 %v1320_v32, %v589_v31  ;;  %v2136_v32 = vld [vmem:[#allocation11 + $0x2] sm:$0x3] }
 0xe91   :  { %v7618_v35 = vpop.f32.mrf.mxu1 }
 0xe92   :  { %8012 = vtanh.f32 %v1324_v34  ;;  %v7276_v37 = vmul.f32 -1.442695, %v1324_v34 }
 0xe94   :  { %8014 = vpow2.f32 %v7276_v37 }
 0xe9f   :  { %v8013_v36 = vpop.eup %8012 }
 0xea0   :  { %1334 = vrot.lane.b32.xlu1 %v8013_v36, %s8455_s25 }
 0xea1   :  { %v8015_v38 = vpop.eup %8014 }
 0xea2   :  { %v1328_v39 = vadd.f32 1.0, %v8015_v38 }
 0xea4   :  { %8016 = vrcp.f32 %v1328_v39 }
 0xeb1   :  { %v8017_v19 = vpop.eup %8016 }
 0xeb2   :  { %v1332_v42 = vmul.f32 %v8017_v19, %v1242_v25 }
 0xf12   :  { %v1335_v40 = vpop.permute.xlu1 %1334 }
 0xf13   :  { %v1337_v41 = vmul.f32 %v8017_v19, %v1335_v40 }
 0xf15   :  { %1339 = vrot.lane.b32.xlu0 %v1337_v41, %s8444_s23 }
 0xf87   :  { %v1340_v43 = vpop.permute.xlu0 %1339 }
 0xf88   :  { %v1342_v6 = vadd.f32 %v1340_v43, %v1332_v42 }
 0xf8a   :  { %8018 = vtanh.f32 %v1342_v6 }
 0xf97   :  { %v8019_v44 = vpop.eup %8018 }
 0xf98   :  { %1345 = vrot.lane.b32.xlu1 %v8019_v44, %s8444_s23 }
0x100a   :  { %v1346_v45 = vpop.permute.xlu1 %1345 }
0x100b   :  { %v1348_v46 = vmul.f32 %v8017_v19, %v1346_v45 }
0x100d   :  { %1350 = vrot.lane.b32.xlu0 %v1348_v46, %s8456_s0 }
0x107f   :  { %v8763_v47 = vpop.permute.xlu0 %1350 }
0x1080   :  { %7622 = vmatmul.mubr.msk.f32.vlgmr.msra.gmra.mxu0 %vm746_vm4, %v8763_v47 }
0x1081   :  { %7630 = vmatpush3.msra.mxu0 %v8761_v23  ;;  %7631 = vmatprep.mubr.msk.f32.mxu0 %vm8454_vm0, %v8453_v1 }
0x1082   :  { %7639 = vmatprep.subr.mxu0 %v8453_v1 }
0x1084   :  { %7632 = vmatmul.mubr.msk.f32.vlgmr.msra.gmra.mxu0 %vm746_vm4, %v8694_v10  ;;  %v665_v10 = vadd.f32 %v8624_v27, %v8626_v28 }
0x1085   :  { %7640 = vmatpush3.msra.mxu0 %v8761_v23  ;;  %7641 = vmatprep.mubr.msk.f32.mxu0 %vm8454_vm0, %v8453_v1 }
0x1086   :  { %7649 = vmatprep.subr.mxu0 %v8453_v1 }
0x1088   :  { %7642 = vmatmul.mubr.msk.f32.vlgmr.msra.gmra.mxu0 %vm746_vm4, %v8722_v50 }
0x1089   :  { %7650 = vmatpush3.msra.mxu0 %v8761_v23  ;;  %7651 = vmatprep.mubr.msk.f32.mxu0 %vm8454_vm0, %v8453_v1 }
0x108a   :  { %7659 = vmatprep.subr.mxu0 %v8453_v1 }
0x108c   :  { %7652 = vmatmul.mubr.msk.f32.vlgmr.msra.gmra.mxu0 %vm746_vm4, %v1251_v30 }
0x108d   :  { %7660 = vmatpush3.msra.mxu0 %v8761_v23  ;;  %7661 = vmatprep.mubr.msk.f32.mxu0 %vm8454_vm0, %v8453_v1 }
0x108e   :  { %7669 = vmatprep.subr.mxu0 %v8453_v1 }
0x1140   :  { %v1420_v48 = vpop.f32.mrf.mxu0 }
0x1141   :  { %v1424_v49 = vadd.f32 %v1420_v48, %v665_v10 }
0x1142   :  { %v7623_v50 = vpop.f32.mrf.mxu0 }
0x1143   :  { %8020 = vtanh.f32 %v1424_v49  ;;  %v7278_v58 = vmul.f32 -1.442695, %v1424_v49 }
0x1144   :  { %v1637_v51 = vpop.f32.mrf.mxu0 }
0x1145   :  { %8022 = vpow2.f32 %v7278_v58 }
0x1146   :  { %v7633_v52 = vpop.f32.mrf.mxu0 }
0x1148   :  { %v8790_v53 = vpop.f32.mrf.mxu0 }
0x114a   :  { %v7643_v54 = vpop.f32.mrf.mxu0 }
0x114c   :  { %v8792_v55 = vpop.f32.mrf.mxu0 }
0x114e   :  { %v7653_v56 = vpop.f32.mrf.mxu0 }
0x1150   :  { %v8021_v57 = vpop.eup %8020 }
0x1151   :  { %1434 = vrot.lane.b32.xlu1 %v8021_v57, %s8455_s25 }
0x1152   :  { %v8023_v59 = vpop.eup %8022 }
0x1153   :  { %v1428_v60 = vadd.f32 1.0, %v8023_v59 }
0x1155   :  { %8024 = vrcp.f32 %v1428_v60 }
0x1162   :  { %v8025_v28 = vpop.eup %8024 }
0x1163   :  { %v1432_v63 = vmul.f32 %v8025_v28, %v1342_v6 }
0x11c3   :  { %v1435_v61 = vpop.permute.xlu1 %1434 }
0x11c4   :  { %v1437_v62 = vmul.f32 %v8025_v28, %v1435_v61 }
0x11c6   :  { %1439 = vrot.lane.b32.xlu0 %v1437_v62, %s8444_s23 }
0x1238   :  { %v1440_v0 = vpop.permute.xlu0 %1439 }
0x1239   :  { %v8796_v2 = vadd.f32 %v1440_v0, %v1432_v63 }
0x123b   :  { %8026 = vtanh.f32 %v8796_v2 }
0x1248   :  { %v8027_v3 = vpop.eup %8026 }
0x1249   :  { %1445 = vrot.lane.b32.xlu1 %v8027_v3, %s8444_s23 }
0x12bb   :  { %v1446_v4 = vpop.permute.xlu1 %1445 }
0x12bc   :  { %v1448_v7 = vmul.f32 %v8025_v28, %v1446_v4 }
0x12be   :  { %1450 = vrot.lane.b32.xlu0 %v1448_v7, %s8456_s0 }
0x1330   :  { %v1451_v11 = vpop.permute.xlu0 %1450 }
0x1331   :  { %7627 = vmatmul.mubr.msk.f32.vlgmr.msra.gmra.mxu1 %vm746_vm4, %v1451_v11  ;;  %7662 = vmatmul.mubr.msk.f32.vlgmr.msra.gmra.mxu0 %vm746_vm4, %v1451_v11 }
0x1332   :  { %7670 = vmatpush3.msra.mxu0 %v8804_v9  ;;  %7635 = vmatpush3.msra.mxu1 %v8761_v23 }
0x1333   :  { %7636 = vmatprep.mubr.msk.f32.mxu1 %vm8454_vm0, %v8453_v1  ;;  %7671 = vmatprep.mubr.msk.f32.mxu0 %vm8454_vm0, %v8453_v1 }
0x1334   :  { %7644 = vmatprep.subr.mxu1 %v8453_v1  ;;  %7679 = vmatprep.subr.mxu0 %v8453_v1 }
0x1335   :  { %7637 = vmatmul.mubr.msk.f32.vlgmr.msra.gmra.mxu1 %vm746_vm4, %v8708_v33  ;;  %7672 = vmatmul.mubr.msk.f32.vlgmr.msra.gmra.mxu0 %vm746_vm4, %v2134_v12  ;;  %v741_v33 = vadd.f32 %v8624_v27, %v8692_v8 }
0x1336   :  { %7645 = vmatpush3.msra.mxu1 %v8761_v23  ;;  %7646 = vmatprep.mubr.msk.f32.mxu1 %vm8454_vm0, %v8453_v1 }
0x1337   :  { %7654 = vmatprep.subr.mxu1 %v8453_v1  ;;  %7680 = vmatpush3.msra.mxu0 %v8804_v9 }
0x1338   :  { %7681 = vmatprep.mubr.msk.f32.mxu0 %vm8454_vm0, %v8453_v1  ;;  %7689 = vmatprep.subr.mxu0 %v8453_v1 }
0x1339   :  { %7647 = vmatmul.mubr.msk.f32.vlgmr.msra.gmra.mxu1 %vm746_vm4, %v8736_v5  ;;  %v8841_v5 = vld [vmem:[#allocation8 + $0x1] ss:$0 sm:$0xff] }
0x133a   :  { %7655 = vmatpush3.msra.mxu1 %v8761_v23  ;;  %7656 = vmatprep.mubr.msk.f32.mxu1 %vm8454_vm0, %v8453_v1  ;;  %v1638_v18 = vadd.f32 %v8841_v5, %v1637_v51 }
0x133b   :  { %7664 = vmatprep.subr.mxu1 %v8453_v1 }
0x133d   :  { %7657 = vmatmul.mubr.msk.f32.vlgmr.msra.gmra.mxu1 %vm746_vm4, %v8763_v47 }
0x133e   :  { %7665 = vmatpush3.msra.mxu1 %v8761_v23  ;;  %7666 = vmatprep.mubr.msk.f32.mxu1 %vm8454_vm0, %v8453_v1 }
0x133f   :  { %7674 = vmatprep.subr.mxu1 %v8453_v1 }
0x13f1   :  { %v1520_v13 = vpop.f32.mrf.mxu1  ;;  %v8843_v14 = vpop.f32.mrf.mxu0 }
0x13f2   :  { %v1524_v15 = vadd.f32 %v1520_v13, %v741_v33 }
0x13f3   :  { %v7628_v16 = vpop.f32.mrf.mxu1  ;;  %v7663_v17 = vpop.f32.mrf.mxu0 }
0x13f4   :  { %8028 = vtanh.f32 %v1524_v15  ;;  %v7280_v34 = vmul.f32 -1.442695, %v1524_v15 }
0x13f5   :  { %v8846_v20 = vpop.f32.mrf.mxu1  ;;  %v2206_v21 = vpop.f32.mrf.mxu0 }
0x13f6   :  { %v2210_v22 = vadd.f32 %v2206_v21, %v1638_v18  ;;  %v1708_v28 = vadd.f32 %v8841_v5, %v8846_v20  ;;  %v1778_v21 = vadd.f32 %v8841_v5, %v8790_v53 }
0x13f7   :  { %v7638_v25 = vpop.f32.mrf.mxu1  ;;  %v7673_v24 = vpop.f32.mrf.mxu0 }
0x13f8   :  { %8030 = vtanh.f32 %v2210_v22  ;;  %v7292_v35 = vmul.f32 -1.442695, %v2210_v22 }
0x13f9   :  { %v8848_v26 = vpop.f32.mrf.mxu1  ;;  %8032 = vpow2.f32 %v7280_v34 }
0x13fa   :  { %8034 = vpow2.f32 %v7292_v35 }
0x13fb   :  { %v7648_v27 = vpop.f32.mrf.mxu1 }
0x13fd   :  { %v8850_v8 = vpop.f32.mrf.mxu1 }
0x13ff   :  { %v7658_v29 = vpop.f32.mrf.mxu1 }
0x1401   :  { %v8029_v30 = vpop.eup %8028 }
0x1402   :  { %1534 = vrot.lane.b32.xlu1 %v8029_v30, %s8455_s25 }
0x1405   :  { %v8031_v31 = vpop.eup %8030 }
0x1406   :  { %2224 = vrot.lane.b32.xlu0 %v8031_v31, %s8455_s25  ;;  %v8033_v36 = vpop.eup %8032 }
0x1407   :  { %v1528_v37 = vadd.f32 1.0, %v8033_v36  ;;  %v8035_v38 = vpop.eup %8034 }
0x1408   :  { %v2214_v39 = vadd.f32 1.0, %v8035_v38 }
0x1409   :  { %8036 = vrcp.f32 %v1528_v37 }
0x140a   :  { %2219 = vrot.lane.b32.xlu0 %v2136_v32, %s8444_s23  ;;  %8038 = vrcp.f32 %v2214_v39 }
0x1416   :  { %v8037_v19 = vpop.eup %8036 }
0x1417   :  { %v8039_v42 = vpop.eup %8038  ;;  %v1532_v44 = vmul.f32 %v8037_v19, %v8796_v2 }
0x1474   :  { %v1535_v40 = vpop.permute.xlu1 %1534 }
0x1475   :  { %v1537_v41 = vmul.f32 %v8037_v19, %v1535_v40 }
0x1477   :  { %1539 = vrot.lane.b32.xlu1 %v1537_v41, %s8444_s23  ;;  %v1848_v41 = vadd.f32 %v8841_v5, %v8848_v26 }
0x1478   :  { %v2225_v43 = vpop.permute.xlu0 %2224 }
0x1479   :  { %v2227_v6 = vmul.f32 %v8039_v42, %v2225_v43 }
0x147b   :  { %2229 = vrot.lane.b32.xlu1 %v2227_v6, %s8444_s23 }
0x147c   :  { %v2220_v45 = vpop.permute.xlu0 %2219 }
0x147d   :  { %v2222_v47 = vmul.f32 %v8039_v42, %v2220_v45 }
0x14e9   :  { %v1540_v46 = vpop.permute.xlu1 %1539 }
0x14ea   :  { %v8858_v23 = vadd.f32 %v1540_v46, %v1532_v44 }
0x14ec   :  { %8040 = vtanh.f32 %v8858_v23 }
0x14ed   :  { %v2230_v10 = vpop.permute.xlu1 %2229 }
0x14ee   :  { %v2232_v48 = vadd.f32 %v2230_v10, %v2222_v47 }
0x14f0   :  { %8042 = vtanh.f32 %v2232_v48 }
0x14f9   :  { %v8041_v49 = vpop.eup %8040 }
0x14fa   :  { %1545 = vrot.lane.b32.xlu0 %v8041_v49, %s8444_s23 }
0x14fd   :  { %v8043_v50 = vpop.eup %8042 }
0x14fe   :  { %2235 = vrot.lane.b32.xlu1 %v8043_v50, %s8444_s23 }
0x156c   :  { %v1546_v51 = vpop.permute.xlu0 %1545 }
0x156d   :  { %v1548_v52 = vmul.f32 %v8037_v19, %v1546_v51 }
0x156f   :  { %1550 = vrot.lane.b32.xlu0 %v1548_v52, %s8456_s0 }
0x1570   :  { %v2236_v54 = vpop.permute.xlu1 %2235 }
0x1571   :  { %v2238_v56 = vmul.f32 %v8039_v42, %v2236_v54 }
0x1573   :  { %2240 = vrot.lane.b32.xlu1 %v2238_v56, %s8456_s0 }
0x15e1   :  { %v1551_v57 = vpop.permute.xlu0 %1550 }
0x15e2   :  { %1554 = vst.msk [vmem:[#allocation12] sm:$0x3] %vm1553_vm5, %v1551_v57  ;;  %7667 = vmatmul.mubr.msk.f32.vlgmr.msra.gmra.mxu1 %vm746_vm4, %v1551_v57 }
0x15e3   :  { %7675 = vmatpush3.msra.mxu1 %v8804_v9  ;;  %7676 = vmatprep.mubr.msk.f32.mxu1 %vm8454_vm0, %v8453_v1 }
0x15e4   :  { %7684 = vmatprep.subr.mxu1 %v8453_v1 }
0x15e5   :  { %v8871_v58 = vpop.permute.xlu1 %2240 }
0x15e6   :  { %7677 = vmatmul.mubr.msk.f32.vlgmr.msra.gmra.mxu1 %vm746_vm4, %v8871_v58 }
0x15e7   :  { %7685 = vmatpush3.msra.mxu1 %v8804_v9  ;;  %7686 = vmatprep.mubr.msk.f32.mxu1 %vm8454_vm0, %v8453_v1 }
0x15e8   :  { %7694 = vmatprep.subr.mxu1 %v8453_v1 }
0x16a2   :  { %v8879_v59 = vpop.f32.mrf.mxu1 }
0x16a4   :  { %v7668_v60 = vpop.f32.mrf.mxu1 }
0x16a5   :  { %v1918_v60 = vadd.f32 %v8841_v5, %v8792_v55 }
0x16a6   :  { %v2310_v61 = vpop.f32.mrf.mxu1 }
0x16a7   :  { %v2314_v62 = vadd.f32 %v2310_v61, %v1708_v28 }
0x16a8   :  { %v7678_v63 = vpop.f32.mrf.mxu1 }
0x16a9   :  { %8044 = vtanh.f32 %v2314_v62  ;;  %v7294_v2 = vmul.f32 -1.442695, %v2314_v62 }
0x16ab   :  { %8046 = vpow2.f32 %v7294_v2 }
0x16b6   :  { %v8045_v0 = vpop.eup %8044 }
0x16b7   :  { %2324 = vrot.lane.b32.xlu0 %v8045_v0, %s8455_s25 }
0x16b8   :  { %v8047_v3 = vpop.eup %8046 }
0x16b9   :  { %v2318_v4 = vadd.f32 1.0, %v8047_v3 }
0x16bb   :  { %8048 = vrcp.f32 %v2318_v4 }
0x16c8   :  { %v8049_v7 = vpop.eup %8048 }
0x16c9   :  { %v2322_v33 = vmul.f32 %v8049_v7, %v2232_v48 }
0x1729   :  { %v2325_v11 = vpop.permute.xlu0 %2324 }
0x172a   :  { %v2327_v12 = vmul.f32 %v8049_v7, %v2325_v11 }
0x172c   :  { %2329 = vrot.lane.b32.xlu1 %v2327_v12, %s8444_s23 }
0x179e   :  { %v2330_v13 = vpop.permute.xlu1 %2329 }
0x179f   :  { %v2332_v15 = vadd.f32 %v2330_v13, %v2322_v33 }
0x17a1   :  { %8050 = vtanh.f32 %v2332_v15 }
0x17ae   :  { %v8051_v16 = vpop.eup %8050 }
0x17af   :  { %2335 = vrot.lane.b32.xlu0 %v8051_v16, %s8444_s23 }
0x1821   :  { %v2336_v17 = vpop.permute.xlu0 %2335 }
0x1822   :  { %v2338_v18 = vmul.f32 %v8049_v7, %v2336_v17 }
0x1824   :  { %2340 = vrot.lane.b32.xlu1 %v2338_v18, %s8456_s0  ;;  %v1988_v18 = vadd.f32 %v8841_v5, %v8850_v8 }
0x1896   :  { %v8887_v20 = vpop.permute.xlu1 %2340 }
0x1897   :  { %7682 = vmatmul.mubr.msk.f32.vlgmr.msra.gmra.mxu0 %vm746_vm4, %v8887_v20 }
0x1898   :  { %7690 = vmatpush3.msra.mxu0 %v8804_v9  ;;  %7691 = vmatprep.mubr.msk.f32.mxu0 %vm8454_vm0, %v8453_v1 }
0x1899   :  { %7699 = vmatprep.subr.mxu0 %v8453_v1 }
0x1957   :  { %v2410_v22 = vpop.f32.mrf.mxu0 }
0x1958   :  { %v2414_v25 = vadd.f32 %v2410_v22, %v1778_v21 }
0x1959   :  { %v7683_v24 = vpop.f32.mrf.mxu0 }
0x195a   :  { %8052 = vtanh.f32 %v2414_v25  ;;  %v7296_v29 = vmul.f32 -1.442695, %v2414_v25 }
0x195c   :  { %8054 = vpow2.f32 %v7296_v29 }
0x1967   :  { %v8053_v27 = vpop.eup %8052 }
0x1968   :  { %2424 = vrot.lane.b32.xlu0 %v8053_v27, %s8455_s25 }
0x1969   :  { %v8055_v30 = vpop.eup %8054 }
0x196a   :  { %v2418_v31 = vadd.f32 1.0, %v8055_v30 }
0x196c   :  { %8056 = vrcp.f32 %v2418_v31 }
0x1979   :  { %v8057_v32 = vpop.eup %8056 }
0x197a   :  { %v2422_v36 = vmul.f32 %v8057_v32, %v2332_v15 }
0x19da   :  { %v2425_v34 = vpop.permute.xlu0 %2424 }
0x19db   :  { %v2427_v35 = vmul.f32 %v8057_v32, %v2425_v34 }
0x19dd   :  { %2429 = vrot.lane.b32.xlu1 %v2427_v35, %s8444_s23 }
0x1a4f   :  { %v2430_v37 = vpop.permute.xlu1 %2429 }
0x1a50   :  { %v2432_v53 = vadd.f32 %v2430_v37, %v2422_v36 }
0x1a52   :  { %8058 = vtanh.f32 %v2432_v53 }
0x1a5f   :  { %v8059_v38 = vpop.eup %8058 }
0x1a60   :  { %2435 = vrot.lane.b32.xlu0 %v8059_v38, %s8444_s23  ;;  %v8940_v38 = vld [vmem:[#allocation6 + $0x8] sm:$0xff] }
0x1ad2   :  { %v2436_v39 = vpop.permute.xlu0 %2435 }
0x1ad3   :  { %v2438_v19 = vmul.f32 %v8057_v32, %v2436_v39 }
0x1ad5   :  { %2440 = vrot.lane.b32.xlu1 %v2438_v19, %s8456_s0 }
0x1b47   :  { %v8901_v40 = vpop.permute.xlu1 %2440 }
0x1b48   :  { %7687 = vmatmul.mubr.msk.f32.vlgmr.msra.gmra.mxu1 %vm746_vm4, %v8901_v40 }
0x1b49   :  { %7695 = vmatpush3.msra.mxu1 %v8804_v9  ;;  %7696 = vmatprep.mubr.msk.f32.mxu1 %vm8454_vm0, %v8453_v1 }
0x1b4a   :  { %7704 = vmatprep.subr.mxu1 %v8453_v1 }
0x1c08   :  { %v2510_v42 = vpop.f32.mrf.mxu1 }
0x1c09   :  { %v2514_v43 = vadd.f32 %v2510_v42, %v1848_v41 }
0x1c0a   :  { %v7688_v6 = vpop.f32.mrf.mxu1 }
0x1c0b   :  { %8060 = vtanh.f32 %v2514_v43  ;;  %v7298_v45 = vmul.f32 -1.442695, %v2514_v43 }
0x1c0d   :  { %8062 = vpow2.f32 %v7298_v45 }
0x1c18   :  { %v8061_v44 = vpop.eup %8060 }
0x1c19   :  { %2524 = vrot.lane.b32.xlu0 %v8061_v44, %s8455_s25 }
0x1c1a   :  { %v8063_v46 = vpop.eup %8062 }
0x1c1b   :  { %v2518_v47 = vadd.f32 1.0, %v8063_v46 }
0x1c1d   :  { %8064 = vrcp.f32 %v2518_v47 }
0x1c2a   :  { %v8065_v10 = vpop.eup %8064 }
0x1c2b   :  { %v2522_v50 = vmul.f32 %v8065_v10, %v2432_v53 }
0x1c8b   :  { %v2525_v48 = vpop.permute.xlu0 %2524 }
0x1c8c   :  { %v2527_v49 = vmul.f32 %v8065_v10, %v2525_v48 }
0x1c8e   :  { %2529 = vrot.lane.b32.xlu1 %v2527_v49, %s8444_s23 }
0x1d00   :  { %v2530_v51 = vpop.permute.xlu1 %2529 }
0x1d01   :  { %v2532_v26 = vadd.f32 %v2530_v51, %v2522_v50 }
0x1d03   :  { %8066 = vtanh.f32 %v2532_v26 }
0x1d10   :  { %v8067_v52 = vpop.eup %8066 }
0x1d11   :  { %2535 = vrot.lane.b32.xlu0 %v8067_v52, %s8444_s23 }
0x1d83   :  { %v2536_v54 = vpop.permute.xlu0 %2535 }
0x1d84   :  { %v2538_v56 = vmul.f32 %v8065_v10, %v2536_v54 }
0x1d86   :  { %2540 = vrot.lane.b32.xlu1 %v2538_v56, %s8456_s0 }
0x1df8   :  { %v8915_v57 = vpop.permute.xlu1 %2540 }
0x1df9   :  { %7692 = vmatmul.mubr.msk.f32.vlgmr.msra.gmra.mxu0 %vm746_vm4, %v8915_v57 }
0x1dfa   :  { %7700 = vmatpush3.msra.mxu0 %v8804_v9  ;;  %7701 = vmatprep.mubr.msk.f32.mxu0 %vm8454_vm0, %v8453_v1 }
0x1dfb   :  { %7709 = vmatprep.subr.mxu0 %v8453_v1 }
0x1eb9   :  { %v2610_v28 = vpop.f32.mrf.mxu0 }
0x1eba   :  { %v2614_v61 = vadd.f32 %v2610_v28, %v1918_v60 }
0x1ebb   :  { %v7693_v62 = vpop.f32.mrf.mxu0 }
0x1ebc   :  { %8068 = vtanh.f32 %v2614_v61  ;;  %v7300_v0 = vmul.f32 -1.442695, %v2614_v61  ;;  %v8983_v61 = vld [vmem:[%s9512_s3 + $0x10] sm:$0xff] }
0x1ebe   :  { %8070 = vpow2.f32 %v7300_v0 }
0x1ec9   :  { %v8069_v63 = vpop.eup %8068 }
0x1eca   :  { %2624 = vrot.lane.b32.xlu0 %v8069_v63, %s8455_s25  ;;  %v3526_v63 = vld [vmem:[#allocation9 + $0x4] sm:$0x3] }
0x1ecb   :  { %v8071_v2 = vpop.eup %8070 }
0x1ecc   :  { %v2618_v3 = vadd.f32 1.0, %v8071_v2 }
0x1ece   :  { %8072 = vrcp.f32 %v2618_v3 }
0x1edb   :  { %v8073_v4 = vpop.eup %8072 }
0x1edc   :  { %v2622_v12 = vmul.f32 %v8073_v4, %v2532_v26 }
0x1f3c   :  { %v2625_v7 = vpop.permute.xlu0 %2624 }
0x1f3d   :  { %v2627_v11 = vmul.f32 %v8073_v4, %v2625_v7 }
0x1f3f   :  { %2629 = vrot.lane.b32.xlu1 %v2627_v11, %s8444_s23 }
0x1fb1   :  { %v2630_v33 = vpop.permute.xlu1 %2629 }
0x1fb2   :  { %v2632_v55 = vadd.f32 %v2630_v33, %v2622_v12 }
0x1fb4   :  { %8074 = vtanh.f32 %v2632_v55 }
0x1fc1   :  { %v8075_v13 = vpop.eup %8074 }
0x1fc2   :  { %2635 = vrot.lane.b32.xlu0 %v8075_v13, %s8444_s23 }
0x2034   :  { %v2636_v15 = vpop.permute.xlu0 %2635 }
0x2035   :  { %v2638_v16 = vmul.f32 %v8073_v4, %v2636_v15 }
0x2037   :  { %2640 = vrot.lane.b32.xlu1 %v2638_v16, %s8456_s0 }
0x20a9   :  { %v2641_v17 = vpop.permute.xlu1 %2640 }
0x20aa   :  { %7697 = vmatmul.mubr.msk.f32.vlgmr.msra.gmra.mxu1 %vm746_vm4, %v2641_v17 }
0x20ab   :  { %7705 = vmatpush3.msra.mxu1 %v8804_v9  ;;  %7706 = vmatprep.mubr.msk.f32.mxu1 %vm8454_vm0, %v8453_v1 }
0x20ac   :  { %7714 = vmatprep.subr.mxu1 %v8453_v1 }
0x216a   :  { %v2710_v21 = vpop.f32.mrf.mxu1 }
0x216b   :  { %v2714_v22 = vadd.f32 %v2710_v21, %v1988_v18 }
0x216c   :  { %v7698_v25 = vpop.f32.mrf.mxu1 }
0x216d   :  { %8076 = vtanh.f32 %v2714_v22  ;;  %v7302_v27 = vmul.f32 -1.442695, %v2714_v22  ;;  %v3528_v22 = vld [vmem:[#allocation11 + $0x4] sm:$0x3] }
0x216f   :  { %8078 = vpow2.f32 %v7302_v27 }
0x217a   :  { %v8077_v24 = vpop.eup %8076 }
0x217b   :  { %2724 = vrot.lane.b32.xlu0 %v8077_v24, %s8455_s25 }
0x217c   :  { %v8079_v29 = vpop.eup %8078 }
0x217d   :  { %v2718_v30 = vadd.f32 1.0, %v8079_v29 }
0x217f   :  { %8080 = vrcp.f32 %v2718_v30 }
0x218c   :  { %v8081_v9 = vpop.eup %8080 }
0x218d   :  { %v2722_v34 = vmul.f32 %v8081_v9, %v2632_v55 }
0x21ed   :  { %v2725_v31 = vpop.permute.xlu0 %2724 }
0x21ee   :  { %v2727_v32 = vmul.f32 %v8081_v9, %v2725_v31 }
0x21f0   :  { %2729 = vrot.lane.b32.xlu1 %v2727_v32, %s8444_s23 }
0x2262   :  { %v2730_v35 = vpop.permute.xlu1 %2729 }
0x2263   :  { %v2732_v8 = vadd.f32 %v2730_v35, %v2722_v34 }
0x2265   :  { %8082 = vtanh.f32 %v2732_v8 }
0x2272   :  { %v8083_v36 = vpop.eup %8082 }
0x2273   :  { %2735 = vrot.lane.b32.xlu0 %v8083_v36, %s8444_s23 }
0x22e5   :  { %v2736_v37 = vpop.permute.xlu0 %2735 }
0x22e6   :  { %v2738_v53 = vmul.f32 %v8081_v9, %v2736_v37 }
0x22e8   :  { %2740 = vrot.lane.b32.xlu1 %v2738_v53, %s8456_s0 }
0x235a   :  { %v8942_v39 = vpop.permute.xlu1 %2740 }
0x235b   :  { %7702 = vmatmul.mubr.msk.f32.vlgmr.msra.gmra.mxu0 %vm746_vm4, %v8942_v39 }
0x235c   :  { %7710 = vmatpush3.msra.mxu0 %v8940_v38  ;;  %7711 = vmatprep.mubr.msk.f32.mxu0 %vm8454_vm0, %v8453_v1 }
0x235d   :  { %7719 = vmatprep.subr.mxu0 %v8453_v1 }
0x235f   :  { %7712 = vmatmul.mubr.msk.f32.vlgmr.msra.gmra.mxu0 %vm746_vm4, %v8871_v58  ;;  %v2058_v58 = vadd.f32 %v8841_v5, %v8843_v14 }
0x2360   :  { %7720 = vmatpush3.msra.mxu0 %v8940_v38  ;;  %7721 = vmatprep.mubr.msk.f32.mxu0 %vm8454_vm0, %v8453_v1 }
0x2361   :  { %7729 = vmatprep.subr.mxu0 %v8453_v1 }
0x2363   :  { %7722 = vmatmul.mubr.msk.f32.vlgmr.msra.gmra.mxu0 %vm746_vm4, %v8901_v40 }
0x2364   :  { %7730 = vmatpush3.msra.mxu0 %v8940_v38  ;;  %7731 = vmatprep.mubr.msk.f32.mxu0 %vm8454_vm0, %v8453_v1 }
0x2365   :  { %7739 = vmatprep.subr.mxu0 %v8453_v1 }
0x2367   :  { %7732 = vmatmul.mubr.msk.f32.vlgmr.msra.gmra.mxu0 %vm746_vm4, %v2641_v17 }
0x2368   :  { %7740 = vmatpush3.msra.mxu0 %v8940_v38  ;;  %7741 = vmatprep.mubr.msk.f32.mxu0 %vm8454_vm0, %v8453_v1 }
0x2369   :  { %7749 = vmatprep.subr.mxu0 %v8453_v1 }
0x241b   :  { %v2810_v19 = vpop.f32.mrf.mxu0 }
0x241c   :  { %v2814_v40 = vadd.f32 %v2810_v19, %v2058_v58 }
0x241d   :  { %v7703_v41 = vpop.f32.mrf.mxu0 }
0x241e   :  { %8084 = vtanh.f32 %v2814_v40  ;;  %v7304_v10 = vmul.f32 -1.442695, %v2814_v40 }
0x241f   :  { %v3029_v42 = vpop.f32.mrf.mxu0 }
0x2420   :  { %8086 = vpow2.f32 %v7304_v10 }
0x2421   :  { %v7713_v43 = vpop.f32.mrf.mxu0 }
0x2423   :  { %v8969_v6 = vpop.f32.mrf.mxu0 }
0x2425   :  { %v7723_v44 = vpop.f32.mrf.mxu0 }
0x2427   :  { %v8971_v45 = vpop.f32.mrf.mxu0 }
0x2429   :  { %v7733_v46 = vpop.f32.mrf.mxu0 }
0x242b   :  { %v8085_v47 = vpop.eup %8084 }
0x242c   :  { %2824 = vrot.lane.b32.xlu0 %v8085_v47, %s8455_s25 }
0x242d   :  { %v8087_v48 = vpop.eup %8086 }
0x242e   :  { %v2818_v49 = vadd.f32 1.0, %v8087_v48 }
0x2430   :  { %8088 = vrcp.f32 %v2818_v49 }
0x243d   :  { %v8089_v14 = vpop.eup %8088 }
0x243e   :  { %v2822_v26 = vmul.f32 %v8089_v14, %v2732_v8 }
0x249e   :  { %v2825_v50 = vpop.permute.xlu0 %2824 }
0x249f   :  { %v2827_v51 = vmul.f32 %v8089_v14, %v2825_v50 }
0x24a1   :  { %2829 = vrot.lane.b32.xlu1 %v2827_v51, %s8444_s23 }
0x2513   :  { %v2830_v52 = vpop.permute.xlu1 %2829 }
0x2514   :  { %v8975_v54 = vadd.f32 %v2830_v52, %v2822_v26 }
0x2516   :  { %8090 = vtanh.f32 %v8975_v54 }
0x2523   :  { %v8091_v56 = vpop.eup %8090 }
0x2524   :  { %2835 = vrot.lane.b32.xlu0 %v8091_v56, %s8444_s23 }
0x2596   :  { %v2836_v60 = vpop.permute.xlu0 %2835 }
0x2597   :  { %v2838_v28 = vmul.f32 %v8089_v14, %v2836_v60 }
0x2599   :  { %2840 = vrot.lane.b32.xlu1 %v2838_v28, %s8456_s0 }
0x260b   :  { %v2841_v62 = vpop.permute.xlu1 %2840 }
0x260c   :  { %7707 = vmatmul.mubr.msk.f32.vlgmr.msra.gmra.mxu1 %vm746_vm4, %v2841_v62  ;;  %7742 = vmatmul.mubr.msk.f32.vlgmr.msra.gmra.mxu0 %vm746_vm4, %v2841_v62 }
0x260d   :  { %7750 = vmatpush3.msra.mxu0 %v8983_v61  ;;  %7715 = vmatpush3.msra.mxu1 %v8940_v38 }
0x260e   :  { %7716 = vmatprep.mubr.msk.f32.mxu1 %vm8454_vm0, %v8453_v1  ;;  %7751 = vmatprep.mubr.msk.f32.mxu0 %vm8454_vm0, %v8453_v1 }
0x260f   :  { %7724 = vmatprep.subr.mxu1 %v8453_v1  ;;  %7759 = vmatprep.subr.mxu0 %v8453_v1 }
0x2610   :  { %7717 = vmatmul.mubr.msk.f32.vlgmr.msra.gmra.mxu1 %vm746_vm4, %v8887_v20  ;;  %7752 = vmatmul.mubr.msk.f32.vlgmr.msra.gmra.mxu0 %vm746_vm4, %v3526_v63  ;;  %v2130_v20 = vadd.f32 %v8841_v5, %v8879_v59 }
0x2611   :  { %7725 = vmatpush3.msra.mxu1 %v8940_v38  ;;  %7726 = vmatprep.mubr.msk.f32.mxu1 %vm8454_vm0, %v8453_v1 }
0x2612   :  { %7734 = vmatprep.subr.mxu1 %v8453_v1  ;;  %7760 = vmatpush3.msra.mxu0 %v8983_v61 }
0x2613   :  { %7761 = vmatprep.mubr.msk.f32.mxu0 %vm8454_vm0, %v8453_v1  ;;  %7769 = vmatprep.subr.mxu0 %v8453_v1 }
0x2614   :  { %7727 = vmatmul.mubr.msk.f32.vlgmr.msra.gmra.mxu1 %vm746_vm4, %v8915_v57  ;;  %v9020_v57 = vld [vmem:[#allocation8 + $0x2] ss:$0 sm:$0xff] }
0x2615   :  { %7735 = vmatpush3.msra.mxu1 %v8940_v38  ;;  %7736 = vmatprep.mubr.msk.f32.mxu1 %vm8454_vm0, %v8453_v1  ;;  %v3030_v11 = vadd.f32 %v9020_v57, %v3029_v42 }
0x2616   :  { %7744 = vmatprep.subr.mxu1 %v8453_v1 }
0x2618   :  { %7737 = vmatmul.mubr.msk.f32.vlgmr.msra.gmra.mxu1 %vm746_vm4, %v8942_v39 }
0x2619   :  { %7745 = vmatpush3.msra.mxu1 %v8940_v38  ;;  %7746 = vmatprep.mubr.msk.f32.mxu1 %vm8454_vm0, %v8453_v1 }
0x261a   :  { %7754 = vmatprep.subr.mxu1 %v8453_v1 }
0x26cc   :  { %v2910_v0 = vpop.f32.mrf.mxu1  ;;  %v9022_v2 = vpop.f32.mrf.mxu0 }
0x26cd   :  { %v2914_v3 = vadd.f32 %v2910_v0, %v2130_v20 }
0x26ce   :  { %v7708_v4 = vpop.f32.mrf.mxu1  ;;  %v7743_v7 = vpop.f32.mrf.mxu0 }
0x26cf   :  { %8092 = vtanh.f32 %v2914_v3  ;;  %v7306_v25 = vmul.f32 -1.442695, %v2914_v3 }
0x26d0   :  { %v9025_v12 = vpop.f32.mrf.mxu1  ;;  %v3598_v33 = vpop.f32.mrf.mxu0 }
0x26d1   :  { %v3602_v55 = vadd.f32 %v3598_v33, %v3030_v11  ;;  %v3100_v50 = vadd.f32 %v9020_v57, %v9025_v12 }
0x26d2   :  { %v7718_v13 = vpop.f32.mrf.mxu1  ;;  %v7753_v15 = vpop.f32.mrf.mxu0 }
0x26d3   :  { %8094 = vtanh.f32 %v3602_v55  ;;  %v7318_v24 = vmul.f32 -1.442695, %v3602_v55  ;;  %v3170_v55 = vadd.f32 %v9020_v57, %v8969_v6 }
0x26d4   :  { %v9027_v16 = vpop.f32.mrf.mxu1  ;;  %8096 = vpow2.f32 %v7306_v25 }
0x26d5   :  { %8098 = vpow2.f32 %v7318_v24 }
0x26d6   :  { %v7728_v5 = vpop.f32.mrf.mxu1 }
0x26d8   :  { %v9029_v59 = vpop.f32.mrf.mxu1 }
0x26da   :  { %v7738_v17 = vpop.f32.mrf.mxu1 }
0x26dc   :  { %v8093_v18 = vpop.eup %8092 }
0x26dd   :  { %2924 = vrot.lane.b32.xlu0 %v8093_v18, %s8455_s25 }
0x26e0   :  { %v8095_v21 = vpop.eup %8094 }
0x26e1   :  { %3616 = vrot.lane.b32.xlu1 %v8095_v21, %s8455_s25  ;;  %v8097_v27 = vpop.eup %8096 }
0x26e2   :  { %v2918_v29 = vadd.f32 1.0, %v8097_v27  ;;  %v8099_v30 = vpop.eup %8098 }
0x26e3   :  { %v3606_v9 = vadd.f32 1.0, %v8099_v30 }
0x26e4   :  { %8100 = vrcp.f32 %v2918_v29 }
0x26e5   :  { %3611 = vrot.lane.b32.xlu1 %v3528_v22, %s8444_s23  ;;  %8102 = vrcp.f32 %v3606_v9 }
0x26f1   :  { %v8101_v31 = vpop.eup %8100 }
0x26f2   :  { %v8103_v35 = vpop.eup %8102  ;;  %v2922_v37 = vmul.f32 %v8101_v31, %v8975_v54 }
0x274f   :  { %v2925_v32 = vpop.permute.xlu0 %2924 }
0x2750   :  { %v2927_v34 = vmul.f32 %v8101_v31, %v2925_v32 }
0x2752   :  { %2929 = vrot.lane.b32.xlu0 %v2927_v34, %s8444_s23 }
0x2753   :  { %v3617_v8 = vpop.permute.xlu1 %3616 }
0x2754   :  { %v3619_v36 = vmul.f32 %v8103_v35, %v3617_v8 }
0x2756   :  { %3621 = vrot.lane.b32.xlu0 %v3619_v36, %s8444_s23 }
0x2757   :  { %v3612_v53 = vpop.permute.xlu1 %3611 }
0x2758   :  { %v3614_v58 = vmul.f32 %v8103_v35, %v3612_v53 }
0x27c4   :  { %v2930_v38 = vpop.permute.xlu0 %2929 }
0x27c5   :  { %v9037_v39 = vadd.f32 %v2930_v38, %v2922_v37 }
0x27c7   :  { %8104 = vtanh.f32 %v9037_v39 }
0x27c8   :  { %v3622_v19 = vpop.permute.xlu0 %3621 }
0x27c9   :  { %v3624_v40 = vadd.f32 %v3622_v19, %v3614_v58 }
0x27cb   :  { %8106 = vtanh.f32 %v3624_v40 }
0x27d4   :  { %v8105_v41 = vpop.eup %8104 }
0x27d5   :  { %2935 = vrot.lane.b32.xlu1 %v8105_v41, %s8444_s23 }
0x27d8   :  { %v8107_v42 = vpop.eup %8106 }
0x27d9   :  { %3627 = vrot.lane.b32.xlu0 %v8107_v42, %s8444_s23 }
0x2847   :  { %v2936_v43 = vpop.permute.xlu1 %2935 }
0x2848   :  { %v2938_v44 = vmul.f32 %v8101_v31, %v2936_v43 }
0x284a   :  { %2940 = vrot.lane.b32.xlu1 %v2938_v44, %s8456_s0 }
0x284b   :  { %v3628_v46 = vpop.permute.xlu0 %3627 }
0x284c   :  { %v3630_v47 = vmul.f32 %v8103_v35, %v3628_v46  ;;  %v3240_v35 = vadd.f32 %v9020_v57, %v9027_v16 }
0x284e   :  { %3632 = vrot.lane.b32.xlu0 %v3630_v47, %s8456_s0 }
0x28bc   :  { %v2941_v10 = vpop.permute.xlu1 %2940 }
0x28bd   :  { %2944 = vst.msk [vmem:[#allocation12 + $0x2] sm:$0x3] %vm1553_vm5, %v2941_v10  ;;  %7747 = vmatmul.mubr.msk.f32.vlgmr.msra.gmra.mxu1 %vm746_vm4, %v2941_v10 }
0x28be   :  { %7755 = vmatpush3.msra.mxu1 %v8983_v61  ;;  %7756 = vmatprep.mubr.msk.f32.mxu1 %vm8454_vm0, %v8453_v1 }
0x28bf   :  { %7764 = vmatprep.subr.mxu1 %v8453_v1 }
0x28c0   :  { %v9050_v48 = vpop.permute.xlu0 %3632 }
0x28c1   :  { %7757 = vmatmul.mubr.msk.f32.vlgmr.msra.gmra.mxu1 %vm746_vm4, %v9050_v48 }
0x28c2   :  { %7765 = vmatpush3.msra.mxu1 %v8983_v61  ;;  %7766 = vmatprep.mubr.msk.f32.mxu1 %vm8454_vm0, %v8453_v1 }
0x28c3   :  { %7774 = vmatprep.subr.mxu1 %v8453_v1 }
0x297d   :  { %v9058_v49 = vpop.f32.mrf.mxu1 }
0x297f   :  { %v7748_v14 = vpop.f32.mrf.mxu1 }
0x2981   :  { %v3702_v51 = vpop.f32.mrf.mxu1 }
0x2982   :  { %v3706_v26 = vadd.f32 %v3702_v51, %v3100_v50  ;;  %v3310_v50 = vadd.f32 %v9020_v57, %v8971_v45 }
0x2983   :  { %v7758_v52 = vpop.f32.mrf.mxu1 }
0x2984   :  { %8108 = vtanh.f32 %v3706_v26  ;;  %v7320_v56 = vmul.f32 -1.442695, %v3706_v26 }
0x2986   :  { %8110 = vpow2.f32 %v7320_v56 }
0x2991   :  { %v8109_v54 = vpop.eup %8108 }
0x2992   :  { %3716 = vrot.lane.b32.xlu1 %v8109_v54, %s8455_s25 }
0x2993   :  { %v8111_v60 = vpop.eup %8110 }
0x2994   :  { %v3710_v28 = vadd.f32 1.0, %v8111_v60 }
0x2996   :  { %8112 = vrcp.f32 %v3710_v28 }
0x29a3   :  { %v8113_v62 = vpop.eup %8112 }
0x29a4   :  { %v3714_v0 = vmul.f32 %v8113_v62, %v3624_v40 }
0x2a04   :  { %v3717_v63 = vpop.permute.xlu1 %3716 }
0x2a05   :  { %v3719_v20 = vmul.f32 %v8113_v62, %v3717_v63 }
0x2a07   :  { %3721 = vrot.lane.b32.xlu0 %v3719_v20, %s8444_s23 }
0x2a79   :  { %v3722_v3 = vpop.permute.xlu0 %3721 }
0x2a7a   :  { %v3724_v4 = vadd.f32 %v3722_v3, %v3714_v0 }
0x2a7c   :  { %8114 = vtanh.f32 %v3724_v4 }
0x2a89   :  { %v8115_v7 = vpop.eup %8114 }
0x2a8a   :  { %3727 = vrot.lane.b32.xlu1 %v8115_v7, %s8444_s23 }
0x2afc   :  { %v3728_v11 = vpop.permute.xlu1 %3727 }
0x2afd   :  { %v3730_v12 = vmul.f32 %v8113_v62, %v3728_v11 }
0x2aff   :  { %3732 = vrot.lane.b32.xlu0 %v3730_v12, %s8456_s0 }
0x2b71   :  { %v9066_v33 = vpop.permute.xlu0 %3732 }
0x2b72   :  { %7762 = vmatmul.mubr.msk.f32.vlgmr.msra.gmra.mxu0 %vm746_vm4, %v9066_v33 }
0x2b73   :  { %7770 = vmatpush3.msra.mxu0 %v8983_v61  ;;  %7771 = vmatprep.mubr.msk.f32.mxu0 %vm8454_vm0, %v8453_v1 }
0x2b74   :  { %7779 = vmatprep.subr.mxu0 %v8453_v1 }
0x2c32   :  { %v3802_v13 = vpop.f32.mrf.mxu0 }
0x2c33   :  { %v3806_v15 = vadd.f32 %v3802_v13, %v3170_v55  ;;  %v3380_v55 = vadd.f32 %v9020_v57, %v9029_v59 }
0x2c34   :  { %v7763_v5 = vpop.f32.mrf.mxu0 }
0x2c35   :  { %8116 = vtanh.f32 %v3806_v15  ;;  %v7322_v18 = vmul.f32 -1.442695, %v3806_v15 }
0x2c37   :  { %8118 = vpow2.f32 %v7322_v18 }
0x2c42   :  { %v8117_v17 = vpop.eup %8116 }
0x2c43   :  { %3816 = vrot.lane.b32.xlu1 %v8117_v17, %s8455_s25 }
0x2c44   :  { %v8119_v21 = vpop.eup %8118 }
0x2c45   :  { %v3810_v22 = vadd.f32 1.0, %v8119_v21 }
0x2c47   :  { %8120 = vrcp.f32 %v3810_v22 }
0x2c54   :  { %v8121_v25 = vpop.eup %8120 }
0x2c55   :  { %v3814_v29 = vmul.f32 %v8121_v25, %v3724_v4 }
0x2cb5   :  { %v3817_v24 = vpop.permute.xlu1 %3816 }
0x2cb6   :  { %v3819_v27 = vmul.f32 %v8121_v25, %v3817_v24 }
0x2cb8   :  { %3821 = vrot.lane.b32.xlu0 %v3819_v27, %s8444_s23 }
0x2d2a   :  { %v3822_v30 = vpop.permute.xlu0 %3821 }
0x2d2b   :  { %v3824_v6 = vadd.f32 %v3822_v30, %v3814_v29 }
0x2d2d   :  { %8122 = vtanh.f32 %v3824_v6 }
0x2d3a   :  { %v8123_v9 = vpop.eup %8122 }
0x2d3b   :  { %3827 = vrot.lane.b32.xlu1 %v8123_v9, %s8444_s23 }
0x2dad   :  { %v3828_v31 = vpop.permute.xlu1 %3827 }
0x2dae   :  { %v3830_v32 = vmul.f32 %v8121_v25, %v3828_v31  ;;  %v9119_v31 = vld [vmem:[#allocation6 + $0x10] sm:$0xff] }
0x2db0   :  { %3832 = vrot.lane.b32.xlu0 %v3830_v32, %s8456_s0 }
0x2e22   :  { %v9080_v34 = vpop.permute.xlu0 %3832 }
0x2e23   :  { %7767 = vmatmul.mubr.msk.f32.vlgmr.msra.gmra.mxu1 %vm746_vm4, %v9080_v34 }
0x2e24   :  { %7775 = vmatpush3.msra.mxu1 %v8983_v61  ;;  %7776 = vmatprep.mubr.msk.f32.mxu1 %vm8454_vm0, %v8453_v1 }
0x2e25   :  { %7784 = vmatprep.subr.mxu1 %v8453_v1 }
0x2ee3   :  { %v3902_v8 = vpop.f32.mrf.mxu1 }
0x2ee4   :  { %v3906_v36 = vadd.f32 %v3902_v8, %v3240_v35 }
0x2ee5   :  { %v7768_v37 = vpop.f32.mrf.mxu1 }
0x2ee6   :  { %8124 = vtanh.f32 %v3906_v36  ;;  %v7324_v38 = vmul.f32 -1.442695, %v3906_v36 }
0x2ee8   :  { %8126 = vpow2.f32 %v7324_v38 }
0x2ef3   :  { %v8125_v53 = vpop.eup %8124 }
0x2ef4   :  { %3916 = vrot.lane.b32.xlu1 %v8125_v53, %s8455_s25 }
0x2ef5   :  { %v8127_v58 = vpop.eup %8126 }
0x2ef6   :  { %v3910_v19 = vadd.f32 1.0, %v8127_v58 }
0x2ef8   :  { %8128 = vrcp.f32 %v3910_v19 }
0x2f05   :  { %v8129_v40 = vpop.eup %8128 }
0x2f06   :  { %v3914_v43 = vmul.f32 %v8129_v40, %v3824_v6 }
0x2f66   :  { %v3917_v41 = vpop.permute.xlu1 %3916 }
0x2f67   :  { %v3919_v42 = vmul.f32 %v8129_v40, %v3917_v41 }
0x2f69   :  { %3921 = vrot.lane.b32.xlu0 %v3919_v42, %s8444_s23 }
0x2fdb   :  { %v3922_v44 = vpop.permute.xlu0 %3921 }
0x2fdc   :  { %v3924_v16 = vadd.f32 %v3922_v44, %v3914_v43 }
0x2fde   :  { %8130 = vtanh.f32 %v3924_v16 }
0x2feb   :  { %v8131_v46 = vpop.eup %8130 }
0x2fec   :  { %3927 = vrot.lane.b32.xlu1 %v8131_v46, %s8444_s23 }
0x305e   :  { %v3928_v47 = vpop.permute.xlu1 %3927 }
0x305f   :  { %v3930_v10 = vmul.f32 %v8129_v40, %v3928_v47 }
0x3061   :  { %3932 = vrot.lane.b32.xlu0 %v3930_v10, %s8456_s0 }
0x30d3   :  { %v9094_v14 = vpop.permute.xlu0 %3932 }
0x30d4   :  { %7772 = vmatmul.mubr.msk.f32.vlgmr.msra.gmra.mxu0 %vm746_vm4, %v9094_v14 }
0x30d5   :  { %7780 = vmatpush3.msra.mxu0 %v8983_v61  ;;  %7781 = vmatprep.mubr.msk.f32.mxu0 %vm8454_vm0, %v8453_v1 }
0x30d6   :  { %7789 = vmatprep.subr.mxu0 %v8453_v1 }
0x3194   :  { %v4002_v51 = vpop.f32.mrf.mxu0 }
0x3195   :  { %v4006_v26 = vadd.f32 %v4002_v51, %v3310_v50 }
0x3196   :  { %v7773_v52 = vpop.f32.mrf.mxu0 }
0x3197   :  { %8132 = vtanh.f32 %v4006_v26  ;;  %v7326_v56 = vmul.f32 -1.442695, %v4006_v26  ;;  %v9162_v52 = vld [vmem:[%s9512_s3 + $0x18] sm:$0xff] }
0x3199   :  { %8134 = vpow2.f32 %v7326_v56  ;;  %v4918_v56 = vld [vmem:[#allocation9 + $0x6] sm:$0x3] }
0x31a4   :  { %v8133_v54 = vpop.eup %8132 }
0x31a5   :  { %4016 = vrot.lane.b32.xlu1 %v8133_v54, %s8455_s25 }
0x31a6   :  { %v8135_v60 = vpop.eup %8134 }
0x31a7   :  { %v4010_v28 = vadd.f32 1.0, %v8135_v60 }
0x31a9   :  { %8136 = vrcp.f32 %v4010_v28 }
0x31b6   :  { %v8137_v62 = vpop.eup %8136 }
0x31b7   :  { %v4014_v0 = vmul.f32 %v8137_v62, %v3924_v16 }
0x3217   :  { %v4017_v63 = vpop.permute.xlu1 %4016 }
0x3218   :  { %v4019_v20 = vmul.f32 %v8137_v62, %v4017_v63 }
0x321a   :  { %4021 = vrot.lane.b32.xlu0 %v4019_v20, %s8444_s23 }
0x328c   :  { %v4022_v3 = vpop.permute.xlu0 %4021 }
0x328d   :  { %v4024_v45 = vadd.f32 %v4022_v3, %v4014_v0 }
0x328f   :  { %8138 = vtanh.f32 %v4024_v45 }
0x329c   :  { %v8139_v4 = vpop.eup %8138 }
0x329d   :  { %4027 = vrot.lane.b32.xlu1 %v8139_v4, %s8444_s23 }
0x330f   :  { %v4028_v7 = vpop.permute.xlu1 %4027 }
0x3310   :  { %v4030_v11 = vmul.f32 %v8137_v62, %v4028_v7 }
0x3312   :  { %4032 = vrot.lane.b32.xlu0 %v4030_v11, %s8456_s0 }
0x3384   :  { %v4033_v12 = vpop.permute.xlu0 %4032 }
0x3385   :  { %7777 = vmatmul.mubr.msk.f32.vlgmr.msra.gmra.mxu1 %vm746_vm4, %v4033_v12 }
0x3386   :  { %7785 = vmatpush3.msra.mxu1 %v8983_v61  ;;  %7786 = vmatprep.mubr.msk.f32.mxu1 %vm8454_vm0, %v8453_v1 }
0x3387   :  { %7794 = vmatprep.subr.mxu1 %v8453_v1 }
0x3445   :  { %v4102_v13 = vpop.f32.mrf.mxu1 }
0x3446   :  { %v4106_v15 = vadd.f32 %v4102_v13, %v3380_v55 }
0x3447   :  { %v7778_v5 = vpop.f32.mrf.mxu1 }
0x3448   :  { %8140 = vtanh.f32 %v4106_v15  ;;  %v7328_v18 = vmul.f32 -1.442695, %v4106_v15  ;;  %v4920_v5 = vld [vmem:[#allocation11 + $0x6] sm:$0x3] }
0x344a   :  { %8142 = vpow2.f32 %v7328_v18 }
0x3455   :  { %v8141_v17 = vpop.eup %8140 }
0x3456   :  { %4116 = vrot.lane.b32.xlu1 %v8141_v17, %s8455_s25 }
0x3457   :  { %v8143_v21 = vpop.eup %8142 }
0x3458   :  { %v4110_v22 = vadd.f32 1.0, %v8143_v21 }
0x345a   :  { %8144 = vrcp.f32 %v4110_v22 }
0x3467   :  { %v8145_v61 = vpop.eup %8144 }
0x3468   :  { %v4114_v27 = vmul.f32 %v8145_v61, %v4024_v45 }
0x34c8   :  { %v4117_v25 = vpop.permute.xlu1 %4116 }
0x34c9   :  { %v4119_v24 = vmul.f32 %v8145_v61, %v4117_v25 }
0x34cb   :  { %4121 = vrot.lane.b32.xlu0 %v4119_v24, %s8444_s23 }
0x353d   :  { %v4122_v29 = vpop.permute.xlu0 %4121 }
0x353e   :  { %v4124_v59 = vadd.f32 %v4122_v29, %v4114_v27 }
0x3540   :  { %8146 = vtanh.f32 %v4124_v59 }
0x354d   :  { %v8147_v30 = vpop.eup %8146 }
0x354e   :  { %4127 = vrot.lane.b32.xlu1 %v8147_v30, %s8444_s23 }
0x35c0   :  { %v4128_v6 = vpop.permute.xlu1 %4127 }
0x35c1   :  { %v4130_v9 = vmul.f32 %v8145_v61, %v4128_v6 }
0x35c3   :  { %4132 = vrot.lane.b32.xlu0 %v4130_v9, %s8456_s0 }
0x3635   :  { %v9121_v32 = vpop.permute.xlu0 %4132 }
0x3636   :  { %7782 = vmatmul.mubr.msk.f32.vlgmr.msra.gmra.mxu0 %vm746_vm4, %v9121_v32 }
0x3637   :  { %7790 = vmatpush3.msra.mxu0 %v9119_v31  ;;  %7791 = vmatprep.mubr.msk.f32.mxu0 %vm8454_vm0, %v8453_v1 }
0x3638   :  { %7799 = vmatprep.subr.mxu0 %v8453_v1 }
0x363a   :  { %7792 = vmatmul.mubr.msk.f32.vlgmr.msra.gmra.mxu0 %vm746_vm4, %v9050_v48  ;;  %v3450_v48 = vadd.f32 %v9020_v57, %v9022_v2 }
0x363b   :  { %7800 = vmatpush3.msra.mxu0 %v9119_v31  ;;  %7801 = vmatprep.mubr.msk.f32.mxu0 %vm8454_vm0, %v8453_v1 }
0x363c   :  { %7809 = vmatprep.subr.mxu0 %v8453_v1 }
0x363e   :  { %7802 = vmatmul.mubr.msk.f32.vlgmr.msra.gmra.mxu0 %vm746_vm4, %v9080_v34 }
0x363f   :  { %7810 = vmatpush3.msra.mxu0 %v9119_v31  ;;  %7811 = vmatprep.mubr.msk.f32.mxu0 %vm8454_vm0, %v8453_v1 }
0x3640   :  { %7819 = vmatprep.subr.mxu0 %v8453_v1 }
0x3642   :  { %7812 = vmatmul.mubr.msk.f32.vlgmr.msra.gmra.mxu0 %vm746_vm4, %v4033_v12 }
0x3643   :  { %7820 = vmatpush3.msra.mxu0 %v9119_v31  ;;  %7821 = vmatprep.mubr.msk.f32.mxu0 %vm8454_vm0, %v8453_v1 }
0x3644   :  { %7829 = vmatprep.subr.mxu0 %v8453_v1 }
0x36f6   :  { %v4202_v34 = vpop.f32.mrf.mxu0 }
0x36f7   :  { %v4206_v35 = vadd.f32 %v4202_v34, %v3450_v48 }
0x36f8   :  { %v7783_v8 = vpop.f32.mrf.mxu0 }
0x36f9   :  { %8148 = vtanh.f32 %v4206_v35  ;;  %v7330_v41 = vmul.f32 -1.442695, %v4206_v35 }
0x36fa   :  { %v4421_v36 = vpop.f32.mrf.mxu0 }
0x36fb   :  { %8150 = vpow2.f32 %v7330_v41 }
0x36fc   :  { %v7793_v37 = vpop.f32.mrf.mxu0 }
0x36fe   :  { %v9148_v53 = vpop.f32.mrf.mxu0 }
0x3700   :  { %v7803_v38 = vpop.f32.mrf.mxu0 }
0x3702   :  { %v9150_v58 = vpop.f32.mrf.mxu0 }
0x3704   :  { %v7813_v19 = vpop.f32.mrf.mxu0 }
0x3706   :  { %v8149_v40 = vpop.eup %8148 }
0x3707   :  { %4216 = vrot.lane.b32.xlu1 %v8149_v40, %s8455_s25 }
0x3708   :  { %v8151_v42 = vpop.eup %8150 }
0x3709   :  { %v4210_v43 = vadd.f32 1.0, %v8151_v42 }
0x370b   :  { %8152 = vrcp.f32 %v4210_v43 }
0x3718   :  { %v8153_v2 = vpop.eup %8152 }
0x3719   :  { %v4214_v46 = vmul.f32 %v8153_v2, %v4124_v59 }
0x3779   :  { %v4217_v44 = vpop.permute.xlu1 %4216 }
0x377a   :  { %v4219_v16 = vmul.f32 %v8153_v2, %v4217_v44 }
0x377c   :  { %4221 = vrot.lane.b32.xlu0 %v4219_v16, %s8444_s23 }
0x37ee   :  { %v4222_v47 = vpop.permute.xlu0 %4221 }
0x37ef   :  { %v9154_v10 = vadd.f32 %v4222_v47, %v4214_v46 }
0x37f1   :  { %8154 = vtanh.f32 %v9154_v10 }
0x37fe   :  { %v8155_v50 = vpop.eup %8154 }
0x37ff   :  { %4227 = vrot.lane.b32.xlu1 %v8155_v50, %s8444_s23 }
0x3871   :  { %v4228_v51 = vpop.permute.xlu1 %4227 }
0x3872   :  { %v4230_v26 = vmul.f32 %v8153_v2, %v4228_v51 }
0x3874   :  { %4232 = vrot.lane.b32.xlu0 %v4230_v26, %s8456_s0 }
0x38e6   :  { %v4233_v54 = vpop.permute.xlu0 %4232 }
0x38e7   :  { %7787 = vmatmul.mubr.msk.f32.vlgmr.msra.gmra.mxu1 %vm746_vm4, %v4233_v54  ;;  %7822 = vmatmul.mubr.msk.f32.vlgmr.msra.gmra.mxu0 %vm746_vm4, %v4233_v54 }
0x38e8   :  { %7830 = vmatpush3.msra.mxu0 %v9162_v52  ;;  %7795 = vmatpush3.msra.mxu1 %v9119_v31 }
0x38e9   :  { %7796 = vmatprep.mubr.msk.f32.mxu1 %vm8454_vm0, %v8453_v1  ;;  %7831 = vmatprep.mubr.msk.f32.mxu0 %vm8454_vm0, %v8453_v1 }
0x38ea   :  { %7804 = vmatprep.subr.mxu1 %v8453_v1  ;;  %7839 = vmatprep.subr.mxu0 %v8453_v1 }
0x38eb   :  { %7797 = vmatmul.mubr.msk.f32.vlgmr.msra.gmra.mxu1 %vm746_vm4, %v9066_v33  ;;  %7832 = vmatmul.mubr.msk.f32.vlgmr.msra.gmra.mxu0 %vm746_vm4, %v4918_v56  ;;  %v3522_v33 = vadd.f32 %v9020_v57, %v9058_v49 }
0x38ec   :  { %7805 = vmatpush3.msra.mxu1 %v9119_v31  ;;  %7806 = vmatprep.mubr.msk.f32.mxu1 %vm8454_vm0, %v8453_v1 }
0x38ed   :  { %7814 = vmatprep.subr.mxu1 %v8453_v1  ;;  %7840 = vmatpush3.msra.mxu0 %v9162_v52 }
0x38ee   :  { %7841 = vmatprep.mubr.msk.f32.mxu0 %vm8454_vm0, %v8453_v1  ;;  %7849 = vmatprep.subr.mxu0 %v8453_v1 }
0x38ef   :  { %7807 = vmatmul.mubr.msk.f32.vlgmr.msra.gmra.mxu1 %vm746_vm4, %v9094_v14  ;;  %v9199_v14 = vld [vmem:[#allocation8 + $0x3] ss:$0 sm:$0xff] }
0x38f0   :  { %7815 = vmatpush3.msra.mxu1 %v9119_v31  ;;  %7816 = vmatprep.mubr.msk.f32.mxu1 %vm8454_vm0, %v8453_v1  ;;  %v4422_v0 = vadd.f32 %v9199_v14, %v4421_v36 }
0x38f1   :  { %7824 = vmatprep.subr.mxu1 %v8453_v1 }
0x38f3   :  { %7817 = vmatmul.mubr.msk.f32.vlgmr.msra.gmra.mxu1 %vm746_vm4, %v9121_v32 }
0x38f4   :  { %7825 = vmatpush3.msra.mxu1 %v9119_v31  ;;  %7826 = vmatprep.mubr.msk.f32.mxu1 %vm8454_vm0, %v8453_v1 }
0x38f5   :  { %7834 = vmatprep.subr.mxu1 %v8453_v1 }
0x39a7   :  { %v4302_v60 = vpop.f32.mrf.mxu1  ;;  %v9201_v28 = vpop.f32.mrf.mxu0 }
0x39a8   :  { %v4306_v62 = vadd.f32 %v4302_v60, %v3522_v33 }
0x39a9   :  { %v7788_v63 = vpop.f32.mrf.mxu1  ;;  %v7823_v20 = vpop.f32.mrf.mxu0 }
0x39aa   :  { %8156 = vtanh.f32 %v4306_v62  ;;  %v7332_v17 = vmul.f32 -1.442695, %v4306_v62 }
0x39ab   :  { %v9204_v3 = vpop.f32.mrf.mxu1  ;;  %v4990_v45 = vpop.f32.mrf.mxu0 }
0x39ac   :  { %v4994_v4 = vadd.f32 %v4990_v45, %v4422_v0  ;;  %v4492_v16 = vadd.f32 %v9199_v14, %v9204_v3 }
0x39ad   :  { %v7798_v7 = vpop.f32.mrf.mxu1  ;;  %v7833_v11 = vpop.f32.mrf.mxu0 }
0x39ae   :  { %8158 = vtanh.f32 %v4994_v4  ;;  %v7344_v18 = vmul.f32 -1.442695, %v4994_v4  ;;  %v4562_v7 = vadd.f32 %v9199_v14, %v9148_v53 }
0x39af   :  { %v9206_v12 = vpop.f32.mrf.mxu1  ;;  %8160 = vpow2.f32 %v7332_v17 }
0x39b0   :  { %8162 = vpow2.f32 %v7344_v18 }
0x39b1   :  { %v7808_v57 = vpop.f32.mrf.mxu1 }
0x39b3   :  { %v9208_v49 = vpop.f32.mrf.mxu1 }
0x39b5   :  { %v7818_v55 = vpop.f32.mrf.mxu1 }
0x39b7   :  { %v8157_v13 = vpop.eup %8156 }
0x39b8   :  { %4316 = vrot.lane.b32.xlu1 %v8157_v13, %s8455_s25 }
0x39bb   :  { %v8159_v15 = vpop.eup %8158 }
0x39bc   :  { %5008 = vrot.lane.b32.xlu0 %v8159_v15, %s8455_s25  ;;  %v8161_v21 = vpop.eup %8160 }
0x39bd   :  { %v4310_v22 = vadd.f32 1.0, %v8161_v21  ;;  %v8163_v61 = vpop.eup %8162 }
0x39be   :  { %v4998_v25 = vadd.f32 1.0, %v8163_v61 }
0x39bf   :  { %8164 = vrcp.f32 %v4310_v22 }
0x39c0   :  { %5003 = vrot.lane.b32.xlu0 %v4920_v5, %s8444_s23  ;;  %8166 = vrcp.f32 %v4998_v25 }
0x39cc   :  { %v8165_v24 = vpop.eup %8164 }
0x39cd   :  { %v8167_v59 = vpop.eup %8166  ;;  %v4314_v9 = vmul.f32 %v8165_v24, %v9154_v10 }
0x3a2a   :  { %v4317_v27 = vpop.permute.xlu1 %4316 }
0x3a2b   :  { %v4319_v29 = vmul.f32 %v8165_v24, %v4317_v27 }
0x3a2d   :  { %4321 = vrot.lane.b32.xlu1 %v4319_v29, %s8444_s23 }
0x3a2e   :  { %v5009_v30 = vpop.permute.xlu0 %5008 }
0x3a2f   :  { %v5011_v6 = vmul.f32 %v8167_v59, %v5009_v30  ;;  %v4632_v30 = vadd.f32 %v9199_v14, %v9206_v12 }
0x3a31   :  { %5013 = vrot.lane.b32.xlu1 %v5011_v6, %s8444_s23 }
0x3a32   :  { %v5004_v31 = vpop.permute.xlu0 %5003 }
0x3a33   :  { %v5006_v34 = vmul.f32 %v8167_v59, %v5004_v31 }
0x3a9f   :  { %v4322_v32 = vpop.permute.xlu1 %4321 }
0x3aa0   :  { %v9216_v48 = vadd.f32 %v4322_v32, %v4314_v9 }
0x3aa2   :  { %8168 = vtanh.f32 %v9216_v48 }
0x3aa3   :  { %v5014_v35 = vpop.permute.xlu1 %5013 }
0x3aa4   :  { %v5016_v8 = vadd.f32 %v5014_v35, %v5006_v34 }
0x3aa6   :  { %8170 = vtanh.f32 %v5016_v8 }
0x3aaf   :  { %v8169_v36 = vpop.eup %8168 }
0x3ab0   :  { %4327 = vrot.lane.b32.xlu0 %v8169_v36, %s8444_s23 }
0x3ab3   :  { %v8171_v37 = vpop.eup %8170 }
0x3ab4   :  { %5019 = vrot.lane.b32.xlu1 %v8171_v37, %s8444_s23 }
0x3b22   :  { %v4328_v38 = vpop.permute.xlu0 %4327 }
0x3b23   :  { %v4330_v19 = vmul.f32 %v8165_v24, %v4328_v38 }
0x3b25   :  { %4332 = vrot.lane.b32.xlu0 %v4330_v19, %s8456_s0 }
0x3b26   :  { %v5020_v40 = vpop.permute.xlu1 %5019 }
0x3b27   :  { %v5022_v41 = vmul.f32 %v8167_v59, %v5020_v40 }
0x3b29   :  { %5024 = vrot.lane.b32.xlu1 %v5022_v41, %s8456_s0 }
0x3b97   :  { %v4333_v42 = vpop.permute.xlu0 %4332 }
0x3b98   :  { %4336 = vst.msk [vmem:[#allocation12 + $0x4] sm:$0x3] %vm1553_vm5, %v4333_v42  ;;  %7827 = vmatmul.mubr.msk.f32.vlgmr.msra.gmra.mxu1 %vm746_vm4, %v4333_v42 }
0x3b99   :  { %7835 = vmatpush3.msra.mxu1 %v9162_v52  ;;  %7836 = vmatprep.mubr.msk.f32.mxu1 %vm8454_vm0, %v8453_v1 }
0x3b9a   :  { %7844 = vmatprep.subr.mxu1 %v8453_v1 }
0x3b9b   :  { %v9229_v43 = vpop.permute.xlu1 %5024 }
0x3b9c   :  { %7837 = vmatmul.mubr.msk.f32.vlgmr.msra.gmra.mxu1 %vm746_vm4, %v9229_v43 }
0x3b9d   :  { %7845 = vmatpush3.msra.mxu1 %v9162_v52  ;;  %7846 = vmatprep.mubr.msk.f32.mxu1 %vm8454_vm0, %v8453_v1 }
0x3b9e   :  { %7854 = vmatprep.subr.mxu1 %v8453_v1 }
0x3c58   :  { %v9237_v2 = vpop.f32.mrf.mxu1 }
0x3c5a   :  { %v7828_v44 = vpop.f32.mrf.mxu1 }
0x3c5c   :  { %v5094_v46 = vpop.f32.mrf.mxu1 }
0x3c5d   :  { %v5098_v47 = vadd.f32 %v5094_v46, %v4492_v16  ;;  %v4702_v46 = vadd.f32 %v9199_v14, %v9150_v58 }
0x3c5e   :  { %v7838_v10 = vpop.f32.mrf.mxu1 }
0x3c5f   :  { %8172 = vtanh.f32 %v5098_v47  ;;  %v7346_v51 = vmul.f32 -1.442695, %v5098_v47 }
0x3c61   :  { %8174 = vpow2.f32 %v7346_v51 }
0x3c6c   :  { %v8173_v50 = vpop.eup %8172 }
0x3c6d   :  { %5108 = vrot.lane.b32.xlu0 %v8173_v50, %s8455_s25 }
0x3c6e   :  { %v8175_v26 = vpop.eup %8174 }
0x3c6f   :  { %v5102_v54 = vadd.f32 1.0, %v8175_v26 }
0x3c71   :  { %8176 = vrcp.f32 %v5102_v54 }
0x3c7e   :  { %v8177_v56 = vpop.eup %8176 }
0x3c7f   :  { %v5106_v62 = vmul.f32 %v8177_v56, %v5016_v8 }
0x3cdf   :  { %v5109_v33 = vpop.permute.xlu0 %5108 }
0x3ce0   :  { %v5111_v60 = vmul.f32 %v8177_v56, %v5109_v33 }
0x3ce2   :  { %5113 = vrot.lane.b32.xlu1 %v5111_v60, %s8444_s23 }
0x3d54   :  { %v5114_v63 = vpop.permute.xlu1 %5113 }
0x3d55   :  { %v5116_v20 = vadd.f32 %v5114_v63, %v5106_v62 }
0x3d57   :  { %8178 = vtanh.f32 %v5116_v20 }
0x3d64   :  { %v8179_v0 = vpop.eup %8178 }
0x3d65   :  { %5119 = vrot.lane.b32.xlu0 %v8179_v0, %s8444_s23 }
0x3dd7   :  { %v5120_v3 = vpop.permute.xlu0 %5119 }
0x3dd8   :  { %v5122_v45 = vmul.f32 %v8177_v56, %v5120_v3 }
0x3dda   :  { %5124 = vrot.lane.b32.xlu1 %v5122_v45, %s8456_s0 }
0x3e4c   :  { %v9245_v4 = vpop.permute.xlu1 %5124 }
0x3e4d   :  { %7842 = vmatmul.mubr.msk.f32.vlgmr.msra.gmra.mxu0 %vm746_vm4, %v9245_v4 }
0x3e4e   :  { %7850 = vmatpush3.msra.mxu0 %v9162_v52  ;;  %7851 = vmatprep.mubr.msk.f32.mxu0 %vm8454_vm0, %v8453_v1 }
0x3e4f   :  { %7859 = vmatprep.subr.mxu0 %v8453_v1 }
0x3f0d   :  { %v5194_v11 = vpop.f32.mrf.mxu0 }
0x3f0e   :  { %v5198_v57 = vadd.f32 %v5194_v11, %v4562_v7  ;;  %v4772_v11 = vadd.f32 %v9199_v14, %v9208_v49 }
0x3f0f   :  { %v7843_v55 = vpop.f32.mrf.mxu0 }
0x3f10   :  { %8180 = vtanh.f32 %v5198_v57  ;;  %v7348_v15 = vmul.f32 -1.442695, %v5198_v57 }
0x3f12   :  { %8182 = vpow2.f32 %v7348_v15 }
0x3f1d   :  { %v8181_v13 = vpop.eup %8180 }
0x3f1e   :  { %5208 = vrot.lane.b32.xlu0 %v8181_v13, %s8455_s25 }
0x3f1f   :  { %v8183_v5 = vpop.eup %8182 }
0x3f20   :  { %v5202_v17 = vadd.f32 1.0, %v8183_v5 }
0x3f22   :  { %8184 = vrcp.f32 %v5202_v17 }
0x3f2f   :  { %v8185_v18 = vpop.eup %8184 }
0x3f30   :  { %v5206_v61 = vmul.f32 %v8185_v18, %v5116_v20 }
0x3f90   :  { %v5209_v21 = vpop.permute.xlu0 %5208 }
0x3f91   :  { %v5211_v22 = vmul.f32 %v8185_v18, %v5209_v21 }
0x3f93   :  { %5213 = vrot.lane.b32.xlu1 %v5211_v22, %s8444_s23 }
0x4005   :  { %v5214_v25 = vpop.permute.xlu1 %5213 }
0x4006   :  { %v5216_v53 = vadd.f32 %v5214_v25, %v5206_v61 }
0x4008   :  { %8186 = vtanh.f32 %v5216_v53 }
0x4015   :  { %v8187_v24 = vpop.eup %8186 }
0x4016   :  { %5219 = vrot.lane.b32.xlu0 %v8187_v24, %s8444_s23 }
0x4088   :  { %v5220_v27 = vpop.permute.xlu0 %5219 }
0x4089   :  { %v5222_v29 = vmul.f32 %v8185_v18, %v5220_v27 }
0x408b   :  { %5224 = vrot.lane.b32.xlu1 %v5222_v29, %s8456_s0  ;;  %v9298_v29 = vld [vmem:[#allocation6 + $0x18] sm:$0xff] }
0x40fd   :  { %v9259_v59 = vpop.permute.xlu1 %5224 }
0x40fe   :  { %7847 = vmatmul.mubr.msk.f32.vlgmr.msra.gmra.mxu1 %vm746_vm4, %v9259_v59 }
0x40ff   :  { %7855 = vmatpush3.msra.mxu1 %v9162_v52  ;;  %7856 = vmatprep.mubr.msk.f32.mxu1 %vm8454_vm0, %v8453_v1 }
0x4100   :  { %7864 = vmatprep.subr.mxu1 %v8453_v1 }
0x41be   :  { %v5294_v6 = vpop.f32.mrf.mxu1 }
0x41bf   :  { %v5298_v9 = vadd.f32 %v5294_v6, %v4632_v30 }
0x41c0   :  { %v7848_v31 = vpop.f32.mrf.mxu1 }
0x41c1   :  { %8188 = vtanh.f32 %v5298_v9  ;;  %v7350_v34 = vmul.f32 -1.442695, %v5298_v9 }
0x41c3   :  { %8190 = vpow2.f32 %v7350_v34 }
0x41ce   :  { %v8189_v32 = vpop.eup %8188 }
0x41cf   :  { %5308 = vrot.lane.b32.xlu0 %v8189_v32, %s8455_s25 }
0x41d0   :  { %v8191_v35 = vpop.eup %8190 }
0x41d1   :  { %v5302_v8 = vadd.f32 1.0, %v8191_v35 }
0x41d3   :  { %8192 = vrcp.f32 %v5302_v8 }
0x41e0   :  { %v8193_v36 = vpop.eup %8192 }
0x41e1   :  { %v5306_v19 = vmul.f32 %v8193_v36, %v5216_v53 }
0x4241   :  { %v5309_v37 = vpop.permute.xlu0 %5308 }
0x4242   :  { %v5311_v38 = vmul.f32 %v8193_v36, %v5309_v37 }
0x4244   :  { %5313 = vrot.lane.b32.xlu1 %v5311_v38, %s8444_s23 }
0x42b6   :  { %v5314_v40 = vpop.permute.xlu1 %5313 }
0x42b7   :  { %v5316_v12 = vadd.f32 %v5314_v40, %v5306_v19 }
0x42b9   :  { %8194 = vtanh.f32 %v5316_v12 }
0x42c6   :  { %v8195_v41 = vpop.eup %8194 }
0x42c7   :  { %5319 = vrot.lane.b32.xlu0 %v8195_v41, %s8444_s23 }
0x4339   :  { %v5320_v42 = vpop.permute.xlu0 %5319 }
0x433a   :  { %v5322_v44 = vmul.f32 %v8193_v36, %v5320_v42 }
0x433c   :  { %5324 = vrot.lane.b32.xlu1 %v5322_v44, %s8456_s0 }
0x43ae   :  { %v9273_v16 = vpop.permute.xlu1 %5324 }
0x43af   :  { %7852 = vmatmul.mubr.msk.f32.vlgmr.msra.gmra.mxu0 %vm746_vm4, %v9273_v16 }
0x43b0   :  { %7860 = vmatpush3.msra.mxu0 %v9162_v52  ;;  %7861 = vmatprep.mubr.msk.f32.mxu0 %vm8454_vm0, %v8453_v1 }
0x43b1   :  { %7869 = vmatprep.subr.mxu0 %v8453_v1 }
0x446f   :  { %v5394_v47 = vpop.f32.mrf.mxu0 }
0x4470   :  { %v5398_v10 = vadd.f32 %v5394_v47, %v4702_v46 }
0x4471   :  { %v7853_v50 = vpop.f32.mrf.mxu0 }
0x4472   :  { %8196 = vtanh.f32 %v5398_v10  ;;  %v7352_v26 = vmul.f32 -1.442695, %v5398_v10 }
0x4474   :  { %8198 = vpow2.f32 %v7352_v26 }
0x447f   :  { %v8197_v51 = vpop.eup %8196 }
0x4480   :  { %5408 = vrot.lane.b32.xlu0 %v8197_v51, %s8455_s25  ;;  %v9341_v51 = vld [vmem:[%s9512_s3 + $0x20] sm:$0xff] }
0x4481   :  { %v8199_v54 = vpop.eup %8198 }
0x4482   :  { %v5402_v56 = vadd.f32 1.0, %v8199_v54  ;;  %v6310_v54 = vld [vmem:[#allocation9 + $0x8] sm:$0x3] }
0x4484   :  { %8200 = vrcp.f32 %v5402_v56 }
0x4491   :  { %v8201_v33 = vpop.eup %8200 }
0x4492   :  { %v5406_v63 = vmul.f32 %v8201_v33, %v5316_v12 }
0x44f2   :  { %v5409_v60 = vpop.permute.xlu0 %5408 }
0x44f3   :  { %v5411_v62 = vmul.f32 %v8201_v33, %v5409_v60 }
0x44f5   :  { %5413 = vrot.lane.b32.xlu1 %v5411_v62, %s8444_s23 }
0x4567   :  { %v5414_v20 = vpop.permute.xlu1 %5413 }
0x4568   :  { %v5416_v58 = vadd.f32 %v5414_v20, %v5406_v63 }
0x456a   :  { %8202 = vtanh.f32 %v5416_v58 }
0x4577   :  { %v8203_v0 = vpop.eup %8202 }
0x4578   :  { %5419 = vrot.lane.b32.xlu0 %v8203_v0, %s8444_s23 }
0x45ea   :  { %v5420_v3 = vpop.permute.xlu0 %5419 }
0x45eb   :  { %v5422_v45 = vmul.f32 %v8201_v33, %v5420_v3 }
0x45ed   :  { %5424 = vrot.lane.b32.xlu1 %v5422_v45, %s8456_s0 }
0x465f   :  { %v5425_v7 = vpop.permute.xlu1 %5424 }
0x4660   :  { %7857 = vmatmul.mubr.msk.f32.vlgmr.msra.gmra.mxu1 %vm746_vm4, %v5425_v7 }
0x4661   :  { %7865 = vmatpush3.msra.mxu1 %v9162_v52  ;;  %7866 = vmatprep.mubr.msk.f32.mxu1 %vm8454_vm0, %v8453_v1 }
0x4662   :  { %7874 = vmatprep.subr.mxu1 %v8453_v1 }
0x4720   :  { %v5494_v57 = vpop.f32.mrf.mxu1 }
0x4721   :  { %v5498_v55 = vadd.f32 %v5494_v57, %v4772_v11 }
0x4722   :  { %v7858_v13 = vpop.f32.mrf.mxu1 }
0x4723   :  { %8204 = vtanh.f32 %v5498_v55  ;;  %v7354_v5 = vmul.f32 -1.442695, %v5498_v55 }
0x4725   :  { %8206 = vpow2.f32 %v7354_v5 }
0x4730   :  { %v8205_v15 = vpop.eup %8204 }
0x4731   :  { %5508 = vrot.lane.b32.xlu0 %v8205_v15, %s8455_s25  ;;  %v6312_v15 = vld [vmem:[#allocation11 + $0x8] sm:$0x3] }
0x4732   :  { %v8207_v17 = vpop.eup %8206 }
0x4733   :  { %v5502_v18 = vadd.f32 1.0, %v8207_v17 }
0x4735   :  { %8208 = vrcp.f32 %v5502_v18 }
0x4742   :  { %v8209_v52 = vpop.eup %8208 }
0x4743   :  { %v5506_v61 = vmul.f32 %v8209_v52, %v5416_v58 }
0x47a3   :  { %v5509_v21 = vpop.permute.xlu0 %5508 }
0x47a4   :  { %v5511_v22 = vmul.f32 %v8209_v52, %v5509_v21 }
0x47a6   :  { %5513 = vrot.lane.b32.xlu1 %v5511_v22, %s8444_s23 }
0x4818   :  { %v5514_v25 = vpop.permute.xlu1 %5513 }
0x4819   :  { %v5516_v49 = vadd.f32 %v5514_v25, %v5506_v61 }
0x481b   :  { %8210 = vtanh.f32 %v5516_v49 }
0x4828   :  { %v8211_v53 = vpop.eup %8210 }
0x4829   :  { %5519 = vrot.lane.b32.xlu0 %v8211_v53, %s8444_s23 }
0x489b   :  { %v5520_v24 = vpop.permute.xlu0 %5519 }
0x489c   :  { %v5522_v27 = vmul.f32 %v8209_v52, %v5520_v24 }
0x489e   :  { %5524 = vrot.lane.b32.xlu1 %v5522_v27, %s8456_s0 }
0x4910   :  { %v9300_v30 = vpop.permute.xlu1 %5524 }
0x4911   :  { %7862 = vmatmul.mubr.msk.f32.vlgmr.msra.gmra.mxu0 %vm746_vm4, %v9300_v30 }
0x4912   :  { %7870 = vmatpush3.msra.mxu0 %v9298_v29  ;;  %7871 = vmatprep.mubr.msk.f32.mxu0 %vm8454_vm0, %v8453_v1 }
0x4913   :  { %7879 = vmatprep.subr.mxu0 %v8453_v1 }
0x4915   :  { %7872 = vmatmul.mubr.msk.f32.vlgmr.msra.gmra.mxu0 %vm746_vm4, %v9229_v43  ;;  %v4842_v43 = vadd.f32 %v9199_v14, %v9201_v28 }
0x4916   :  { %7880 = vmatpush3.msra.mxu0 %v9298_v29  ;;  %7881 = vmatprep.mubr.msk.f32.mxu0 %vm8454_vm0, %v8453_v1 }
0x4917   :  { %7889 = vmatprep.subr.mxu0 %v8453_v1 }
0x4919   :  { %7882 = vmatmul.mubr.msk.f32.vlgmr.msra.gmra.mxu0 %vm746_vm4, %v9259_v59 }
0x491a   :  { %7890 = vmatpush3.msra.mxu0 %v9298_v29  ;;  %7891 = vmatprep.mubr.msk.f32.mxu0 %vm8454_vm0, %v8453_v1 }
0x491b   :  { %7899 = vmatprep.subr.mxu0 %v8453_v1 }
0x491d   :  { %7892 = vmatmul.mubr.msk.f32.vlgmr.msra.gmra.mxu0 %vm746_vm4, %v5425_v7 }
0x491e   :  { %7900 = vmatpush3.msra.mxu0 %v9298_v29  ;;  %7901 = vmatprep.mubr.msk.f32.mxu0 %vm8454_vm0, %v8453_v1 }
0x491f   :  { %7909 = vmatprep.subr.mxu0 %v8453_v1 }
0x49d1   :  { %v5594_v59 = vpop.f32.mrf.mxu0 }
0x49d2   :  { %v5598_v6 = vadd.f32 %v5594_v59, %v4842_v43 }
0x49d3   :  { %v7863_v9 = vpop.f32.mrf.mxu0 }
0x49d4   :  { %8212 = vtanh.f32 %v5598_v6  ;;  %v7356_v38 = vmul.f32 -1.442695, %v5598_v6 }
0x49d5   :  { %v5813_v31 = vpop.f32.mrf.mxu0 }
0x49d6   :  { %8214 = vpow2.f32 %v7356_v38 }
0x49d7   :  { %v7873_v32 = vpop.f32.mrf.mxu0 }
0x49d9   :  { %v9327_v34 = vpop.f32.mrf.mxu0 }
0x49db   :  { %v7883_v35 = vpop.f32.mrf.mxu0 }
0x49dd   :  { %v9329_v8 = vpop.f32.mrf.mxu0 }
0x49df   :  { %v7893_v36 = vpop.f32.mrf.mxu0 }
0x49e1   :  { %v8213_v37 = vpop.eup %8212 }
0x49e2   :  { %5608 = vrot.lane.b32.xlu0 %v8213_v37, %s8455_s25 }
0x49e3   :  { %v8215_v19 = vpop.eup %8214 }
0x49e4   :  { %v5602_v40 = vadd.f32 1.0, %v8215_v19 }
0x49e6   :  { %8216 = vrcp.f32 %v5602_v40 }
0x49f3   :  { %v8217_v28 = vpop.eup %8216 }
0x49f4   :  { %v5606_v42 = vmul.f32 %v8217_v28, %v5516_v49 }
0x4a54   :  { %v5609_v12 = vpop.permute.xlu0 %5608 }
0x4a55   :  { %v5611_v41 = vmul.f32 %v8217_v28, %v5609_v12 }
0x4a57   :  { %5613 = vrot.lane.b32.xlu1 %v5611_v41, %s8444_s23 }
0x4ac9   :  { %v5614_v44 = vpop.permute.xlu1 %5613 }
0x4aca   :  { %v9333_v46 = vadd.f32 %v5614_v44, %v5606_v42 }
0x4acc   :  { %8218 = vtanh.f32 %v9333_v46 }
0x4ad9   :  { %v8219_v47 = vpop.eup %8218 }
0x4ada   :  { %5619 = vrot.lane.b32.xlu0 %v8219_v47, %s8444_s23 }
0x4b4c   :  { %v5620_v10 = vpop.permute.xlu0 %5619 }
0x4b4d   :  { %v5622_v50 = vmul.f32 %v8217_v28, %v5620_v10 }
0x4b4f   :  { %5624 = vrot.lane.b32.xlu1 %v5622_v50, %s8456_s0 }
0x4bc1   :  { %v5625_v26 = vpop.permute.xlu1 %5624 }
0x4bc2   :  { %7867 = vmatmul.mubr.msk.f32.vlgmr.msra.gmra.mxu1 %vm746_vm4, %v5625_v26  ;;  %7902 = vmatmul.mubr.msk.f32.vlgmr.msra.gmra.mxu0 %vm746_vm4, %v5625_v26 }
0x4bc3   :  { %7910 = vmatpush3.msra.mxu0 %v9341_v51  ;;  %7875 = vmatpush3.msra.mxu1 %v9298_v29 }
0x4bc4   :  { %7876 = vmatprep.mubr.msk.f32.mxu1 %vm8454_vm0, %v8453_v1  ;;  %7911 = vmatprep.mubr.msk.f32.mxu0 %vm8454_vm0, %v8453_v1 }
0x4bc5   :  { %7884 = vmatprep.subr.mxu1 %v8453_v1  ;;  %7919 = vmatprep.subr.mxu0 %v8453_v1 }
0x4bc6   :  { %7877 = vmatmul.mubr.msk.f32.vlgmr.msra.gmra.mxu1 %vm746_vm4, %v9245_v4  ;;  %7912 = vmatmul.mubr.msk.f32.vlgmr.msra.gmra.mxu0 %vm746_vm4, %v6310_v54  ;;  %v4914_v4 = vadd.f32 %v9199_v14, %v9237_v2 }
0x4bc7   :  { %7885 = vmatpush3.msra.mxu1 %v9298_v29  ;;  %7886 = vmatprep.mubr.msk.f32.mxu1 %vm8454_vm0, %v8453_v1 }
0x4bc8   :  { %7894 = vmatprep.subr.mxu1 %v8453_v1  ;;  %7920 = vmatpush3.msra.mxu0 %v9341_v51 }
0x4bc9   :  { %7921 = vmatprep.mubr.msk.f32.mxu0 %vm8454_vm0, %v8453_v1  ;;  %7929 = vmatprep.subr.mxu0 %v8453_v1 }
0x4bca   :  { %7887 = vmatmul.mubr.msk.f32.vlgmr.msra.gmra.mxu1 %vm746_vm4, %v9273_v16  ;;  %v9378_v16 = vld [vmem:[#allocation8 + $0x4] ss:$0 sm:$0xff] }
0x4bcb   :  { %7895 = vmatpush3.msra.mxu1 %v9298_v29  ;;  %7896 = vmatprep.mubr.msk.f32.mxu1 %vm8454_vm0, %v8453_v1  ;;  %v5814_v20 = vadd.f32 %v9378_v16, %v5813_v31 }
0x4bcc   :  { %7904 = vmatprep.subr.mxu1 %v8453_v1 }
0x4bce   :  { %7897 = vmatmul.mubr.msk.f32.vlgmr.msra.gmra.mxu1 %vm746_vm4, %v9300_v30 }
0x4bcf   :  { %7905 = vmatpush3.msra.mxu1 %v9298_v29  ;;  %7906 = vmatprep.mubr.msk.f32.mxu1 %vm8454_vm0, %v8453_v1 }
0x4bd0   :  { %7914 = vmatprep.subr.mxu1 %v8453_v1 }
0x4c82   :  { %v5694_v56 = vpop.f32.mrf.mxu1  ;;  %v9380_v33 = vpop.f32.mrf.mxu0 }
0x4c83   :  { %v5698_v60 = vadd.f32 %v5694_v56, %v4914_v4 }
0x4c84   :  { %v7868_v62 = vpop.f32.mrf.mxu1  ;;  %v7903_v63 = vpop.f32.mrf.mxu0 }
0x4c85   :  { %8220 = vtanh.f32 %v5698_v60  ;;  %v7358_v5 = vmul.f32 -1.442695, %v5698_v60 }
0x4c86   :  { %v9383_v58 = vpop.f32.mrf.mxu1  ;;  %v6382_v0 = vpop.f32.mrf.mxu0 }
0x4c87   :  { %v6386_v3 = vadd.f32 %v6382_v0, %v5814_v20  ;;  %v5884_v42 = vadd.f32 %v9378_v16, %v9383_v58 }
0x4c88   :  { %v7878_v45 = vpop.f32.mrf.mxu1  ;;  %v7913_v7 = vpop.f32.mrf.mxu0 }
0x4c89   :  { %8222 = vtanh.f32 %v6386_v3  ;;  %v7370_v17 = vmul.f32 -1.442695, %v6386_v3  ;;  %v5954_v7 = vadd.f32 %v9378_v16, %v9327_v34 }
0x4c8a   :  { %v9385_v11 = vpop.f32.mrf.mxu1  ;;  %8224 = vpow2.f32 %v7358_v5 }
0x4c8b   :  { %8226 = vpow2.f32 %v7370_v17 }
0x4c8c   :  { %v7888_v14 = vpop.f32.mrf.mxu1 }
0x4c8e   :  { %v9387_v2 = vpop.f32.mrf.mxu1 }
0x4c90   :  { %v7898_v57 = vpop.f32.mrf.mxu1 }
0x4c92   :  { %v8221_v55 = vpop.eup %8220 }
0x4c93   :  { %5708 = vrot.lane.b32.xlu0 %v8221_v55, %s8455_s25 }
0x4c96   :  { %v8223_v13 = vpop.eup %8222 }
0x4c97   :  { %6400 = vrot.lane.b32.xlu1 %v8223_v13, %s8455_s25  ;;  %v8225_v18 = vpop.eup %8224 }
0x4c98   :  { %v5702_v52 = vadd.f32 1.0, %v8225_v18  ;;  %v8227_v21 = vpop.eup %8226 }
0x4c99   :  { %v6390_v22 = vadd.f32 1.0, %v8227_v21 }
0x4c9a   :  { %8228 = vrcp.f32 %v5702_v52 }
0x4c9b   :  { %6395 = vrot.lane.b32.xlu1 %v6312_v15, %s8444_s23  ;;  %8230 = vrcp.f32 %v6390_v22 }
0x4ca7   :  { %v8229_v61 = vpop.eup %8228 }
0x4ca8   :  { %v8231_v53 = vpop.eup %8230  ;;  %v5706_v29 = vmul.f32 %v8229_v61, %v9333_v46 }
0x4d05   :  { %v5709_v25 = vpop.permute.xlu0 %5708 }
0x4d06   :  { %v5711_v49 = vmul.f32 %v8229_v61, %v5709_v25 }
0x4d08   :  { %5713 = vrot.lane.b32.xlu0 %v5711_v49, %s8444_s23 }
0x4d09   :  { %v6401_v24 = vpop.permute.xlu1 %6400 }
0x4d0a   :  { %v6403_v27 = vmul.f32 %v8231_v53, %v6401_v24 }
0x4d0c   :  { %6405 = vrot.lane.b32.xlu0 %v6403_v27, %s8444_s23  ;;  %v6024_v27 = vadd.f32 %v9378_v16, %v9385_v11 }
0x4d0d   :  { %v6396_v30 = vpop.permute.xlu1 %6395 }
0x4d0e   :  { %v6398_v6 = vmul.f32 %v8231_v53, %v6396_v30 }
0x4d7a   :  { %v5714_v43 = vpop.permute.xlu0 %5713 }
0x4d7b   :  { %v9395_v59 = vadd.f32 %v5714_v43, %v5706_v29 }
0x4d7d   :  { %8232 = vtanh.f32 %v9395_v59 }
0x4d7e   :  { %v6406_v9 = vpop.permute.xlu0 %6405 }
0x4d7f   :  { %v6408_v31 = vadd.f32 %v6406_v9, %v6398_v6 }
0x4d81   :  { %8234 = vtanh.f32 %v6408_v31 }
0x4d8a   :  { %v8233_v32 = vpop.eup %8232 }
0x4d8b   :  { %5719 = vrot.lane.b32.xlu1 %v8233_v32, %s8444_s23 }
0x4d8e   :  { %v8235_v35 = vpop.eup %8234 }
0x4d8f   :  { %6411 = vrot.lane.b32.xlu0 %v8235_v35, %s8444_s23 }
0x4dfd   :  { %v5720_v36 = vpop.permute.xlu1 %5719 }
0x4dfe   :  { %v5722_v37 = vmul.f32 %v8229_v61, %v5720_v36 }
0x4e00   :  { %5724 = vrot.lane.b32.xlu1 %v5722_v37, %s8456_s0 }
0x4e01   :  { %v6412_v38 = vpop.permute.xlu0 %6411 }
0x4e02   :  { %v6414_v19 = vmul.f32 %v8231_v53, %v6412_v38 }
0x4e04   :  { %6416 = vrot.lane.b32.xlu0 %v6414_v19, %s8456_s0 }
0x4e72   :  { %v5725_v40 = vpop.permute.xlu1 %5724 }
0x4e73   :  { %5728 = vst.msk [vmem:[#allocation12 + $0x6] sm:$0x3] %vm1553_vm5, %v5725_v40  ;;  %7907 = vmatmul.mubr.msk.f32.vlgmr.msra.gmra.mxu1 %vm746_vm4, %v5725_v40 }
0x4e74   :  { %7915 = vmatpush3.msra.mxu1 %v9341_v51  ;;  %7916 = vmatprep.mubr.msk.f32.mxu1 %vm8454_vm0, %v8453_v1 }
0x4e75   :  { %7924 = vmatprep.subr.mxu1 %v8453_v1 }
0x4e76   :  { %v6417_v28 = vpop.permute.xlu0 %6416 }
0x4e77   :  { %7917 = vmatmul.mubr.msk.f32.vlgmr.msra.gmra.mxu1 %vm746_vm4, %v6417_v28 }
0x4e78   :  { %7925 = vmatpush3.msra.mxu1 %v9341_v51  ;;  %7926 = vmatprep.mubr.msk.f32.mxu1 %vm8454_vm0, %v8453_v1 }
0x4e79   :  { %7934 = vmatprep.subr.mxu1 %v8453_v1 }
0x4f33   :  { %v9413_v12 = vpop.f32.mrf.mxu1 }
0x4f35   :  { %v7908_v41 = vpop.f32.mrf.mxu1 }
0x4f37   :  { %v6486_v44 = vpop.f32.mrf.mxu1 }
0x4f38   :  { %v6490_v46 = vadd.f32 %v6486_v44, %v5884_v42  ;;  %v6094_v44 = vadd.f32 %v9378_v16, %v9329_v8 }
0x4f39   :  { %v7918_v47 = vpop.f32.mrf.mxu1 }
0x4f3a   :  { %8236 = vtanh.f32 %v6490_v46  ;;  %v7372_v50 = vmul.f32 -1.442695, %v6490_v46 }
0x4f3c   :  { %8238 = vpow2.f32 %v7372_v50 }
0x4f47   :  { %v8237_v10 = vpop.eup %8236 }
0x4f48   :  { %6500 = vrot.lane.b32.xlu1 %v8237_v10, %s8455_s25 }
0x4f49   :  { %v8239_v26 = vpop.eup %8238 }
0x4f4a   :  { %v6494_v54 = vadd.f32 1.0, %v8239_v26 }
0x4f4c   :  { %8240 = vrcp.f32 %v6494_v54 }
0x4f59   :  { %v8241_v4 = vpop.eup %8240 }
0x4f5a   :  { %v6498_v62 = vmul.f32 %v8241_v4, %v6408_v31 }
0x4fba   :  { %v6501_v56 = vpop.permute.xlu1 %6500 }
0x4fbb   :  { %v6503_v60 = vmul.f32 %v8241_v4, %v6501_v56 }
0x4fbd   :  { %6505 = vrot.lane.b32.xlu0 %v6503_v60, %s8444_s23 }
0x502f   :  { %v6506_v63 = vpop.permute.xlu0 %6505 }
0x5030   :  { %v6508_v20 = vadd.f32 %v6506_v63, %v6498_v62 }
0x5032   :  { %8242 = vtanh.f32 %v6508_v20 }
0x503f   :  { %v8243_v58 = vpop.eup %8242 }
0x5040   :  { %6511 = vrot.lane.b32.xlu1 %v8243_v58, %s8444_s23 }
0x50b2   :  { %v6512_v0 = vpop.permute.xlu1 %6511 }
0x50b3   :  { %v6514_v3 = vmul.f32 %v8241_v4, %v6512_v0 }
0x50b5   :  { %6516 = vrot.lane.b32.xlu0 %v6514_v3, %s8456_s0 }
0x5127   :  { %v6517_v45 = vpop.permute.xlu0 %6516 }
0x5128   :  { %7922 = vmatmul.mubr.msk.f32.vlgmr.msra.gmra.mxu0 %vm746_vm4, %v6517_v45 }
0x5129   :  { %7930 = vmatpush3.msra.mxu0 %v9341_v51  ;;  %7931 = vmatprep.mubr.msk.f32.mxu0 %vm8454_vm0, %v8453_v1 }
0x512a   :  { %7939 = vmatprep.subr.mxu0 %v8453_v1 }
0x51e8   :  { %v6586_v14 = vpop.f32.mrf.mxu0 }
0x51e9   :  { %v6590_v57 = vadd.f32 %v6586_v14, %v5954_v7  ;;  %v6164_v7 = vadd.f32 %v9378_v16, %v9387_v2 }
0x51ea   :  { %v7923_v55 = vpop.f32.mrf.mxu0 }
0x51eb   :  { %8244 = vtanh.f32 %v6590_v57  ;;  %v7374_v15 = vmul.f32 -1.442695, %v6590_v57 }
0x51ed   :  { %8246 = vpow2.f32 %v7374_v15 }
0x51f8   :  { %v8245_v13 = vpop.eup %8244 }
0x51f9   :  { %6600 = vrot.lane.b32.xlu1 %v8245_v13, %s8455_s25 }
0x51fa   :  { %v8247_v5 = vpop.eup %8246 }
0x51fb   :  { %v6594_v17 = vadd.f32 1.0, %v8247_v5 }
0x51fd   :  { %8248 = vrcp.f32 %v6594_v17 }
0x520a   :  { %v8249_v18 = vpop.eup %8248 }
0x520b   :  { %v6598_v22 = vmul.f32 %v8249_v18, %v6508_v20 }
0x526b   :  { %v6601_v52 = vpop.permute.xlu1 %6600 }
0x526c   :  { %v6603_v21 = vmul.f32 %v8249_v18, %v6601_v52 }
0x526e   :  { %6605 = vrot.lane.b32.xlu0 %v6603_v21, %s8444_s23 }
0x52e0   :  { %v6606_v61 = vpop.permute.xlu0 %6605 }
0x52e1   :  { %v6608_v34 = vadd.f32 %v6606_v61, %v6598_v22 }
0x52e3   :  { %8250 = vtanh.f32 %v6608_v34 }
0x52f0   :  { %v8251_v25 = vpop.eup %8250 }
0x52f1   :  { %6611 = vrot.lane.b32.xlu1 %v8251_v25, %s8444_s23 }
0x5363   :  { %v6612_v49 = vpop.permute.xlu1 %6611 }
0x5364   :  { %v6614_v53 = vmul.f32 %v8249_v18, %v6612_v49 }
0x5366   :  { %6616 = vrot.lane.b32.xlu0 %v6614_v53, %s8456_s0  ;;  %v6234_v53 = vadd.f32 %v9378_v16, %v9380_v33 }
0x53d8   :  { %v6617_v24 = vpop.permute.xlu0 %6616 }
0x53d9   :  { %7927 = vmatmul.mubr.msk.f32.vlgmr.msra.gmra.mxu1 %vm746_vm4, %v6617_v24 }
0x53da   :  { %7935 = vmatpush3.msra.mxu1 %v9341_v51  ;;  %7936 = vmatprep.mubr.msk.f32.mxu1 %vm8454_vm0, %v8453_v1 }
0x53db   :  { %7944 = vmatprep.subr.mxu1 %v8453_v1 }
0x5499   :  { %v6686_v29 = vpop.f32.mrf.mxu1 }
0x549a   :  { %v6690_v30 = vadd.f32 %v6686_v29, %v6024_v27 }
0x549b   :  { %v7928_v43 = vpop.f32.mrf.mxu1 }
0x549c   :  { %8252 = vtanh.f32 %v6690_v30  ;;  %v7376_v9 = vmul.f32 -1.442695, %v6690_v30 }
0x549e   :  { %8254 = vpow2.f32 %v7376_v9 }
0x54a9   :  { %v8253_v6 = vpop.eup %8252 }
0x54aa   :  { %6700 = vrot.lane.b32.xlu1 %v8253_v6, %s8455_s25 }
0x54ab   :  { %v8255_v31 = vpop.eup %8254 }
0x54ac   :  { %v6694_v32 = vadd.f32 1.0, %v8255_v31 }
0x54ae   :  { %8256 = vrcp.f32 %v6694_v32 }
0x54bb   :  { %v8257_v35 = vpop.eup %8256 }
0x54bc   :  { %v6698_v38 = vmul.f32 %v8257_v35, %v6608_v34 }
0x551c   :  { %v6701_v36 = vpop.permute.xlu1 %6700 }
0x551d   :  { %v6703_v37 = vmul.f32 %v8257_v35, %v6701_v36 }
0x551f   :  { %6705 = vrot.lane.b32.xlu0 %v6703_v37, %s8444_s23 }
0x5591   :  { %v6706_v19 = vpop.permute.xlu0 %6705 }
0x5592   :  { %v6708_v11 = vadd.f32 %v6706_v19, %v6698_v38 }
0x5594   :  { %8258 = vtanh.f32 %v6708_v11 }
0x55a1   :  { %v8259_v40 = vpop.eup %8258 }
0x55a2   :  { %6711 = vrot.lane.b32.xlu1 %v8259_v40, %s8444_s23  ;;  %v6306_v40 = vadd.f32 %v9378_v16, %v9413_v12 }
0x5614   :  { %v6712_v28 = vpop.permute.xlu1 %6711 }
0x5615   :  { %v6714_v41 = vmul.f32 %v8257_v35, %v6712_v28 }
0x5617   :  { %6716 = vrot.lane.b32.xlu0 %v6714_v41, %s8456_s0 }
0x5689   :  { %v6717_v42 = vpop.permute.xlu0 %6716 }
0x568a   :  { %7932 = vmatmul.mubr.msk.f32.vlgmr.msra.gmra.mxu0 %vm746_vm4, %v6717_v42 }
0x568b   :  { %7940 = vmatpush3.msra.mxu0 %v9341_v51  ;;  %7941 = vmatprep.mubr.msk.f32.mxu0 %vm8454_vm0, %v8453_v1 }
0x568c   :  { %7949 = vmatprep.subr.mxu0 %v8453_v1 }
0x574a   :  { %v6786_v46 = vpop.f32.mrf.mxu0 }
0x574b   :  { %v6790_v47 = vadd.f32 %v6786_v46, %v6094_v44 }
0x574c   :  { %v7933_v10 = vpop.f32.mrf.mxu0 }
0x574d   :  { %8260 = vtanh.f32 %v6790_v47  ;;  %v7378_v26 = vmul.f32 -1.442695, %v6790_v47 }
0x574f   :  { %8262 = vpow2.f32 %v7378_v26 }
0x575a   :  { %v8261_v50 = vpop.eup %8260 }
0x575b   :  { %6800 = vrot.lane.b32.xlu1 %v8261_v50, %s8455_s25 }
0x575c   :  { %v8263_v54 = vpop.eup %8262 }
0x575d   :  { %v6794_v4 = vadd.f32 1.0, %v8263_v54 }
0x575f   :  { %8264 = vrcp.f32 %v6794_v4 }
0x576c   :  { %v8265_v56 = vpop.eup %8264 }
0x576d   :  { %v6798_v63 = vmul.f32 %v8265_v56, %v6708_v11 }
0x57cd   :  { %v6801_v60 = vpop.permute.xlu1 %6800 }
0x57ce   :  { %v6803_v62 = vmul.f32 %v8265_v56, %v6801_v60  ;;  %v7127_v60 = vld [vmem:[%s9516_s7] sm:$0xff]  ;;  %s8458_s7 = smov [#allocation12]  }
0x57d0   :  { %6805 = vrot.lane.b32.xlu0 %v6803_v62, %s8444_s23 }
0x5842   :  { %v6806_v20 = vpop.permute.xlu0 %6805 }
0x5843   :  { %v6808_v8 = vadd.f32 %v6806_v20, %v6798_v63 }
0x5845   :  { %8266 = vtanh.f32 %v6808_v8 }
0x5852   :  { %v8267_v58 = vpop.eup %8266 }
0x5853   :  { %6811 = vrot.lane.b32.xlu1 %v8267_v58, %s8444_s23 }
0x58c5   :  { %v6812_v0 = vpop.permute.xlu1 %6811 }
0x58c6   :  { %v6814_v3 = vmul.f32 %v8265_v56, %v6812_v0 }
0x58c8   :  { %6816 = vrot.lane.b32.xlu0 %v6814_v3, %s8456_s0 }
0x593a   :  { %v6817_v45 = vpop.permute.xlu0 %6816 }
0x593b   :  { %7937 = vmatmul.mubr.msk.f32.vlgmr.msra.gmra.mxu1 %vm746_vm4, %v6817_v45 }
0x593c   :  { %7945 = vmatpush3.msra.mxu1 %v9341_v51  ;;  %7946 = vmatprep.mubr.msk.f32.mxu1 %vm8454_vm0, %v8453_v1 }
0x59fb   :  { %v6886_v14 = vpop.f32.mrf.mxu1 }
0x59fc   :  { %v6890_v57 = vadd.f32 %v6886_v14, %v6164_v7 }
0x59fd   :  { %v7938_v55 = vpop.f32.mrf.mxu1 }
0x59fe   :  { %8268 = vtanh.f32 %v6890_v57  ;;  %v7380_v15 = vmul.f32 -1.442695, %v6890_v57 }
0x5a00   :  { %8270 = vpow2.f32 %v7380_v15 }
0x5a0b   :  { %v8269_v13 = vpop.eup %8268 }
0x5a0c   :  { %6900 = vrot.lane.b32.xlu1 %v8269_v13, %s8455_s25 }
0x5a0d   :  { %v8271_v5 = vpop.eup %8270 }
0x5a0e   :  { %v6894_v17 = vadd.f32 1.0, %v8271_v5 }
0x5a10   :  { %8272 = vrcp.f32 %v6894_v17 }
0x5a1d   :  { %v8273_v18 = vpop.eup %8272 }
0x5a1e   :  { %v6898_v21 = vmul.f32 %v8273_v18, %v6808_v8 }
0x5a7e   :  { %v6901_v51 = vpop.permute.xlu1 %6900 }
0x5a7f   :  { %v6903_v52 = vmul.f32 %v8273_v18, %v6901_v51 }
0x5a81   :  { %6905 = vrot.lane.b32.xlu0 %v6903_v52, %s8444_s23 }
0x5af3   :  { %v6906_v22 = vpop.permute.xlu0 %6905 }
0x5af4   :  { %v6908_v2 = vadd.f32 %v6906_v22, %v6898_v21 }
0x5af6   :  { %8274 = vtanh.f32 %v6908_v2 }
0x5b03   :  { %v8275_v61 = vpop.eup %8274 }
0x5b04   :  { %6911 = vrot.lane.b32.xlu1 %v8275_v61, %s8444_s23 }
0x5b76   :  { %v6912_v34 = vpop.permute.xlu1 %6911 }
0x5b77   :  { %v6914_v25 = vmul.f32 %v8273_v18, %v6912_v34 }
0x5b79   :  { %6916 = vrot.lane.b32.xlu0 %v6914_v25, %s8456_s0 }
0x5beb   :  { %v6917_v49 = vpop.permute.xlu0 %6916 }
0x5bec   :  { %7942 = vmatmul.mubr.msk.f32.vlgmr.msra.gmra.mxu0 %vm746_vm4, %v6917_v49 }
0x5bed   :  { %7951 = vmatprep.mubr.msk.f32.mxu0 %vm8454_vm0, %v8453_v1  ;;  %7950 = vmatpush3.msra.mxu0 %v7127_v60 }
0x5cac   :  { %v6986_v24 = vpop.f32.mrf.mxu0 }
0x5cad   :  { %v6990_v27 = vadd.f32 %v6986_v24, %v6234_v53 }
0x5cae   :  { %v7943_v29 = vpop.f32.mrf.mxu0 }
0x5caf   :  { %8276 = vtanh.f32 %v6990_v27  ;;  %v7382_v43 = vmul.f32 -1.442695, %v6990_v27 }
0x5cb1   :  { %8278 = vpow2.f32 %v7382_v43 }
0x5cbc   :  { %v8277_v30 = vpop.eup %8276 }
0x5cbd   :  { %7000 = vrot.lane.b32.xlu1 %v8277_v30, %s8455_s25 }
0x5cbe   :  { %v8279_v6 = vpop.eup %8278 }
0x5cbf   :  { %v6994_v9 = vadd.f32 1.0, %v8279_v6 }
0x5cc1   :  { %8280 = vrcp.f32 %v6994_v9 }
0x5cce   :  { %v8281_v31 = vpop.eup %8280 }
0x5ccf   :  { %v6998_v1 = vmul.f32 %v8281_v31, %v6908_v2 }
0x5d2f   :  { %v7001_v32 = vpop.permute.xlu1 %7000 }
0x5d30   :  { %v7003_v35 = vmul.f32 %v8281_v31, %v7001_v32 }
0x5d32   :  { %7005 = vrot.lane.b32.xlu0 %v7003_v35, %s8444_s23 }
0x5da4   :  { %v7006_v36 = vpop.permute.xlu0 %7005 }
0x5da5   :  { %v7008_v33 = vadd.f32 %v7006_v36, %v6998_v1 }
0x5da7   :  { %8282 = vtanh.f32 %v7008_v33 }
0x5db4   :  { %v8283_v37 = vpop.eup %8282 }
0x5db5   :  { %7011 = vrot.lane.b32.xlu1 %v8283_v37, %s8444_s23 }
0x5e27   :  { %v7012_v38 = vpop.permute.xlu1 %7011 }
0x5e28   :  { %v7014_v19 = vmul.f32 %v8281_v31, %v7012_v38 }
0x5e2a   :  { %7016 = vrot.lane.b32.xlu0 %v7014_v19, %s8456_s0 }
0x5e9c   :  { %v7017_v11 = vpop.permute.xlu0 %7016 }
0x5e9d   :  { %7947 = vmatmul.mubr.msk.f32.vlgmr.msra.gmra.mxu1 %vm746_vm4, %v7017_v11 }
0x5f5d   :  { %v7086_v28 = vpop.f32.mrf.mxu1 }
0x5f5e   :  { %v7090_v41 = vadd.f32 %v7086_v28, %v6306_v40 }
0x5f5f   :  { %v7948_v42 = vpop.f32.mrf.mxu1 }
0x5f60   :  { %8284 = vtanh.f32 %v7090_v41  ;;  %v7384_v46 = vmul.f32 -1.442695, %v7090_v41 }
0x5f62   :  { %8286 = vpow2.f32 %v7384_v46 }
0x5f6d   :  { %v8285_v44 = vpop.eup %8284 }
0x5f6e   :  { %7100 = vrot.lane.b32.xlu1 %v8285_v44, %s8455_s25  ;;  %s8457_s25 = smov 120  }
0x5f6f   :  { %v8287_v47 = vpop.eup %8286 }
0x5f70   :  { %v7094_v10 = vadd.f32 1.0, %v8287_v47 }
0x5f72   :  { %8288 = vrcp.f32 %v7094_v10 }
0x5f7f   :  { %v8289_v50 = vpop.eup %8288 }
0x5f80   :  { %v7098_v4 = vmul.f32 %v8289_v50, %v7008_v33 }
0x5fe0   :  { %v7101_v26 = vpop.permute.xlu1 %7100 }
0x5fe1   :  { %v7103_v54 = vmul.f32 %v8289_v50, %v7101_v26 }
0x5fe3   :  { %7105 = vrot.lane.b32.xlu0 %v7103_v54, %s8444_s23 }
0x6055   :  { %v7106_v56 = vpop.permute.xlu0 %7105 }
0x6056   :  { %v7108_v16 = vadd.f32 %v7106_v56, %v7098_v4 }
0x6058   :  { %8290 = vtanh.f32 %v7108_v16 }
0x6065   :  { %v8291_v12 = vpop.eup %8290 }
0x6066   :  { %7111 = vrot.lane.b32.xlu1 %v8291_v12, %s8444_s23  ;;  %s7216_s23 = sshll.u32 %s8458_s7, 4  ;;  %s7217_s23 = int_to_ptr.vmem [resolvable:$true] %s7216_s23 }
0x6067   :  { %s8392_s12 = scalar_lea.vmem %s7217_s23, 160  ;;  %p8397_p12 = scmp.lt.s32.totalorder %s7217_s23, %s7217_s23 }
0x6068   :  { %p8393_p11 = scmp.ne.s32.totalorder %s7217_s23, %s8392_s12  ;;  %p8398_p13 = scmp.lt.s32.totalorder %s8392_s12, %s8392_s12 }
0x606a   :  { %1556 = vrot.lane.b32.xlu1 %v8858_v23, %s8457_s25  ;;  %p8399_p0 = por %p8398_p13, %p8397_p12 }
0x606c   :  { %p8400_p1 = pnand %p8399_p0, %p8393_p11 }
0x606e   :  { %4338 = vrot.lane.b32.xlu1 %v9216_v48, %s8457_s25 }
0x6072   :  { %7122 = vrot.lane.b32.xlu1 %v7108_v16, %s8457_s25 }
0x60d8   :  { %v7112_v62 = vpop.permute.xlu1 %7111 }
0x60d9   :  { %v7114_v63 = vmul.f32 %v8289_v50, %v7112_v62 }
0x60db   :  { %7116 = vrot.lane.b32.xlu0 %v7114_v63, %s8456_s0 }
0x60dc   :  { %v1557_v20 = vpop.permute.xlu1 %1556 }
0x60dd   :  { %1559 = vst.msk [vmem:[#allocation13] sm:$0x3] %vm1553_vm5, %v1557_v20 }
0x60df   :  { %2946 = vrot.lane.b32.xlu0 %v9037_v39, %s8457_s25 }
0x60e0   :  { %v4339_v8 = vpop.permute.xlu1 %4338 }
0x60e1   :  { %4342 = vst.msk [vmem:[#allocation13 + $0x4] sm:$0x3] %vm1553_vm5, %v4339_v8 }
0x60e3   :  { %5730 = vrot.lane.b32.xlu0 %v9395_v59, %s8457_s25 }
0x60e4   :  { %v7123_v58 = vpop.permute.xlu1 %7122 }
0x60e5   :  { %7126 = vst.msk [vmem:[#allocation13 + $0x8] sm:$0x3] %vm1553_vm5, %v7123_v58 }
0x614d   :  { %v7117_v23 = vpop.permute.xlu0 %7116 }
0x614e   :  { %7120 = vst.msk [vmem:[#allocation12 + $0x8] sm:$0x3] %vm1553_vm5, %v7117_v23  ;;  %7952 = vmatmul.mubr.msk.f32.vlgmr.msra.gmra.mxu0 %vm746_vm4, %v7117_v23 }
0x6151   :  { %v2947_v48 = vpop.permute.xlu0 %2946 }
0x6152   :  { %2950 = vst.msk [vmem:[#allocation13 + $0x2] sm:$0x3] %vm1553_vm5, %v2947_v48 }
0x6155   :  { %v5731_v0 = vpop.permute.xlu0 %5730 }
0x6156   :  { %5734 = vst.msk [vmem:[#allocation13 + $0x6] sm:$0x3] %vm1553_vm5, %v5731_v0 }
0x6157   :  { %8403 = shalt.err (!%p8400_p1)
}
0x6158   :  { %7222 = dma.vmem_to_hbm [thread:$0]  %s7217_s23, 160, %s9519_s10, [#allocation5], %s8446_s28, %s8446_s28, %s8447_s29  }
0x6159   :  { %s8412_s14 = scalar_lea.vmem %s7229_s30, 160  ;;  %p8417_p3 = scmp.lt.s32.totalorder %s7229_s30, %s7229_s30 }
0x615a   :  { %p8413_p2 = scmp.ne.s32.totalorder %s7229_s30, %s8412_s14  ;;  %p8418_p4 = scmp.lt.s32.totalorder %s8412_s14, %s8412_s14 }
0x615c   :  { %p8419_p5 = por %p8418_p4, %p8417_p3 }
0x615e   :  { %p8420_p6 = pnand %p8419_p5, %p8413_p2 }
0x6160   :  { %8423 = shalt.err (!%p8420_p6)
}
0x6161   :  { %7234 = dma.vmem_to_hbm [thread:$0]  %s7229_s30, 160, %s9520_s11, [#allocation14], %s8446_s28, %s8446_s28, %s8447_s29   ;;  %v7385_v39 = vld [vmem:[#allocation2] ss:$0 sm:$0xff]  ;;  %vm7207_vm6 = vcmask 1024  }
0x620e   :  { %v7203_v59 = vpop.f32.mrf.mxu0 }
0x620f   :  { %v7204_v3 = vadd.f32 %v7385_v39, %v7203_v59 }
0x6210   :  { %v7953_v45 = vpop.f32.mrf.mxu0 }
0x6211   :  { %7208 = vst.msk [vmem:[%s9518_s9] sm:$0x3] %vm7207_vm6, %v7204_v3 }
0x6212   :  { %8438 = dma.done.wait [#allocation5], 160  }
0x6213   :  { %8439 = vsyncadd [#allocation5], 4294967136 }
0x6214   :  { %8440 = dma.done.wait [#allocation14], 160  }
0x6215   :  { %8441 = vsyncadd [#allocation14], 4294967136 }
0x6216   :  { %7243 = vsyncpa [#allocation4], 1 }
0x6217   :  { %7244 = vsyncpa [#allocation7], 1 }
0x6218   :  { %7245 = vsyncpa [#allocation10], 1 }
0x6219   :  { %7246 = vsyncpa [#allocation5], 1 }
0x621a   :  { %7247 = vsyncpa [#allocation14], 1 }

</bundles_post_ra>
